<compile_context>
chip_gen: v7x
topology: tpu7x:2x2x1
jax: 0.10.0
libtpu: 0.0.40
codegen_flags: <defaults>
</compile_context>

<pallas_src>
import functools

import jax
import jax.numpy as jnp
from jax import lax
from jax.experimental import pallas as pl
from jax.experimental.pallas import tpu as pltpu


def _attention_kernel(x_ref, wqkv_ref, bqkv_ref, wproj_ref, bproj_ref, o_ref,
                      qkv_scr, ctx_scr, *, num_heads, scale):
    # x_ref:    VMEM (N, C)        -- one batch element (leading dim squeezed)
    # wqkv_ref: VMEM (C, 3C), bqkv_ref: VMEM (1, 3C)
    # wproj_ref:VMEM (C, C),  bproj_ref:VMEM (1, C)
    # o_ref:    VMEM (N, C)
    # qkv_scr:  VMEM (N, 3C) f32 scratch ; ctx_scr: VMEM (N, C) f32 scratch
    x = x_ref[...].astype(jnp.float32)
    C = x.shape[1]
    d = C // num_heads

    # qkv = x @ Wqkv + bqkv   (single MXU matmul for all of q, k, v)
    qkv_scr[...] = (
        jnp.dot(x, wqkv_ref[...].astype(jnp.float32),
                preferred_element_type=jnp.float32)
        + bqkv_ref[...].astype(jnp.float32)
    )

    # Per-head attention; heads laid out along the channel axis exactly like the
    # PyTorch reshape(B,N,3,H,d) -> q cols [0,C), k cols [C,2C), v cols [2C,3C),
    # head h occupying columns [h*d, (h+1)*d).
    for h in range(num_heads):
        q = qkv_scr[:, h * d:(h + 1) * d]
        k = qkv_scr[:, C + h * d:C + (h + 1) * d]
        v = qkv_scr[:, 2 * C + h * d:2 * C + (h + 1) * d]

        # scores = q @ k^T * scale   (contract on head_dim, no explicit transpose)
        s = lax.dot_general(q, k, (((1,), (1,)), ((), ())),
                            preferred_element_type=jnp.float32) * scale
        # numerically-stable softmax over keys
        s = s - jnp.max(s, axis=-1, keepdims=True)
        e = jnp.exp(s)
        p = e / jnp.sum(e, axis=-1, keepdims=True)
        # TODO(synk): attn_drop omitted (p=0.0 / eval mode => identity).

        ctx_scr[:, h * d:(h + 1) * d] = jnp.dot(p, v,
                                                preferred_element_type=jnp.float32)

    # output projection: y = ctx @ Wproj + bproj
    y = (
        jnp.dot(ctx_scr[...], wproj_ref[...].astype(jnp.float32),
                preferred_element_type=jnp.float32)
        + bproj_ref[...].astype(jnp.float32)
    )
    # TODO(synk): proj_drop omitted (p=0.0 / eval mode => identity).
    o_ref[...] = y.astype(o_ref.dtype)


def attention_forward(x, w_qkv, b_qkv, w_proj, b_proj, num_heads):
    """Pallas implementation of Attention.forward.

    x:       (B, H, W, C)  NHWC
    w_qkv:   (C, 3C)   (x @ w_qkv == PyTorch Linear(dim, 3*dim))
    b_qkv:   (3C,)
    w_proj:  (C, C)
    b_proj:  (C,)
    returns  (B, H, W, C)
    """
    B, H, W, C = x.shape
    N = H * W
    assert C % num_heads == 0
    d = C // num_heads
    scale = float(d) ** -0.5

    xf = x.reshape(B, N, C)
    bq = b_qkv.reshape(1, 3 * C)
    bp = b_proj.reshape(1, C)

    kernel = functools.partial(_attention_kernel, num_heads=num_heads, scale=scale)

    flops = 2 * B * (N * C * 3 * C + num_heads * 2 * N * N * d + N * C * C)
    bytes_accessed = 4 * (2 * B * N * C + C * 3 * C + 3 * C + C * C + C)

    out = pl.pallas_call(
        kernel,
        out_shape=jax.ShapeDtypeStruct((B, N, C), x.dtype),
        grid_spec=pltpu.PrefetchScalarGridSpec(
            num_scalar_prefetch=0,
            grid=(B,),
            in_specs=[
                pl.BlockSpec((None, N, C), lambda b: (b, 0, 0)),   # x, squeezed batch
                pl.BlockSpec((C, 3 * C), lambda b: (0, 0)),        # w_qkv (whole)
                pl.BlockSpec((1, 3 * C), lambda b: (0, 0)),        # b_qkv
                pl.BlockSpec((C, C), lambda b: (0, 0)),            # w_proj (whole)
                pl.BlockSpec((1, C), lambda b: (0, 0)),            # b_proj
            ],
            out_specs=pl.BlockSpec((None, N, C), lambda b: (b, 0, 0)),
            scratch_shapes=[
                pltpu.VMEM((N, 3 * C), jnp.float32),               # qkv scratch
                pltpu.VMEM((N, C), jnp.float32),                   # attention context
            ],
        ),
        compiler_params=pltpu.CompilerParams(
            dimension_semantics=("parallel",),
        ),
        cost_estimate=pl.CostEstimate(
            flops=int(flops),
            transcendentals=int(B * num_heads * N * N),
            bytes_accessed=int(bytes_accessed),
        ),
    )(xf, w_qkv, bq, w_proj, bp)
    return out.reshape(B, H, W, C)


def attention_ref(x, w_qkv, b_qkv, w_proj, b_proj, num_heads):
    """Pure-JAX reference mirroring the PyTorch forward (high precision matmuls)."""
    B, H, W, C = x.shape
    N = H * W
    d = C // num_heads
    scale = float(d) ** -0.5
    hp = jax.lax.Precision.HIGHEST

    xf = x.reshape(B, N, C)
    qkv = jnp.einsum("bnc,ck->bnk", xf, w_qkv, precision=hp) + b_qkv
    qkv = qkv.reshape(B, N, 3, num_heads, d).transpose(2, 0, 3, 1, 4)
    q, k, v = qkv[0], qkv[1], qkv[2]                     # (B, heads, N, d)
    attn = jnp.einsum("bhnd,bhmd->bhnm", q, k, precision=hp) * scale
    attn = jax.nn.softmax(attn, axis=-1)
    out = jnp.einsum("bhnm,bhmd->bhnd", attn, v, precision=hp)
    out = out.transpose(0, 2, 1, 3).reshape(B, N, C)
    out = jnp.einsum("bnc,ck->bnk", out, w_proj, precision=hp) + b_proj
    return out.reshape(B, H, W, C)


if __name__ == "__main__":
    key = jax.random.PRNGKey(0)
    kx, kw1, kw2, kb2 = jax.random.split(key, 4)

    B, H, W, C = 2, 8, 8, 64       # N = 64 tokens, dim = 64
    num_heads = 8                  # head_dim = 8

    x = jax.random.normal(kx, (B, H, W, C), dtype=jnp.float32)
    w_qkv = jax.random.normal(kw1, (C, 3 * C), dtype=jnp.float32) * (C ** -0.5)
    b_qkv = jnp.zeros((3 * C,), dtype=jnp.float32)     # qkv_bias=False in the module
    w_proj = jax.random.normal(kw2, (C, C), dtype=jnp.float32) * (C ** -0.5)
    b_proj = jax.random.normal(kb2, (C,), dtype=jnp.float32) * 0.02

    out = attention_forward(x, w_qkv, b_qkv, w_proj, b_proj, num_heads)
    out = jax.block_until_ready(out)
    ref = attention_ref(x, w_qkv, b_qkv, w_proj, b_proj, num_heads)

    ok = out.shape == (B, H, W, C) and bool(
        jnp.allclose(out, ref, atol=2e-2, rtol=2e-2)
    )
    if ok:
        print("KERNEL_OK")
    else:
        print("KERNEL_MISMATCH", float(jnp.max(jnp.abs(out - ref))))
</pallas_src>

<mosaic_0001>
module attributes {stable_mosaic.version = 11 : i64} {
  func.func @_attention_kernel(%arg0: i32, %arg1: memref<1x64x64xf32, #tpu.memory_space<vmem>>, %arg2: memref<64x192xf32, #tpu.memory_space<vmem>>, %arg3: memref<1x192xf32, #tpu.memory_space<vmem>>, %arg4: memref<64x64xf32, #tpu.memory_space<vmem>>, %arg5: memref<1x64xf32, #tpu.memory_space<vmem>>, %arg6: memref<1x64x64xf32, #tpu.memory_space<vmem>>, %arg7: memref<64x192xf32, #tpu.memory_space<vmem>>, %arg8: memref<64x64xf32, #tpu.memory_space<vmem>>) attributes {dimension_semantics = [#tpu.dimension_semantics<parallel>], iteration_bounds = array<i64: 2>, scalar_prefetch = 0 : i64, scratch_operands = 2 : i64, tpu.core_type = #tpu.core_type<tc>, window_params = [{transform_indices = @transform_0, window_bounds = array<i64: 1, 64, 64>}, {pipeline_mode = #tpu.pipeline_mode<synchronous>, transform_indices = @transform_1, window_bounds = array<i64: 64, 192>}, {pipeline_mode = #tpu.pipeline_mode<synchronous>, transform_indices = @transform_2, window_bounds = array<i64: 1, 192>}, {pipeline_mode = #tpu.pipeline_mode<synchronous>, transform_indices = @transform_3, window_bounds = array<i64: 64, 64>}, {pipeline_mode = #tpu.pipeline_mode<synchronous>, transform_indices = @transform_4, window_bounds = array<i64: 1, 64>}, {transform_indices = @transform_5, window_bounds = array<i64: 1, 64, 64>}]} {
    %c0 = arith.constant 0 : index
    %c0_0 = arith.constant 0 : index
    %c0_1 = arith.constant 0 : index
    %0 = vector.load %arg1[%c0, %c0_0, %c0_1] : memref<1x64x64xf32, #tpu.memory_space<vmem>>, vector<1x64x64xf32>
    %1 = vector.shape_cast %0 : vector<1x64x64xf32> to vector<64x64xf32>
    %c0_2 = arith.constant 0 : index
    %c0_3 = arith.constant 0 : index
    %2 = vector.load %arg2[%c0_2, %c0_3] : memref<64x192xf32, #tpu.memory_space<vmem>>, vector<64x192xf32>
    %cst = arith.constant dense<0.000000e+00> : vector<64x192xf32>
    %3 = tpu.matmul %1, %2, %cst {dimension_numbers = #tpu.dot_dimension_numbers<[1], [0], [0], [1], [0, 0, 1, 1], [], []>} : vector<64x64xf32>, vector<64x192xf32>, vector<64x192xf32> -> vector<64x192xf32>
    %c0_4 = arith.constant 0 : index
    %c0_5 = arith.constant 0 : index
    %4 = vector.load %arg3[%c0_4, %c0_5] : memref<1x192xf32, #tpu.memory_space<vmem>>, vector<1x192xf32>
    %5 = vector.broadcast %4 : vector<1x192xf32> to vector<64x192xf32>
    %6 = arith.addf %3, %5 : vector<64x192xf32>
    %c0_6 = arith.constant 0 : index
    %c0_7 = arith.constant 0 : index
    %7 = vector.load %arg7[%c0_6, %c0_7] : memref<64x192xf32, #tpu.memory_space<vmem>>, vector<64x192xf32>
    tpu.vector_store %arg7[%c0_6, %c0_7], %6 {strides = array<i32>} : memref<64x192xf32, #tpu.memory_space<vmem>>, vector<64x192xf32>,
    %c0_8 = arith.constant 0 : index
    %c0_9 = arith.constant 0 : index
    %8 = vector.load %arg7[%c0_8, %c0_9] : memref<64x192xf32, #tpu.memory_space<vmem>>, vector<64x8xf32>
    %c0_10 = arith.constant 0 : index
    %c64 = arith.constant 64 : index
    %9 = vector.load %arg7[%c0_10, %c64] : memref<64x192xf32, #tpu.memory_space<vmem>>, vector<64x8xf32>
    %c0_11 = arith.constant 0 : index
    %c128 = arith.constant 128 : index
    %10 = vector.load %arg7[%c0_11, %c128] : memref<64x192xf32, #tpu.memory_space<vmem>>, vector<64x8xf32>
    %cst_12 = arith.constant dense<0.000000e+00> : vector<64x64xf32>
    %11 = tpu.matmul %8, %9, %cst_12 {dimension_numbers = #tpu.dot_dimension_numbers<[1], [1], [0], [0], [0, 0, 1, 0], [], []>} : vector<64x8xf32>, vector<64x8xf32>, vector<64x64xf32> -> vector<64x64xf32>
    %cst_13 = arith.constant 0.353553385 : f32
    %12 = vector.broadcast %cst_13 : f32 to vector<64x64xf32>
    %13 = arith.mulf %11, %12 : vector<64x64xf32>
    %cst_14 = arith.constant dense<0xFF800000> : vector<64xf32>
    %14 = vector.multi_reduction <maximumf>, %13, %cst_14 [1] : vector<64x64xf32> to vector<64xf32>
    %15 = vector.shape_cast %14 : vector<64xf32> to vector<64x1xf32>
    %16 = vector.broadcast %15 : vector<64x1xf32> to vector<64x64xf32>
    %17 = arith.subf %13, %16 : vector<64x64xf32>
    %18 = math.exp %17 : vector<64x64xf32>
    %cst_15 = arith.constant dense<0.000000e+00> : vector<64xf32>
    %19 = vector.multi_reduction <add>, %18, %cst_15 [1] : vector<64x64xf32> to vector<64xf32>
    %20 = vector.shape_cast %19 : vector<64xf32> to vector<64x1xf32>
    %21 = vector.broadcast %20 : vector<64x1xf32> to vector<64x64xf32>
    %22 = arith.divf %18, %21 : vector<64x64xf32>
    %cst_16 = arith.constant dense<0.000000e+00> : vector<64x8xf32>
    %23 = tpu.matmul %22, %10, %cst_16 {dimension_numbers = #tpu.dot_dimension_numbers<[1], [0], [0], [1], [0, 0, 1, 1], [], []>} : vector<64x64xf32>, vector<64x8xf32>, vector<64x8xf32> -> vector<64x8xf32>
    %c0_17 = arith.constant 0 : index
    %c0_18 = arith.constant 0 : index
    %24 = vector.load %arg8[%c0_17, %c0_18] : memref<64x64xf32, #tpu.memory_space<vmem>>, vector<64x8xf32>
    tpu.vector_store %arg8[%c0_17, %c0_18], %23 {strides = array<i32>} : memref<64x64xf32, #tpu.memory_space<vmem>>, vector<64x8xf32>,
    %c0_19 = arith.constant 0 : index
    %c8 = arith.constant 8 : index
    %25 = vector.load %arg7[%c0_19, %c8] : memref<64x192xf32, #tpu.memory_space<vmem>>, vector<64x8xf32>
    %c0_20 = arith.constant 0 : index
    %c72 = arith.constant 72 : index
    %26 = vector.load %arg7[%c0_20, %c72] : memref<64x192xf32, #tpu.memory_space<vmem>>, vector<64x8xf32>
    %c0_21 = arith.constant 0 : index
    %c136 = arith.constant 136 : index
    %27 = vector.load %arg7[%c0_21, %c136] : memref<64x192xf32, #tpu.memory_space<vmem>>, vector<64x8xf32>
    %cst_22 = arith.constant dense<0.000000e+00> : vector<64x64xf32>
    %28 = tpu.matmul %25, %26, %cst_22 {dimension_numbers = #tpu.dot_dimension_numbers<[1], [1], [0], [0], [0, 0, 1, 0], [], []>} : vector<64x8xf32>, vector<64x8xf32>, vector<64x64xf32> -> vector<64x64xf32>
    %cst_23 = arith.constant 0.353553385 : f32
    %29 = vector.broadcast %cst_23 : f32 to vector<64x64xf32>
    %30 = arith.mulf %28, %29 : vector<64x64xf32>
    %cst_24 = arith.constant dense<0xFF800000> : vector<64xf32>
    %31 = vector.multi_reduction <maximumf>, %30, %cst_24 [1] : vector<64x64xf32> to vector<64xf32>
    %32 = vector.shape_cast %31 : vector<64xf32> to vector<64x1xf32>
    %33 = vector.broadcast %32 : vector<64x1xf32> to vector<64x64xf32>
    %34 = arith.subf %30, %33 : vector<64x64xf32>
    %35 = math.exp %34 : vector<64x64xf32>
    %cst_25 = arith.constant dense<0.000000e+00> : vector<64xf32>
    %36 = vector.multi_reduction <add>, %35, %cst_25 [1] : vector<64x64xf32> to vector<64xf32>
    %37 = vector.shape_cast %36 : vector<64xf32> to vector<64x1xf32>
    %38 = vector.broadcast %37 : vector<64x1xf32> to vector<64x64xf32>
    %39 = arith.divf %35, %38 : vector<64x64xf32>
    %cst_26 = arith.constant dense<0.000000e+00> : vector<64x8xf32>
    %40 = tpu.matmul %39, %27, %cst_26 {dimension_numbers = #tpu.dot_dimension_numbers<[1], [0], [0], [1], [0, 0, 1, 1], [], []>} : vector<64x64xf32>, vector<64x8xf32>, vector<64x8xf32> -> vector<64x8xf32>
    %c0_27 = arith.constant 0 : index
    %c8_28 = arith.constant 8 : index
    %41 = vector.load %arg8[%c0_27, %c8_28] : memref<64x64xf32, #tpu.memory_space<vmem>>, vector<64x8xf32>
    tpu.vector_store %arg8[%c0_27, %c8_28], %40 {strides = array<i32>} : memref<64x64xf32, #tpu.memory_space<vmem>>, vector<64x8xf32>,
    %c0_29 = arith.constant 0 : index
    %c16 = arith.constant 16 : index
    %42 = vector.load %arg7[%c0_29, %c16] : memref<64x192xf32, #tpu.memory_space<vmem>>, vector<64x8xf32>
    %c0_30 = arith.constant 0 : index
    %c80 = arith.constant 80 : index
    %43 = vector.load %arg7[%c0_30, %c80] : memref<64x192xf32, #tpu.memory_space<vmem>>, vector<64x8xf32>
    %c0_31 = arith.constant 0 : index
    %c144 = arith.constant 144 : index
    %44 = vector.load %arg7[%c0_31, %c144] : memref<64x192xf32, #tpu.memory_space<vmem>>, vector<64x8xf32>
    %cst_32 = arith.constant dense<0.000000e+00> : vector<64x64xf32>
    %45 = tpu.matmul %42, %43, %cst_32 {dimension_numbers = #tpu.dot_dimension_numbers<[1], [1], [0], [0], [0, 0, 1, 0], [], []>} : vector<64x8xf32>, vector<64x8xf32>, vector<64x64xf32> -> vector<64x64xf32>
    %cst_33 = arith.constant 0.353553385 : f32
    %46 = vector.broadcast %cst_33 : f32 to vector<64x64xf32>
    %47 = arith.mulf %45, %46 : vector<64x64xf32>
    %cst_34 = arith.constant dense<0xFF800000> : vector<64xf32>
    %48 = vector.multi_reduction <maximumf>, %47, %cst_34 [1] : vector<64x64xf32> to vector<64xf32>
    %49 = vector.shape_cast %48 : vector<64xf32> to vector<64x1xf32>
    %50 = vector.broadcast %49 : vector<64x1xf32> to vector<64x64xf32>
    %51 = arith.subf %47, %50 : vector<64x64xf32>
    %52 = math.exp %51 : vector<64x64xf32>
    %cst_35 = arith.constant dense<0.000000e+00> : vector<64xf32>
    %53 = vector.multi_reduction <add>, %52, %cst_35 [1] : vector<64x64xf32> to vector<64xf32>
    %54 = vector.shape_cast %53 : vector<64xf32> to vector<64x1xf32>
    %55 = vector.broadcast %54 : vector<64x1xf32> to vector<64x64xf32>
    %56 = arith.divf %52, %55 : vector<64x64xf32>
    %cst_36 = arith.constant dense<0.000000e+00> : vector<64x8xf32>
    %57 = tpu.matmul %56, %44, %cst_36 {dimension_numbers = #tpu.dot_dimension_numbers<[1], [0], [0], [1], [0, 0, 1, 1], [], []>} : vector<64x64xf32>, vector<64x8xf32>, vector<64x8xf32> -> vector<64x8xf32>
    %c0_37 = arith.constant 0 : index
    %c16_38 = arith.constant 16 : index
    %58 = vector.load %arg8[%c0_37, %c16_38] : memref<64x64xf32, #tpu.memory_space<vmem>>, vector<64x8xf32>
    tpu.vector_store %arg8[%c0_37, %c16_38], %57 {strides = array<i32>} : memref<64x64xf32, #tpu.memory_space<vmem>>, vector<64x8xf32>,
    %c0_39 = arith.constant 0 : index
    %c24 = arith.constant 24 : index
    %59 = vector.load %arg7[%c0_39, %c24] : memref<64x192xf32, #tpu.memory_space<vmem>>, vector<64x8xf32>
    %c0_40 = arith.constant 0 : index
    %c88 = arith.constant 88 : index
    %60 = vector.load %arg7[%c0_40, %c88] : memref<64x192xf32, #tpu.memory_space<vmem>>, vector<64x8xf32>
    %c0_41 = arith.constant 0 : index
    %c152 = arith.constant 152 : index
    %61 = vector.load %arg7[%c0_41, %c152] : memref<64x192xf32, #tpu.memory_space<vmem>>, vector<64x8xf32>
    %cst_42 = arith.constant dense<0.000000e+00> : vector<64x64xf32>
    %62 = tpu.matmul %59, %60, %cst_42 {dimension_numbers = #tpu.dot_dimension_numbers<[1], [1], [0], [0], [0, 0, 1, 0], [], []>} : vector<64x8xf32>, vector<64x8xf32>, vector<64x64xf32> -> vector<64x64xf32>
    %cst_43 = arith.constant 0.353553385 : f32
    %63 = vector.broadcast %cst_43 : f32 to vector<64x64xf32>
    %64 = arith.mulf %62, %63 : vector<64x64xf32>
    %cst_44 = arith.constant dense<0xFF800000> : vector<64xf32>
    %65 = vector.multi_reduction <maximumf>, %64, %cst_44 [1] : vector<64x64xf32> to vector<64xf32>
    %66 = vector.shape_cast %65 : vector<64xf32> to vector<64x1xf32>
    %67 = vector.broadcast %66 : vector<64x1xf32> to vector<64x64xf32>
    %68 = arith.subf %64, %67 : vector<64x64xf32>
    %69 = math.exp %68 : vector<64x64xf32>
    %cst_45 = arith.constant dense<0.000000e+00> : vector<64xf32>
    %70 = vector.multi_reduction <add>, %69, %cst_45 [1] : vector<64x64xf32> to vector<64xf32>
    %71 = vector.shape_cast %70 : vector<64xf32> to vector<64x1xf32>
    %72 = vector.broadcast %71 : vector<64x1xf32> to vector<64x64xf32>
    %73 = arith.divf %69, %72 : vector<64x64xf32>
    %cst_46 = arith.constant dense<0.000000e+00> : vector<64x8xf32>
    %74 = tpu.matmul %73, %61, %cst_46 {dimension_numbers = #tpu.dot_dimension_numbers<[1], [0], [0], [1], [0, 0, 1, 1], [], []>} : vector<64x64xf32>, vector<64x8xf32>, vector<64x8xf32> -> vector<64x8xf32>
    %c0_47 = arith.constant 0 : index
    %c24_48 = arith.constant 24 : index
    %75 = vector.load %arg8[%c0_47, %c24_48] : memref<64x64xf32, #tpu.memory_space<vmem>>, vector<64x8xf32>
    tpu.vector_store %arg8[%c0_47, %c24_48], %74 {strides = array<i32>} : memref<64x64xf32, #tpu.memory_space<vmem>>, vector<64x8xf32>,
    %c0_49 = arith.constant 0 : index
    %c32 = arith.constant 32 : index
    %76 = vector.load %arg7[%c0_49, %c32] : memref<64x192xf32, #tpu.memory_space<vmem>>, vector<64x8xf32>
    %c0_50 = arith.constant 0 : index
    %c96 = arith.constant 96 : index
    %77 = vector.load %arg7[%c0_50, %c96] : memref<64x192xf32, #tpu.memory_space<vmem>>, vector<64x8xf32>
    %c0_51 = arith.constant 0 : index
    %c160 = arith.constant 160 : index
    %78 = vector.load %arg7[%c0_51, %c160] : memref<64x192xf32, #tpu.memory_space<vmem>>, vector<64x8xf32>
    %cst_52 = arith.constant dense<0.000000e+00> : vector<64x64xf32>
    %79 = tpu.matmul %76, %77, %cst_52 {dimension_numbers = #tpu.dot_dimension_numbers<[1], [1], [0], [0], [0, 0, 1, 0], [], []>} : vector<64x8xf32>, vector<64x8xf32>, vector<64x64xf32> -> vector<64x64xf32>
    %cst_53 = arith.constant 0.353553385 : f32
    %80 = vector.broadcast %cst_53 : f32 to vector<64x64xf32>
    %81 = arith.mulf %79, %80 : vector<64x64xf32>
    %cst_54 = arith.constant dense<0xFF800000> : vector<64xf32>
    %82 = vector.multi_reduction <maximumf>, %81, %cst_54 [1] : vector<64x64xf32> to vector<64xf32>
    %83 = vector.shape_cast %82 : vector<64xf32> to vector<64x1xf32>
    %84 = vector.broadcast %83 : vector<64x1xf32> to vector<64x64xf32>
    %85 = arith.subf %81, %84 : vector<64x64xf32>
    %86 = math.exp %85 : vector<64x64xf32>
    %cst_55 = arith.constant dense<0.000000e+00> : vector<64xf32>
    %87 = vector.multi_reduction <add>, %86, %cst_55 [1] : vector<64x64xf32> to vector<64xf32>
    %88 = vector.shape_cast %87 : vector<64xf32> to vector<64x1xf32>
    %89 = vector.broadcast %88 : vector<64x1xf32> to vector<64x64xf32>
    %90 = arith.divf %86, %89 : vector<64x64xf32>
    %cst_56 = arith.constant dense<0.000000e+00> : vector<64x8xf32>
    %91 = tpu.matmul %90, %78, %cst_56 {dimension_numbers = #tpu.dot_dimension_numbers<[1], [0], [0], [1], [0, 0, 1, 1], [], []>} : vector<64x64xf32>, vector<64x8xf32>, vector<64x8xf32> -> vector<64x8xf32>
    %c0_57 = arith.constant 0 : index
    %c32_58 = arith.constant 32 : index
    %92 = vector.load %arg8[%c0_57, %c32_58] : memref<64x64xf32, #tpu.memory_space<vmem>>, vector<64x8xf32>
    tpu.vector_store %arg8[%c0_57, %c32_58], %91 {strides = array<i32>} : memref<64x64xf32, #tpu.memory_space<vmem>>, vector<64x8xf32>,
    %c0_59 = arith.constant 0 : index
    %c40 = arith.constant 40 : index
    %93 = vector.load %arg7[%c0_59, %c40] : memref<64x192xf32, #tpu.memory_space<vmem>>, vector<64x8xf32>
    %c0_60 = arith.constant 0 : index
    %c104 = arith.constant 104 : index
    %94 = vector.load %arg7[%c0_60, %c104] : memref<64x192xf32, #tpu.memory_space<vmem>>, vector<64x8xf32>
    %c0_61 = arith.constant 0 : index
    %c168 = arith.constant 168 : index
    %95 = vector.load %arg7[%c0_61, %c168] : memref<64x192xf32, #tpu.memory_space<vmem>>, vector<64x8xf32>
    %cst_62 = arith.constant dense<0.000000e+00> : vector<64x64xf32>
    %96 = tpu.matmul %93, %94, %cst_62 {dimension_numbers = #tpu.dot_dimension_numbers<[1], [1], [0], [0], [0, 0, 1, 0], [], []>} : vector<64x8xf32>, vector<64x8xf32>, vector<64x64xf32> -> vector<64x64xf32>
    %cst_63 = arith.constant 0.353553385 : f32
    %97 = vector.broadcast %cst_63 : f32 to vector<64x64xf32>
    %98 = arith.mulf %96, %97 : vector<64x64xf32>
    %cst_64 = arith.constant dense<0xFF800000> : vector<64xf32>
    %99 = vector.multi_reduction <maximumf>, %98, %cst_64 [1] : vector<64x64xf32> to vector<64xf32>
    %100 = vector.shape_cast %99 : vector<64xf32> to vector<64x1xf32>
    %101 = vector.broadcast %100 : vector<64x1xf32> to vector<64x64xf32>
    %102 = arith.subf %98, %101 : vector<64x64xf32>
    %103 = math.exp %102 : vector<64x64xf32>
    %cst_65 = arith.constant dense<0.000000e+00> : vector<64xf32>
    %104 = vector.multi_reduction <add>, %103, %cst_65 [1] : vector<64x64xf32> to vector<64xf32>
    %105 = vector.shape_cast %104 : vector<64xf32> to vector<64x1xf32>
    %106 = vector.broadcast %105 : vector<64x1xf32> to vector<64x64xf32>
    %107 = arith.divf %103, %106 : vector<64x64xf32>
    %cst_66 = arith.constant dense<0.000000e+00> : vector<64x8xf32>
    %108 = tpu.matmul %107, %95, %cst_66 {dimension_numbers = #tpu.dot_dimension_numbers<[1], [0], [0], [1], [0, 0, 1, 1], [], []>} : vector<64x64xf32>, vector<64x8xf32>, vector<64x8xf32> -> vector<64x8xf32>
    %c0_67 = arith.constant 0 : index
    %c40_68 = arith.constant 40 : index
    %109 = vector.load %arg8[%c0_67, %c40_68] : memref<64x64xf32, #tpu.memory_space<vmem>>, vector<64x8xf32>
    tpu.vector_store %arg8[%c0_67, %c40_68], %108 {strides = array<i32>} : memref<64x64xf32, #tpu.memory_space<vmem>>, vector<64x8xf32>,
    %c0_69 = arith.constant 0 : index
    %c48 = arith.constant 48 : index
    %110 = vector.load %arg7[%c0_69, %c48] : memref<64x192xf32, #tpu.memory_space<vmem>>, vector<64x8xf32>
    %c0_70 = arith.constant 0 : index
    %c112 = arith.constant 112 : index
    %111 = vector.load %arg7[%c0_70, %c112] : memref<64x192xf32, #tpu.memory_space<vmem>>, vector<64x8xf32>
    %c0_71 = arith.constant 0 : index
    %c176 = arith.constant 176 : index
    %112 = vector.load %arg7[%c0_71, %c176] : memref<64x192xf32, #tpu.memory_space<vmem>>, vector<64x8xf32>
    %cst_72 = arith.constant dense<0.000000e+00> : vector<64x64xf32>
    %113 = tpu.matmul %110, %111, %cst_72 {dimension_numbers = #tpu.dot_dimension_numbers<[1], [1], [0], [0], [0, 0, 1, 0], [], []>} : vector<64x8xf32>, vector<64x8xf32>, vector<64x64xf32> -> vector<64x64xf32>
    %cst_73 = arith.constant 0.353553385 : f32
    %114 = vector.broadcast %cst_73 : f32 to vector<64x64xf32>
    %115 = arith.mulf %113, %114 : vector<64x64xf32>
    %cst_74 = arith.constant dense<0xFF800000> : vector<64xf32>
    %116 = vector.multi_reduction <maximumf>, %115, %cst_74 [1] : vector<64x64xf32> to vector<64xf32>
    %117 = vector.shape_cast %116 : vector<64xf32> to vector<64x1xf32>
    %118 = vector.broadcast %117 : vector<64x1xf32> to vector<64x64xf32>
    %119 = arith.subf %115, %118 : vector<64x64xf32>
    %120 = math.exp %119 : vector<64x64xf32>
    %cst_75 = arith.constant dense<0.000000e+00> : vector<64xf32>
    %121 = vector.multi_reduction <add>, %120, %cst_75 [1] : vector<64x64xf32> to vector<64xf32>
    %122 = vector.shape_cast %121 : vector<64xf32> to vector<64x1xf32>
    %123 = vector.broadcast %122 : vector<64x1xf32> to vector<64x64xf32>
    %124 = arith.divf %120, %123 : vector<64x64xf32>
    %cst_76 = arith.constant dense<0.000000e+00> : vector<64x8xf32>
    %125 = tpu.matmul %124, %112, %cst_76 {dimension_numbers = #tpu.dot_dimension_numbers<[1], [0], [0], [1], [0, 0, 1, 1], [], []>} : vector<64x64xf32>, vector<64x8xf32>, vector<64x8xf32> -> vector<64x8xf32>
    %c0_77 = arith.constant 0 : index
    %c48_78 = arith.constant 48 : index
    %126 = vector.load %arg8[%c0_77, %c48_78] : memref<64x64xf32, #tpu.memory_space<vmem>>, vector<64x8xf32>
    tpu.vector_store %arg8[%c0_77, %c48_78], %125 {strides = array<i32>} : memref<64x64xf32, #tpu.memory_space<vmem>>, vector<64x8xf32>,
    %c0_79 = arith.constant 0 : index
    %c56 = arith.constant 56 : index
    %127 = vector.load %arg7[%c0_79, %c56] : memref<64x192xf32, #tpu.memory_space<vmem>>, vector<64x8xf32>
    %c0_80 = arith.constant 0 : index
    %c120 = arith.constant 120 : index
    %128 = vector.load %arg7[%c0_80, %c120] : memref<64x192xf32, #tpu.memory_space<vmem>>, vector<64x8xf32>
    %c0_81 = arith.constant 0 : index
    %c184 = arith.constant 184 : index
    %129 = vector.load %arg7[%c0_81, %c184] : memref<64x192xf32, #tpu.memory_space<vmem>>, vector<64x8xf32>
    %cst_82 = arith.constant dense<0.000000e+00> : vector<64x64xf32>
    %130 = tpu.matmul %127, %128, %cst_82 {dimension_numbers = #tpu.dot_dimension_numbers<[1], [1], [0], [0], [0, 0, 1, 0], [], []>} : vector<64x8xf32>, vector<64x8xf32>, vector<64x64xf32> -> vector<64x64xf32>
    %cst_83 = arith.constant 0.353553385 : f32
    %131 = vector.broadcast %cst_83 : f32 to vector<64x64xf32>
    %132 = arith.mulf %130, %131 : vector<64x64xf32>
    %cst_84 = arith.constant dense<0xFF800000> : vector<64xf32>
    %133 = vector.multi_reduction <maximumf>, %132, %cst_84 [1] : vector<64x64xf32> to vector<64xf32>
    %134 = vector.shape_cast %133 : vector<64xf32> to vector<64x1xf32>
    %135 = vector.broadcast %134 : vector<64x1xf32> to vector<64x64xf32>
    %136 = arith.subf %132, %135 : vector<64x64xf32>
    %137 = math.exp %136 : vector<64x64xf32>
    %cst_85 = arith.constant dense<0.000000e+00> : vector<64xf32>
    %138 = vector.multi_reduction <add>, %137, %cst_85 [1] : vector<64x64xf32> to vector<64xf32>
    %139 = vector.shape_cast %138 : vector<64xf32> to vector<64x1xf32>
    %140 = vector.broadcast %139 : vector<64x1xf32> to vector<64x64xf32>
    %141 = arith.divf %137, %140 : vector<64x64xf32>
    %cst_86 = arith.constant dense<0.000000e+00> : vector<64x8xf32>
    %142 = tpu.matmul %141, %129, %cst_86 {dimension_numbers = #tpu.dot_dimension_numbers<[1], [0], [0], [1], [0, 0, 1, 1], [], []>} : vector<64x64xf32>, vector<64x8xf32>, vector<64x8xf32> -> vector<64x8xf32>
    %c0_87 = arith.constant 0 : index
    %c56_88 = arith.constant 56 : index
    %143 = vector.load %arg8[%c0_87, %c56_88] : memref<64x64xf32, #tpu.memory_space<vmem>>, vector<64x8xf32>
    tpu.vector_store %arg8[%c0_87, %c56_88], %142 {strides = array<i32>} : memref<64x64xf32, #tpu.memory_space<vmem>>, vector<64x8xf32>,
    %c0_89 = arith.constant 0 : index
    %c0_90 = arith.constant 0 : index
    %144 = vector.load %arg8[%c0_89, %c0_90] : memref<64x64xf32, #tpu.memory_space<vmem>>, vector<64x64xf32>
    %c0_91 = arith.constant 0 : index
    %c0_92 = arith.constant 0 : index
    %145 = vector.load %arg4[%c0_91, %c0_92] : memref<64x64xf32, #tpu.memory_space<vmem>>, vector<64x64xf32>
    %cst_93 = arith.constant dense<0.000000e+00> : vector<64x64xf32>
    %146 = tpu.matmul %144, %145, %cst_93 {dimension_numbers = #tpu.dot_dimension_numbers<[1], [0], [0], [1], [0, 0, 1, 1], [], []>} : vector<64x64xf32>, vector<64x64xf32>, vector<64x64xf32> -> vector<64x64xf32>
    %c0_94 = arith.constant 0 : index
    %c0_95 = arith.constant 0 : index
    %147 = vector.load %arg5[%c0_94, %c0_95] : memref<1x64xf32, #tpu.memory_space<vmem>>, vector<1x64xf32>
    %148 = vector.broadcast %147 : vector<1x64xf32> to vector<64x64xf32>
    %149 = arith.addf %146, %148 : vector<64x64xf32>
    %c0_96 = arith.constant 0 : index
    %c0_97 = arith.constant 0 : index
    %c0_98 = arith.constant 0 : index
    %150 = vector.load %arg6[%c0_96, %c0_97, %c0_98] : memref<1x64x64xf32, #tpu.memory_space<vmem>>, vector<1x64x64xf32>
    %151 = vector.shape_cast %150 : vector<1x64x64xf32> to vector<64x64xf32>
    %152 = vector.shape_cast %149 : vector<64x64xf32> to vector<1x64x64xf32>
    tpu.vector_store %arg6[%c0_96, %c0_97, %c0_98], %152 {strides = array<i32>} : memref<1x64x64xf32, #tpu.memory_space<vmem>>, vector<1x64x64xf32>,
    return
  }
  func.func @transform_0(%arg0: i32) -> (i32, i32, i32) {
    %c0_i32 = arith.constant 0 : i32
    %c0_i32_0 = arith.constant 0 : i32
    %c0_i32_1 = arith.constant 0 : i32
    return %arg0, %c0_i32, %c0_i32_0 : i32, i32, i32
  }
  func.func @transform_1(%arg0: i32) -> (i32, i32) {
    %c0_i32 = arith.constant 0 : i32
    %c0_i32_0 = arith.constant 0 : i32
    %c0_i32_1 = arith.constant 0 : i32
    return %c0_i32, %c0_i32_0 : i32, i32
  }
  func.func @transform_2(%arg0: i32) -> (i32, i32) {
    %c0_i32 = arith.constant 0 : i32
    %c0_i32_0 = arith.constant 0 : i32
    %c0_i32_1 = arith.constant 0 : i32
    return %c0_i32, %c0_i32_0 : i32, i32
  }
  func.func @transform_3(%arg0: i32) -> (i32, i32) {
    %c0_i32 = arith.constant 0 : i32
    %c0_i32_0 = arith.constant 0 : i32
    %c0_i32_1 = arith.constant 0 : i32
    return %c0_i32, %c0_i32_0 : i32, i32
  }
  func.func @transform_4(%arg0: i32) -> (i32, i32) {
    %c0_i32 = arith.constant 0 : i32
    %c0_i32_0 = arith.constant 0 : i32
    %c0_i32_1 = arith.constant 0 : i32
    return %c0_i32, %c0_i32_0 : i32, i32
  }
  func.func @transform_5(%arg0: i32) -> (i32, i32, i32) {
    %c0_i32 = arith.constant 0 : i32
    %c0_i32_0 = arith.constant 0 : i32
    %c0_i32_1 = arith.constant 0 : i32
    return %arg0, %c0_i32, %c0_i32_0 : i32, i32, i32
  }
}

</mosaic_0001>

<bundles_post_ra>
// kernel: tpu_custom_call.1
= control target key start
LH: loop header
LB: loop body
LE: loop exit
PB: predicated region body
PF: predicated region fallthrough
CT: control target
= control target key end

     0   :  { %10 = vsyncpa [#allocation5], 0  ;;  %s8501_s0 = inlined_call_operand.hbm [shape: f32[2,64,64], index: 0, kind: input, shape index: {}]   ;;  %s8502_s1 = inlined_call_operand.hbm [shape: f32[64,192], index: 1, kind: input, shape index: {}]   ;;  %s8503_s2 = inlined_call_operand.vmem [shape: f32[1,192], index: 2, kind: input, shape index: {}]   ;;  %s8504_s3 = inlined_call_operand.hbm [shape: f32[64,64], index: 3, kind: input, shape index: {}]   ;;  %s8505_s4 = inlined_call_operand.vmem [shape: f32[1,64], index: 4, kind: input, shape index: {}]   ;;  %s8506_s5 = inlined_call_operand.hbm [shape: f32[2,64,64], index: 5, kind: output, shape index: {}]  }
   0x1   :  { %12 = vsyncpa [#allocation5 + $0x1], 0 }
   0x2   :  { %13 = vsyncpa [#allocation8], 0 }
   0x3   :  { %14 = vsyncpa [#allocation6], 0 }
   0x4   :  { %16 = vsyncpa [#allocation6 + $0x1], 0  ;;  %s6770_s18 = smov 0   ;;  %s6772_s19 = smov 0  }
   0x5   :  { %s6774_s20 = smov 0   ;;  %s6776_s21 = smov 0  }
   0x6 LB: > { %s6791_s22 = sadd.s32 4294967295, %s6713_s21   ;;  %s4576_s23 = sadd.s32 4294967294, %s6713_s21   ;;  %s6713_s21 = sphi %s6776_s21, %s8560_s21   ;;  %s6709_s20 = sphi %s6774_s20, %s8559_s20   ;;  %s6705_s19 = sphi %s6772_s19, %s8558_s19   ;;  %s6701_s18 = sphi %s6770_s18, %s8557_s18  }
   0x7   : > { %p42_p0 = scmp.ne.s32.totalorder %s6705_s19, %s6701_s18  ;;  %p8507_p1 = scmp.eq.s32.totalorder %s6791_s22, 0 }
   0x8   : > { %p156_p3 = scmp.eq.s32.totalorder %s4576_s23, 1  ;;  %p4577_p5 = scmp.ge.s32.totalorder %s6713_s21, 1 }
   0x9   : > { %p6800_p4 = por %p8507_p1, %p42_p0  ;;  %p163_p7 = scmp.lt.s32.totalorder %s6713_s21, 3 }
   0xa   : > { %p6805_p6 = por %p156_p3, %p42_p0  ;;  %s6715_s27 = smov [#allocation7]  }
   0xb   : > { %s8510_s24 = scalar_select %p6800_p4, 1, 0 }
   0xc   : > { %s8511_s25 = scalar_select %p6805_p6, 1, 0 }
   0xd   : > { %p6810_p8 = pnand %p4577_p5, %p163_p7  ;;  %s175_s28 = sshll.u32 %s6715_s27, 4  ;;  %s6814_s28 = int_to_ptr.vmem [resolvable:$true] %s175_s28 }
   0xe   : > { %s6716_s30 = smov [#allocation9]   ;;  %s6557_s9 = scalar_lea.hbm %s8502_s1, 2048 }
   0xf   : > { %p5925_p9 = pneg %p6810_p8  ;;  %s191_s6 = sshll.u32 %s6716_s30, 4  ;;  %s6825_s6 = int_to_ptr.vmem [resolvable:$true] %s191_s6 }
  0x10   : > { %p6558_p12 = scmp.ne.s32.totalorder %s8502_s1, %s6557_s9  ;;  %p6564_p5 = scmp.lt.u32.totalorder %s6557_s9, %s8502_s1 }
  0x11   : > { %p6821_p11 = pnand %p5925_p9, %p8507_p1 }
  0x13   : > { %p6559_p13 = pneg %p6821_p11 }
  0x15   : > { %p6560_p0 = pnand %p6559_p13, %p6558_p12 }
  0x17   : > { %p6561_p3 = pneg %p6560_p0 }
  0x19   : > { %p6566_p7 = pnand %p6564_p5, %p6561_p3 }
  0x1b   : > { %6569 = shalt.err (!%p6566_p7)
}
  0x1c   : > { %s6570_s14 = scalar_lea.vmem %s6814_s28, 2048  ;;  %p6578_p2 = scmp.lt.s32.totalorder %s6814_s28, %s6814_s28 }
  0x1d   : > { %p6571_p9 = scmp.ne.s32.totalorder %s6814_s28, %s6570_s14  ;;  %p6579_p12 = scmp.lt.s32.totalorder %s6570_s14, %s6570_s14 }
  0x1f   : > { %p6573_p10 = pnand %p6571_p9, %p6559_p13  ;;  %p6580_p0 = por %p6579_p12, %p6578_p2 }
  0x21   : > { %p6574_p1 = pneg %p6573_p10 }
  0x23   : > { %p6581_p6 = pnand %p6580_p0, %p6574_p1 }
  0x25   : > { %6584 = shalt.err (!%p6581_p6)
}
  0x26   : > { %s6717_s15 = smov 256   ;;  %s6718_s16 = smov 16  }
  0x27   : > { %5928 = dma.hbm_to_vmem [thread:$0]  (!%p6821_p11), %s8502_s1, 2048, %s6814_s28, [#allocation8], %s6717_s15, %s6717_s15, %s6718_s16  }
  0x28   : > { %s6585_s7 = scalar_lea.hbm %s8504_s3, 1024 }
  0x29   : > { %p6586_p2 = scmp.ne.s32.totalorder %s8504_s3, %s6585_s7  ;;  %p6592_p10 = scmp.lt.u32.totalorder %s6585_s7, %s8504_s3 }
  0x2b   : > { %p6588_p1 = pnand %p6586_p2, %p6559_p13 }
  0x2d   : > { %p6589_p6 = pneg %p6588_p1 }
  0x2f   : > { %p6594_p3 = pnand %p6592_p10, %p6589_p6 }
  0x31   : > { %6597 = shalt.err (!%p6594_p3)
}
  0x32   : > { %s6598_s28 = scalar_lea.vmem %s6825_s6, 1024  ;;  %p6606_p12 = scmp.lt.s32.totalorder %s6825_s6, %s6825_s6 }
  0x33   : > { %p6599_p5 = scmp.ne.s32.totalorder %s6825_s6, %s6598_s28  ;;  %p6607_p0 = scmp.lt.s32.totalorder %s6598_s28, %s6598_s28 }
  0x35   : > { %p6601_p7 = pnand %p6599_p5, %p6559_p13  ;;  %p6608_p2 = por %p6607_p0, %p6606_p12 }
  0x37   : > { %p6602_p9 = pneg %p6601_p7 }
  0x39   : > { %p6609_p1 = pnand %p6608_p2, %p6602_p9 }
  0x3b   : > { %6612 = shalt.err (!%p6609_p1)
}
  0x3c   : > { %s6719_s12 = smov 128   ;;  %s6720_s13 = smov 8  }
  0x3d   : > { %5931 = dma.hbm_to_vmem [thread:$0]  (!%p6821_p11), %s8504_s3, 1024, %s6825_s6, [#allocation8], %s6719_s12, %s6719_s12, %s6720_s13  }
  0x3e   : > { %s6883_s16 = sadd.s32 1, %s6713_s21   ;;  %s29_s23 = sadd.s32 1, %s6709_s20 }
  0x3f   : > { %s26_s17 = ssub.s32 %s6713_s21, %s6883_s16  ;;  %p36_p6 = scmp.ne.s32.totalorder %s6709_s20, %s6705_s19 }
  0x40   : > { %p27_p13 = scmp.eq.s32.totalorder %s26_s17, 0  ;;  %p37_p10 = scmp.eq.s32.totalorder %s6713_s21, 0 }
  0x41   : > { %p8514_p5 = scmp.eq.s32.totalorder %s6791_s22, 1  ;;  %p5942_p9 = scmp.lt.s32.totalorder %s6713_s21, 2 }
  0x42   : > { %s6892_s27 = scalar_select %p27_p13, %s6709_s20, %s29_s23  }
  0x43   : > { %p38_p3 = por %p37_p10, %p36_p6  ;;  %p6896_p7 = por %p8514_p5, %p36_p6 }
  0x44   : > { %s208_s30 = sand.u32 1, %s6709_s20   ;;  %s4803_s6 = sshll.u32 %s6713_s21, 10 }
  0x45   : > { %s8515_s29 = scalar_select %p6896_p7, 1, 0 }
  0x46   : > { %s4581_s7 = sshll.u32 %s208_s30, 6  ;;  %s6906_s10 = scalar_lea.hbm %s8501_s0, %s4803_s6 }
  0x47   : > { %s212_s11 = scalar_lea.vmem [#allocation4], %s4581_s7  ;;  %p6910_p11 = pnand %p5942_p9, %p38_p3 }
  0x48   : > { %s219_s28 = sshll.u32 %s212_s11, 4  ;;  %s6914_s15 = scalar_lea.sflag [#allocation5], %s208_s30  ;;  %s6908_s28 = int_to_ptr.vmem [resolvable:$true] %s219_s28 }
  0x49   : > { %s6613_s17 = scalar_lea.hbm %s6906_s10, 1024  ;;  %p6615_p0 = pneg %p6910_p11 }
  0x4a   : > { %p6614_p12 = scmp.ne.s32.totalorder %s6906_s10, %s6613_s17  ;;  %s6618_s6 = scalar_lea.hbm %s8501_s0, 2048 }
  0x4b   : > { %p6619_p13 = scmp.lt.u32.totalorder %s6906_s10, %s8501_s0  ;;  %p6620_p6 = scmp.lt.u32.totalorder %s6618_s6, %s6613_s17 }
  0x4c   : > { %p6616_p2 = pnand %p6615_p0, %p6614_p12  ;;  %p6622_p3 = scmp.lt.u32.totalorder %s6613_s17, %s6906_s10 }
  0x4d   : > { %p6621_p10 = por %p6620_p6, %p6619_p13 }
  0x4e   : > { %p6617_p1 = pneg %p6616_p2 }
  0x4f   : > { %p6623_p5 = por %p6622_p3, %p6621_p10 }
  0x51   : > { %p6624_p9 = pnand %p6623_p5, %p6617_p1 }
  0x53   : > { %6627 = shalt.err (!%p6624_p9)
}
  0x54   : > { %s6628_s30 = scalar_lea.vmem %s6908_s28, 1024  ;;  %s6721_s11 = smov [#allocation4]  }
  0x55   : > { %p6629_p12 = scmp.ne.s32.totalorder %s6908_s28, %s6628_s30  ;;  %s6633_s23 = sshll.u32 %s6721_s11, 4  ;;  %s6634_s23 = int_to_ptr.vmem [resolvable:$false] %s6633_s23 }
  0x56   : > { %s6635_s7 = scalar_lea.vmem %s6634_s23, 2048  ;;  %p6636_p4 = scmp.lt.s32.totalorder %s6908_s28, %s6634_s23 }
  0x57   : > { %p6631_p2 = pnand %p6629_p12, %p6615_p0  ;;  %p6637_p13 = scmp.lt.s32.totalorder %s6635_s7, %s6628_s30 }
  0x59   : > { %p6632_p7 = pneg %p6631_p2  ;;  %p6638_p6 = por %p6637_p13, %p6636_p4 }
  0x5b   : > { %p6639_p10 = pnand %p6638_p6, %p6632_p7 }
  0x5d   : > { %6642 = shalt.err (!%p6639_p10)
}
  0x5e   : > { %5935 = dma.hbm_to_vmem [thread:$0]  (!%p6910_p11), %s6906_s10, 1024, %s6908_s28, %s6914_s15, %s6719_s12, %s6719_s12, %s6720_s13  }
  0x5f   : > { %231 = sbr.rel (%p6810_p8) target bundleno = 5550 (0x15ae), region = 40 }
  0x66   : > { %s6948_s17 = sand.u32 1, %s6705_s19   ;;  %p8517_p4 = scmp.ne.s32.totalorder %s8510_s24, 0 }
  0x67   : > { %s4585_s6 = sshll.u32 %s6948_s17, 6  ;;  %s234_s8 = scalar_lea.sflag [#allocation5], %s6948_s17 }
  0x68   : > { %s6954_s14 = scalar_lea.vmem [#allocation4], %s4585_s6 }
  0x69   : > { %6688 = dma.done.wait (%p8517_p4), %s234_s8, 1024  }
  0x6a   : > { %6690 = vsyncadd (%p8517_p4), %s234_s8, 4294966272  ;;  %p8518_p7 = scmp.eq.s32.totalorder %s6791_s22, 0 }
  0x6c   : > { %6692 = dma.done.wait (%p8518_p7), [#allocation8], 3072   ;;  %p8519_p8 = pmov %p8518_p7 }
  0x6d   : > { %v6722_v0 = vmov 0.0   ;;  %v281_v1 = vld [vmem:[#allocation7 + $0x8] sm:$0xff]  ;;  %v283_v2 = vld [vmem:[#allocation7 + $0x18] sm:$0xff]  ;;  %v280_v3 = vld [vmem:[#allocation7] sm:$0xff]  ;;  %vm308_vm0 = vcmask 523264   ;;  %v298_v33 = vlaneseq  ;;  %vm502_vm1 = vcmask 64512  }
  0x6e   : > { %6694 = vsyncadd (%p8519_p8), [#allocation8], 4294964224  ;;  %397 = vmatprep.mubr.f32.mxu0 %v6722_v0  ;;  %v5553_v4 = vpack.c.bf16 %v283_v2, %v281_v1  ;;  %v282_v5 = vld [vmem:[#allocation7 + $0x10] sm:$0xff]  ;;  %v285_v6 = vld [vmem:[#allocation7 + $0x28] sm:$0xff]  ;;  %s6723_s12 = smov 64   ;;  %s6724_s13 = smov 56  }
  0x6f   : > { %v287_v7 = vld [vmem:[#allocation7 + $0x38] sm:$0xff]  ;;  %v5555_v8 = vpack.c.bf16 %v282_v5, %v280_v3  ;;  %v284_v10 = vld [vmem:[#allocation7 + $0x20] sm:$0xff]  ;;  %v286_v11 = vld [vmem:[#allocation7 + $0x30] sm:$0xff]  ;;  %v299_v34 = vshrl.u32 %v298_v33, 7  ;;  %s6725_s10 = smov 120   ;;  %s6726_s28 = smov 48  }
  0x70   : > { %v5557_v9 = vpack.c.bf16 %v287_v7, %v285_v6  ;;  %v289_v12 = vld [vmem:[#allocation7 + $0x48] sm:$0xff]  ;;  %5554 = vmatprep.subr.bf16.mxu0 %v5553_v4  ;;  %v291_v13 = vld [vmem:[#allocation7 + $0x58] sm:$0xff]  ;;  %v5559_v14 = vpack.c.bf16 %v286_v11, %v284_v10  ;;  %v288_v16 = vld [vmem:[#allocation7 + $0x40] sm:$0xff]  ;;  %s6727_s15 = smov 112   ;;  %s6728_s9 = smov 40   ;;  %vm1355_vm3 = vcmask 130112  }
  0x71   : > { %5556 = vmatpush1.bf16.msra.mxu0 %v5555_v8  ;;  %v5561_v15 = vpack.c.bf16 %v291_v13, %v289_v12  ;;  %v290_v17 = vld [vmem:[#allocation7 + $0x50] sm:$0xff]  ;;  %v293_v18 = vld [vmem:[#allocation7 + $0x68] sm:$0xff]  ;;  %v295_v19 = vld [vmem:[#allocation7 + $0x78] sm:$0xff]  ;;  %v300_v35 = vsub.s32 0, %v299_v34  ;;  %v304_v37 = vsub.s32 1, %v299_v34  ;;  %s6729_s30 = smov 104  }
  0x72   : > { %5558 = vmatprep.subr.bf16.mxu0 %v5557_v9  ;;  %v5563_v20 = vpack.c.bf16 %v290_v17, %v288_v16  ;;  %v5565_v21 = vpack.c.bf16 %v295_v19, %v293_v18  ;;  %v292_v22 = vld [vmem:[#allocation7 + $0x60] sm:$0xff]  ;;  %v294_v23 = vld [vmem:[#allocation7 + $0x70] sm:$0xff]  ;;  %v273_v26 = vld [vmem:[%s6954_s14 + $0x8] sm:$0xff]  ;;  %s6730_s11 = smov 32   ;;  %s6731_s23 = smov 96   ;;  %vm1846_vm4 = vcmask 195712  }
  0x73   : > { %v5567_v24 = vpack.c.bf16 %v294_v23, %v292_v22  ;;  %v272_v25 = vld [vmem:[%s6954_s14] sm:$0xff]  ;;  %v274_v27 = vld [vmem:[%s6954_s14 + $0x10] sm:$0xff]  ;;  %v275_v28 = vld [vmem:[%s6954_s14 + $0x18] sm:$0xff]  ;;  %s6732_s7 = smov 24   ;;  %s6733_s8 = smov 88   ;;  %vm2337_vm5 = vcmask 261312  }
  0x74   : > { %v276_v29 = vld [vmem:[%s6954_s14 + $0x20] sm:$0xff]  ;;  %v277_v30 = vld [vmem:[%s6954_s14 + $0x28] sm:$0xff]  ;;  %v278_v31 = vld [vmem:[%s6954_s14 + $0x30] sm:$0xff]  ;;  %s6735_s24 = smov 80   ;;  %s6736_s26 = smov 8   ;;  %vm2828_vm6 = vcmask 326912  }
  0x75   : > { %5560 = vmatpush1.bf16.msra.mxu0 %v5559_v14  ;;  %v279_v32 = vld [vmem:[%s6954_s14 + $0x38] sm:$0xff]  ;;  %v296_v36 = vld [vmem:[%s8503_s2] sm:$0x3]  ;;  %vm7108_vm2 = vmpackc.low %vm502_vm1, %vm502_vm1  ;;  %s6734_s14 = smov 16   ;;  %vm3319_vm7 = vcmask 392512   ;;  %vm3810_vm8 = vcmask 458112  }
  0x76   : > { %5562 = vmatprep.subr.bf16.mxu0 %v5561_v15  ;;  %v6983_v38 = vrot.slane %v296_v36, %v300_v35  ;;  %v6985_v39 = vrot.slane %v296_v36, %v304_v37  ;;  %vm4301_vm9 = vcmask 523712   ;;  %p8554_p0 = scmp.ne.s32.totalorder %s8515_s29, 0 }
  0x79   : > { %5564 = vmatpush1.bf16.msra.mxu0 %v5563_v20 }
  0x7a   : > { %5566 = vmatprep.subr.bf16.mxu0 %v5565_v21 }
  0x7d   : > { %5568 = vmatpush1.bf16.msra.mxu0 %v5567_v24 }
  0x80   : > { %4589 = vmatmul.mubr.msk.f32.vlgmr.msra.gmra.mrb[0].mxu0 %vm308_vm0, %v272_v25 }
  0x81   : > { %403 = vmatprep.mubr.f32.mxu0 %v6722_v0 }
  0x84   : > { %4590 = vmatmul.mubr.msk.f32.gmra.mrb[2].mxu0 %vm308_vm0, %v273_v26 }
  0x85   : > { %409 = vmatprep.mubr.f32.mxu0 %v6722_v0 }
  0x88   : > { %4591 = vmatmul.mubr.msk.f32.gmra.mrb[4].mxu0 %vm308_vm0, %v274_v27 }
  0x89   : > { %415 = vmatprep.mubr.f32.mxu0 %v6722_v0 }
  0x8c   : > { %4592 = vmatmul.mubr.msk.f32.gmra.mrb[6].mxu0 %vm308_vm0, %v275_v28 }
  0x8d   : > { %421 = vmatprep.mubr.f32.mxu0 %v6722_v0 }
  0x90   : > { %4593 = vmatmul.mubr.msk.f32.gmra.mrb[8].mxu0 %vm308_vm0, %v276_v29 }
  0x91   : > { %427 = vmatprep.mubr.f32.mxu0 %v6722_v0 }
  0x94   : > { %4594 = vmatmul.mubr.msk.f32.gmra.mrb[10].mxu0 %vm308_vm0, %v277_v30 }
  0x95   : > { %433 = vmatprep.mubr.f32.mxu0 %v6722_v0 }
  0x98   : > { %4595 = vmatmul.mubr.msk.f32.gmra.mrb[12].mxu0 %vm308_vm0, %v278_v31 }
  0x99   : > { %439 = vmatprep.mubr.f32.mxu0 %v6722_v0 }
  0x9c   : > { %4596 = vmatmul.mubr.msk.f32.gmra.mrb[14].mxu0 %vm308_vm0, %v279_v32 }
 0x153   : > { %v399_v40 = vpop.f32.mrb[0].mxu0 }
 0x154   : > { %v6988_v41 = vadd.f32 %v399_v40, %v6983_v38  ;;  %v401_v42 = vpop.f32.mrb[1].mxu0 }
 0x155   : > { %v402_v43 = vadd.f32 %v401_v42, %v6985_v39 }
 0x156   : > { %446 = vst [vmem:[#allocation2] sm:$0xff] %v6988_v41  ;;  %5093 = vmatprep.mubr.msk.f32.mxu1 %vm502_vm1, %v6988_v41 }
 0x157   : > { %447 = vst.msk [vmem:[#allocation2 + $0x8] sm:$0xff] %vm308_vm0, %v402_v43  ;;  %v405_v44 = vpop.f32.mrb[2].mxu0 }
 0x158   : > { %v6996_v45 = vadd.f32 %v405_v44, %v6983_v38  ;;  %v407_v46 = vpop.f32.mrb[3].mxu0 }
 0x159   : > { %v408_v47 = vadd.f32 %v407_v46, %v6985_v39 }
 0x15a   : > { %448 = vst [vmem:[#allocation2 + $0x10] sm:$0xff] %v6996_v45  ;;  %v7002_v48 = vpack.i.bf16 %v6996_v45, %v6988_v41 }
 0x15b   : > { %449 = vst.msk [vmem:[#allocation2 + $0x18] sm:$0xff] %vm308_vm0, %v408_v47  ;;  %v411_v49 = vpop.f32.mrb[4].mxu0 }
 0x15c   : > { %v7006_v50 = vadd.f32 %v411_v49, %v6983_v38  ;;  %v413_v51 = vpop.f32.mrb[5].mxu0  ;;  %6002 = vrot.lane.b32.xlu0 %v7002_v48, %s6723_s12 }
 0x15d   : > { %v414_v52 = vadd.f32 %v413_v51, %v6985_v39 }
 0x15e   : > { %450 = vst [vmem:[#allocation2 + $0x20] sm:$0xff] %v7006_v50  ;;  %v7018_v57 = vld [vmem:[#allocation2 + $0x8] sm:$0xff] }
 0x15f   : > { %451 = vst.msk [vmem:[#allocation2 + $0x28] sm:$0xff] %vm308_vm0, %v414_v52  ;;  %v417_v53 = vpop.f32.mrb[6].mxu0 }
 0x160   : > { %v7014_v54 = vadd.f32 %v417_v53, %v6983_v38  ;;  %v419_v55 = vpop.f32.mrb[7].mxu0 }
 0x161   : > { %v420_v56 = vadd.f32 %v419_v55, %v6985_v39 }
 0x162   : > { %452 = vst [vmem:[#allocation2 + $0x30] sm:$0xff] %v7014_v54  ;;  %v7020_v58 = vld [vmem:[#allocation2 + $0x18] sm:$0xff]  ;;  %v7024_v59 = vpack.i.bf16 %v7014_v54, %v7006_v50 }
 0x163   : > { %453 = vst.msk [vmem:[#allocation2 + $0x38] sm:$0xff] %vm308_vm0, %v420_v56  ;;  %v423_v60 = vpop.f32.mrb[8].mxu0  ;;  %v5593_v61 = vpack.c.bf16 %v7020_v58, %v7018_v57  ;;  %v6041_v27 = vpack.i.bf16 %v7020_v58, %v7018_v57 }
 0x164   : > { %v7030_v62 = vadd.f32 %v423_v60, %v6983_v38  ;;  %v425_v63 = vpop.f32.mrb[9].mxu0  ;;  %6007 = vrot.lane.b32.xlu0 %v7024_v59, %s6723_s12 }
 0x165   : > { %v426_v0 = vadd.f32 %v425_v63, %v6985_v39  ;;  %5594 = vmatprep.subr.bf16.mxu0 %v5593_v61 }
 0x166   : > { %454 = vst [vmem:[#allocation2 + $0x40] sm:$0xff] %v7030_v62  ;;  %5596 = vmatpush3.bf16.msra.mxu0 %v5593_v61  ;;  %v7044_v5 = vld [vmem:[#allocation2 + $0x28] sm:$0xff] }
 0x167   : > { %455 = vst.msk [vmem:[#allocation2 + $0x48] sm:$0xff] %vm308_vm0, %v426_v0  ;;  %v429_v1 = vpop.f32.mrb[10].mxu0 }
 0x168   : > { %v7038_v2 = vadd.f32 %v429_v1, %v6983_v38  ;;  %v431_v3 = vpop.f32.mrb[11].mxu0  ;;  %6022 = vrot.lane.b32.xlu0 %v7002_v48, %s6724_s13 }
 0x169   : > { %v432_v4 = vadd.f32 %v431_v3, %v6985_v39 }
 0x16a   : > { %456 = vst [vmem:[#allocation2 + $0x50] sm:$0xff] %v7038_v2  ;;  %v7046_v6 = vld [vmem:[#allocation2 + $0x38] sm:$0xff]  ;;  %v7050_v7 = vpack.i.bf16 %v7038_v2, %v7030_v62 }
 0x16b   : > { %457 = vst.msk [vmem:[#allocation2 + $0x58] sm:$0xff] %vm308_vm0, %v432_v4  ;;  %v435_v8 = vpop.f32.mrb[12].mxu0  ;;  %v5597_v9 = vpack.c.bf16 %v7046_v6, %v7044_v5  ;;  %v6046_v10 = vpack.i.bf16 %v7046_v6, %v7044_v5 }
 0x16c   : > { %v7058_v11 = vadd.f32 %v435_v8, %v6983_v38  ;;  %v437_v12 = vpop.f32.mrb[13].mxu0  ;;  %6012 = vrot.lane.b32.xlu1 %v7050_v7, %s6723_s12  ;;  %6032 = vrot.lane.b32.xlu0 %v7050_v7, %s6724_s13 }
 0x16d   : > { %v438_v13 = vadd.f32 %v437_v12, %v6985_v39  ;;  %5598 = vmatprep.subr.bf16.mxu0 %v5597_v9 }
 0x16e   : > { %458 = vst [vmem:[#allocation2 + $0x60] sm:$0xff] %v7058_v11  ;;  %5600 = vmatpush3.bf16.msra.mxu0 %v5597_v9  ;;  %v474_v18 = vld [vmem:[#allocation2 + $0x48] sm:$0xff] }
 0x16f   : > { %459 = vst.msk [vmem:[#allocation2 + $0x68] sm:$0xff] %vm308_vm0, %v438_v13  ;;  %v441_v14 = vpop.f32.mrb[14].mxu0 }
 0x170   : > { %v7068_v15 = vadd.f32 %v441_v14, %v6983_v38  ;;  %v443_v16 = vpop.f32.mrb[15].mxu0  ;;  %897 = vrot.lane.b32.xlu0 %v6988_v41, %s6725_s10 }
 0x171   : > { %v444_v17 = vadd.f32 %v443_v16, %v6985_v39 }
 0x172   : > { %460 = vst [vmem:[#allocation2 + $0x70] sm:$0xff] %v7068_v15  ;;  %v475_v19 = vld [vmem:[#allocation2 + $0x58] sm:$0xff]  ;;  %v7076_v20 = vpack.i.bf16 %v7068_v15, %v7058_v11 }
 0x173   : > { %461 = vst.msk [vmem:[#allocation2 + $0x78] sm:$0xff] %vm308_vm0, %v444_v17  ;;  %v5601_v21 = vpack.c.bf16 %v475_v19, %v474_v18  ;;  %v7079_v22 = vpack.i.bf16 %v475_v19, %v474_v18 }
 0x174   : > { %6017 = vrot.lane.b32.xlu1 %v7076_v20, %s6723_s12  ;;  %901 = vrot.lane.b32.xlu0 %v7006_v50, %s6725_s10  ;;  %s6737_s12 = smov 72  }
 0x175   : > { %5602 = vmatprep.subr.bf16.mxu0 %v5601_v21 }
 0x176   : > { %5604 = vmatpush3.bf16.msra.mxu0 %v5601_v21  ;;  %v476_v23 = vld [vmem:[#allocation2 + $0x68] sm:$0xff] }
 0x178   : > { %6027 = vrot.lane.b32.xlu1 %v7024_v59, %s6724_s13  ;;  %905 = vrot.lane.b32.xlu0 %v7030_v62, %s6725_s10 }
 0x17a   : > { %v477_v24 = vld [vmem:[#allocation2 + $0x78] sm:$0xff] }
 0x17b   : > { %v5605_v25 = vpack.c.bf16 %v477_v24, %v476_v23  ;;  %v7089_v26 = vpack.i.bf16 %v477_v24, %v476_v23 }
 0x17c   : > { %6037 = vrot.lane.b32.xlu1 %v7076_v20, %s6724_s13  ;;  %909 = vrot.lane.b32.xlu0 %v7058_v11, %s6725_s10 }
 0x17d   : > { %5606 = vmatprep.subr.bf16.mxu0 %v5605_v25 }
 0x17e   : > { %5608 = vmatpush3.bf16.msra.mxu0 %v5605_v25 }
 0x180   : > { %899 = vrot.lane.b32.xlu1 %v6996_v45, %s6725_s10 }
 0x184   : > { %903 = vrot.lane.b32.xlu1 %v7014_v54, %s6725_s10 }
 0x188   : > { %907 = vrot.lane.b32.xlu1 %v7038_v2, %s6725_s10 }
 0x18c   : > { %911 = vrot.lane.b32.xlu1 %v7068_v15, %s6725_s10 }
 0x190   : > { %6042 = vrot.lane.b32.xlu1 %v6041_v27, %s6725_s10 }
 0x1ce   : > { %v6003_v28 = vpop.permute.xlu0 %6002 }
 0x1cf   : > { %v6005_v29 = vunpack.i.h.bf16 %v6003_v28  ;;  %v6004_v30 = vunpack.i.l.bf16 %v6003_v28 }
 0x1d1   : > { %v5569_v32 = vpack.c.bf16 %v6005_v29, %v6004_v30 }
 0x1d3   : > { %5571 = vmatprep.subr.msk.bf16.mxu1 %vm7108_vm2, %v5569_v32 }
 0x1d4   : > { %5574 = vmatpush3.bf16.xpose.msk.msra.mxu1 %vm7108_vm2, %v5569_v32 }
 0x1d6   : > { %v6008_v33 = vpop.permute.xlu0 %6007 }
 0x1d7   : > { %v6010_v34 = vunpack.i.h.bf16 %v6008_v33  ;;  %v6009_v35 = vunpack.i.l.bf16 %v6008_v33 }
 0x1d9   : > { %v5575_v36 = vpack.c.bf16 %v6010_v34, %v6009_v35 }
 0x1da   : > { %v6023_v42 = vpop.permute.xlu0 %6022 }
 0x1db   : > { %5577 = vmatprep.subr.msk.bf16.mxu1 %vm7108_vm2, %v5575_v36  ;;  %v6025_v44 = vunpack.i.h.bf16 %v6023_v42  ;;  %v6024_v46 = vunpack.i.l.bf16 %v6023_v42 }
 0x1dc   : > { %5580 = vmatpush3.bf16.xpose.msk.msra.mxu1 %vm7108_vm2, %v5575_v36 }
 0x1dd   : > { %v5609_v53 = vpack.c.bf16 %v6025_v44, %v6024_v46 }
 0x1de   : > { %v6013_v37 = vpop.permute.xlu1 %6012  ;;  %v6033_v61 = vpop.permute.xlu0 %6032 }
 0x1df   : > { %v6015_v38 = vunpack.i.h.bf16 %v6013_v37  ;;  %v6014_v39 = vunpack.i.l.bf16 %v6013_v37  ;;  %v6035_v0 = vunpack.i.h.bf16 %v6033_v61  ;;  %v6034_v1 = vunpack.i.l.bf16 %v6033_v61 }
 0x1e1   : > { %v5581_v40 = vpack.c.bf16 %v6015_v38, %v6014_v39  ;;  %v5621_v4 = vpack.c.bf16 %v6035_v0, %v6034_v1 }
 0x1e2   : > { %v898_v9 = vpop.permute.xlu0 %897 }
 0x1e3   : > { %5583 = vmatprep.subr.msk.bf16.mxu1 %vm7108_vm2, %v5581_v40 }
 0x1e4   : > { %5586 = vmatpush3.bf16.xpose.msk.msra.mxu1 %vm7108_vm2, %v5581_v40 }
 0x1e6   : > { %v6018_v43 = vpop.permute.xlu1 %6017  ;;  %v902_v21 = vpop.permute.xlu0 %901 }
 0x1e7   : > { %v6020_v47 = vunpack.i.h.bf16 %v6018_v43  ;;  %v6019_v49 = vunpack.i.l.bf16 %v6018_v43 }
 0x1e9   : > { %v5587_v51 = vpack.c.bf16 %v6020_v47, %v6019_v49 }
 0x1ea   : > { %v6028_v52 = vpop.permute.xlu1 %6027  ;;  %v906_v23 = vpop.permute.xlu0 %905 }
 0x1eb   : > { %5589 = vmatprep.subr.msk.bf16.mxu1 %vm7108_vm2, %v5587_v51  ;;  %v6030_v56 = vunpack.i.h.bf16 %v6028_v52  ;;  %v6029_v57 = vunpack.i.l.bf16 %v6028_v52 }
 0x1ec   : > { %5592 = vmatpush3.bf16.xpose.msk.msra.mxu1 %vm7108_vm2, %v5587_v51 }
 0x1ed   : > { %5611 = vmatprep.subr.msk.bf16.mxu1 %vm7108_vm2, %v5609_v53  ;;  %v5615_v60 = vpack.c.bf16 %v6030_v56, %v6029_v57 }
 0x1ee   : > { %v6038_v55 = vpop.permute.xlu1 %6037  ;;  %v910_v24 = vpop.permute.xlu0 %909 }
 0x1ef   : > { %v6040_v12 = vunpack.i.h.bf16 %v6038_v55  ;;  %v6039_v13 = vunpack.i.l.bf16 %v6038_v55 }
 0x1f1   : > { %v5627_v16 = vpack.c.bf16 %v6040_v12, %v6039_v13 }
 0x1f2   : > { %v900_v58 = vpop.permute.xlu1 %899 }
 0x1f3   : > { %5094 = vmatmul.mubr.msk.f32.vlgmr.msra.gmra.mrb[0].mxu1 %vm502_vm1, %v6996_v45 }
 0x1f4   : > { %5096 = vmatprep.mubr.msk.f32.mxu1 %vm502_vm1, %v7006_v50  ;;  %5614 = vmatpush3.bf16.xpose.msk.msra.mxu1 %vm7108_vm2, %v5609_v53 }
 0x1f5   : > { %5617 = vmatprep.subr.msk.bf16.mxu1 %vm7108_vm2, %v5615_v60 }
 0x1f6   : > { %v904_v63 = vpop.permute.xlu1 %903 }
 0x1f7   : > { %5097 = vmatmul.mubr.msk.f32.gmra.mrb[2].mxu1 %vm502_vm1, %v7014_v54 }
 0x1f8   : > { %5099 = vmatprep.mubr.msk.f32.mxu1 %vm502_vm1, %v7030_v62 }
 0x1fa   : > { %v908_v3 = vpop.permute.xlu1 %907 }
 0x1fb   : > { %5100 = vmatmul.mubr.msk.f32.gmra.mrb[4].mxu1 %vm502_vm1, %v7038_v2 }
 0x1fc   : > { %5102 = vmatprep.mubr.msk.f32.mxu1 %vm502_vm1, %v7058_v11  ;;  %5620 = vmatpush3.bf16.xpose.msk.msra.mxu1 %vm7108_vm2, %v5615_v60 }
 0x1fd   : > { %5623 = vmatprep.subr.msk.bf16.mxu1 %vm7108_vm2, %v5621_v4 }
 0x1fe   : > { %v912_v8 = vpop.permute.xlu1 %911 }
 0x1ff   : > { %5103 = vmatmul.mubr.msk.f32.gmra.mrb[6].mxu1 %vm502_vm1, %v7068_v15 }
 0x200   : > { %5149 = vmatprep.mubr.msk.f32.mxu1 %vm502_vm1, %v898_v9 }
 0x202   : > { %v6043_v14 = vpop.permute.xlu1 %6042 }
 0x203   : > { %v6045_v17 = vunpack.i.h.bf16 %v6043_v14  ;;  %v6044_v18 = vunpack.i.l.bf16 %v6043_v14 }
 0x204   : > { %5626 = vmatpush3.bf16.xpose.msk.msra.mxu1 %vm7108_vm2, %v5621_v4 }
 0x205   : > { %5629 = vmatprep.subr.msk.bf16.mxu1 %vm7108_vm2, %v5627_v16  ;;  %v7157_v19 = vpack.c.bf16 %v6045_v17, %v6044_v18 }
 0x207   : > { %5634 = vmatprep.subr.bf16.mxu0 %v7157_v19 }
 0x20c   : > { %5632 = vmatpush3.bf16.xpose.msk.msra.mxu1 %vm7108_vm2, %v5627_v16 }
 0x213   : > { %5150 = vmatmul.mubr.msk.f32.vlgmr.msra.gmra.mrb[8].mxu1 %vm502_vm1, %v900_v58 }
 0x214   : > { %5152 = vmatprep.mubr.msk.f32.mxu1 %vm502_vm1, %v902_v21 }
 0x217   : > { %5153 = vmatmul.mubr.msk.f32.gmra.mrb[10].mxu1 %vm502_vm1, %v904_v63 }
 0x218   : > { %5155 = vmatprep.mubr.msk.f32.mxu1 %vm502_vm1, %v906_v23 }
 0x21b   : > { %5156 = vmatmul.mubr.msk.f32.gmra.mrb[12].mxu1 %vm502_vm1, %v908_v3 }
 0x21c   : > { %5158 = vmatprep.mubr.msk.f32.mxu1 %vm502_vm1, %v910_v24 }
 0x21f   : > { %5159 = vmatmul.mubr.msk.f32.gmra.mrb[14].mxu1 %vm502_vm1, %v912_v8 }
 0x2c6   : > { %v5095_v25 = vpop.f32.mrb[0].mxu1 }
 0x2c7   : > { %v7169_v27 = vmul.f32 0.35355338, %v5095_v25  ;;  %v601_v28 = vpop.f32.mrb[1].mxu1 }
 0x2c8   : > { %v7171_v29 = vmul.f32 0.35355338, %v601_v28 }
 0x2c9   : > { %v651_v30 = vsel %vm308_vm0, %v7169_v27, -inf }
 0x2ca   : > { %652 = vmax.xlane.f32.xlu1 %v651_v30  ;;  %v5098_v32 = vpop.f32.mrb[2].mxu1  ;;  %v648_v33 = vsel %vm308_vm0, %v7171_v29, -inf }
 0x2cb   : > { %v7177_v34 = vmul.f32 0.35355338, %v5098_v32  ;;  %649 = vmax.xlane.f32.xlu0 %v648_v33  ;;  %v611_v35 = vpop.f32.mrb[3].mxu1 }
 0x2cc   : > { %v7181_v37 = vmul.f32 0.35355338, %v611_v35 }
 0x2cd   : > { %v657_v36 = vsel %vm308_vm0, %v7177_v34, -inf }
 0x2ce   : > { %v5101_v38 = vpop.f32.mrb[4].mxu1  ;;  %v654_v44 = vsel %vm308_vm0, %v7181_v37, -inf }
 0x2cf   : > { %658 = vmax.xlane.f32.xlu0 %v657_v36  ;;  %v621_v39 = vpop.f32.mrb[5].mxu1  ;;  %v7185_v42 = vmul.f32 0.35355338, %v5101_v38 }
 0x2d0   : > { %v7183_v40 = vmul.f32 0.35355338, %v621_v39 }
 0x2d1   : > { %v663_v52 = vsel %vm308_vm0, %v7185_v42, -inf }
 0x2d2   : > { %v5104_v43 = vpop.f32.mrb[6].mxu1  ;;  %v660_v46 = vsel %vm308_vm0, %v7183_v40, -inf }
 0x2d3   : > { %655 = vmax.xlane.f32.xlu0 %v654_v44  ;;  %661 = vmax.xlane.f32.xlu1 %v660_v46  ;;  %v631_v47 = vpop.f32.mrb[7].mxu1  ;;  %v7193_v51 = vmul.f32 0.35355338, %v5104_v43 }
 0x2d4   : > { %v7191_v49 = vmul.f32 0.35355338, %v631_v47 }
 0x2d5   : > { %v669_v55 = vsel %vm308_vm0, %v7193_v51, -inf }
 0x2d6   : > { %v666_v53 = vsel %vm308_vm0, %v7191_v49, -inf }
 0x2d7   : > { %664 = vmax.xlane.f32.xlu0 %v663_v52  ;;  %667 = vmax.xlane.f32.xlu1 %v666_v53 }
 0x2db   : > { %670 = vmax.xlane.f32.xlu0 %v669_v55 }
 0x2e6   : > { %v5151_v56 = vpop.f32.mrb[8].mxu1 }
 0x2e7   : > { %v7201_v57 = vmul.f32 0.35355338, %v5151_v56  ;;  %v1027_v58 = vpop.f32.mrb[9].mxu1 }
 0x2e8   : > { %v7203_v60 = vmul.f32 0.35355338, %v1027_v58 }
 0x2e9   : > { %v1077_v61 = vsel %vm308_vm0, %v7201_v57, -inf }
 0x2ea   : > { %1078 = vmax.xlane.f32.xlu0 %v1077_v61  ;;  %v5154_v63 = vpop.f32.mrb[10].mxu1  ;;  %v1074_v0 = vsel %vm308_vm0, %v7203_v60, -inf }
 0x2eb   : > { %v7209_v1 = vmul.f32 0.35355338, %v5154_v63  ;;  %v1037_v3 = vpop.f32.mrb[11].mxu1  ;;  %1075 = vmax.xlane.f32.xlu1 %v1074_v0 }
 0x2ec   : > { %v7211_v4 = vmul.f32 0.35355338, %v1037_v3 }
 0x2ed   : > { %v1083_v8 = vsel %vm308_vm0, %v7209_v1, -inf }
 0x2ee   : > { %1084 = vmax.xlane.f32.xlu0 %v1083_v8  ;;  %v5157_v9 = vpop.f32.mrb[12].mxu1  ;;  %v1080_v12 = vsel %vm308_vm0, %v7211_v4, -inf }
 0x2ef   : > { %v7217_v13 = vmul.f32 0.35355338, %v5157_v9  ;;  %v1047_v14 = vpop.f32.mrb[13].mxu1  ;;  %1081 = vmax.xlane.f32.xlu1 %v1080_v12 }
 0x2f0   : > { %v7219_v16 = vmul.f32 0.35355338, %v1047_v14 }
 0x2f1   : > { %v1089_v17 = vsel %vm308_vm0, %v7217_v13, -inf }
 0x2f2   : > { %1090 = vmax.xlane.f32.xlu0 %v1089_v17  ;;  %v5160_v18 = vpop.f32.mrb[14].mxu1  ;;  %v1086_v21 = vsel %vm308_vm0, %v7219_v16, -inf }
 0x2f3   : > { %v7225_v23 = vmul.f32 0.35355338, %v5160_v18  ;;  %v1057_v24 = vpop.f32.mrb[15].mxu1  ;;  %1087 = vmax.xlane.f32.xlu1 %v1086_v21 }
 0x2f4   : > { %v7237_v28 = vmul.f32 0.35355338, %v1057_v24 }
 0x2f5   : > { %v1095_v25 = vsel %vm308_vm0, %v7225_v23, -inf }
 0x2f6   : > { %1096 = vmax.xlane.f32.xlu0 %v1095_v25  ;;  %v1092_v30 = vsel %vm308_vm0, %v7237_v28, -inf }
 0x304   : > { %6052 = vrot.lane.b32.xlu1 %v7079_v22, %s6725_s10 }
 0x308   : > { %6057 = vrot.lane.b32.xlu1 %v7089_v26, %s6725_s10 }
 0x30c   : > { %6047 = vrot.lane.b32.xlu0 %v6046_v10, %s6725_s10 }
 0x32c   : > { %1093 = vmax.xlane.f32.xlu1 %v1092_v30 }
 0x357   : > { %v653_v32 = vpop.xlane.xlu1 %652 }
 0x358   : > { %v673_v33 = vsub.f32 %v7169_v27, %v653_v32  ;;  %v650_v35 = vpop.xlane.xlu0 %649 }
 0x359   : > { %v672_v36 = vsub.f32 %v7171_v29, %v650_v35 }
 0x35a   : > { %v682_v38 = vmul.f32 1.442695, %v673_v33 }
 0x35b   : > { %v680_v39 = vmul.f32 1.442695, %v672_v36 }
 0x35c   : > { %6301 = vpow2.f32 %v682_v38  ;;  %v659_v43 = vpop.xlane.xlu0 %658 }
 0x35d   : > { %6303 = vpow2.f32 %v680_v39  ;;  %v675_v5 = vsub.f32 %v7177_v34, %v659_v43 }
 0x35f   : > { %v686_v6 = vmul.f32 1.442695, %v675_v5 }
 0x360   : > { %v656_v10 = vpop.xlane.xlu0 %655  ;;  %v662_v44 = vpop.xlane.xlu1 %661 }
 0x361   : > { %6305 = vpow2.f32 %v686_v6  ;;  %v674_v46 = vsub.f32 %v7181_v37, %v656_v10  ;;  %v676_v47 = vsub.f32 %v7183_v40, %v662_v44 }
 0x363   : > { %v684_v52 = vmul.f32 1.442695, %v674_v46  ;;  %v688_v27 = vmul.f32 1.442695, %v676_v47 }
 0x364   : > { %v665_v53 = vpop.xlane.xlu0 %664  ;;  %v668_v55 = vpop.xlane.xlu1 %667 }
 0x365   : > { %6307 = vpow2.f32 %v684_v52  ;;  %v677_v29 = vsub.f32 %v7185_v42, %v665_v53  ;;  %v678_v56 = vsub.f32 %v7191_v49, %v668_v55 }
 0x366   : > { %v7248_v58 = vpop.eup %6301  ;;  %6309 = vpow2.f32 %v688_v27 }
 0x367   : > { %v7250_v34 = vpop.eup %6303  ;;  %v690_v61 = vmul.f32 1.442695, %v677_v29  ;;  %v692_v63 = vmul.f32 1.442695, %v678_v56  ;;  %v699_v37 = vsel %vm308_vm0, %v7248_v58, 0.0 }
 0x368   : > { %v671_v40 = vpop.xlane.xlu0 %670  ;;  %700 = vadd.xlane.f32.xlu0 %v699_v37  ;;  %v696_v0 = vsel %vm308_vm0, %v7250_v34, 0.0 }
 0x369   : > { %6311 = vpow2.f32 %v690_v61  ;;  %v679_v42 = vsub.f32 %v7193_v51, %v671_v40  ;;  %697 = vadd.xlane.f32.xlu1 %v696_v0 }
 0x36a   : > { %6313 = vpow2.f32 %v692_v63 }
 0x36b   : > { %v7257_v49 = vpop.eup %6305  ;;  %v694_v3 = vmul.f32 1.442695, %v679_v42 }
 0x36c   : > { %v705_v8 = vsel %vm308_vm0, %v7257_v49, 0.0 }
 0x36d   : > { %6315 = vpow2.f32 %v694_v3  ;;  %706 = vadd.xlane.f32.xlu0 %v705_v8 }
 0x36f   : > { %v7261_v9 = vpop.eup %6307 }
 0x370   : > { %v702_v12 = vsel %vm308_vm0, %v7261_v9, 0.0  ;;  %v7265_v14 = vpop.eup %6309 }
 0x371   : > { %703 = vadd.xlane.f32.xlu1 %v702_v12  ;;  %v708_v18 = vsel %vm308_vm0, %v7265_v14, 0.0 }
 0x373   : > { %v7267_v17 = vpop.eup %6311 }
 0x374   : > { %v711_v51 = vsel %vm308_vm0, %v7267_v17, 0.0  ;;  %v7273_v21 = vpop.eup %6313 }
 0x375   : > { %712 = vadd.xlane.f32.xlu0 %v711_v51  ;;  %709 = vadd.xlane.f32.xlu1 %v708_v18  ;;  %v714_v35 = vsel %vm308_vm0, %v7273_v21, 0.0 }
 0x377   : > { %v7275_v24 = vpop.eup %6315  ;;  %v1079_v25 = vpop.xlane.xlu0 %1078 }
 0x378   : > { %v1099_v30 = vsub.f32 %v7201_v57, %v1079_v25  ;;  %v1076_v32 = vpop.xlane.xlu1 %1075  ;;  %v717_v33 = vsel %vm308_vm0, %v7275_v24, 0.0 }
 0x379   : > { %v1098_v36 = vsub.f32 %v7203_v60, %v1076_v32  ;;  %718 = vadd.xlane.f32.xlu0 %v717_v33  ;;  %715 = vadd.xlane.f32.xlu1 %v714_v35 }
 0x37a   : > { %v1108_v38 = vmul.f32 1.442695, %v1099_v30 }
 0x37b   : > { %v1106_v39 = vmul.f32 1.442695, %v1098_v36  ;;  %v1085_v43 = vpop.xlane.xlu0 %1084 }
 0x37c   : > { %6317 = vpow2.f32 %v1108_v38  ;;  %v1082_v5 = vpop.xlane.xlu1 %1081  ;;  %v1101_v3 = vsub.f32 %v7209_v1, %v1085_v43 }
 0x37d   : > { %6319 = vpow2.f32 %v1106_v39  ;;  %v1100_v6 = vsub.f32 %v7211_v4, %v1082_v5 }
 0x37e   : > { %v1112_v8 = vmul.f32 1.442695, %v1101_v3 }
 0x37f   : > { %v1110_v57 = vmul.f32 1.442695, %v1100_v6  ;;  %v1091_v10 = vpop.xlane.xlu0 %1090 }
 0x380   : > { %v1103_v44 = vsub.f32 %v7217_v13, %v1091_v10  ;;  %v1088_v46 = vpop.xlane.xlu1 %1087 }
 0x381   : > { %6321 = vpow2.f32 %v1110_v57  ;;  %v1102_v47 = vsub.f32 %v7219_v16, %v1088_v46 }
 0x382   : > { %v1116_v52 = vmul.f32 1.442695, %v1103_v44 }
 0x383   : > { %v1114_v60 = vmul.f32 1.442695, %v1102_v47  ;;  %v1097_v27 = vpop.xlane.xlu0 %1096 }
 0x384   : > { %6323 = vpow2.f32 %v1116_v52  ;;  %v1105_v53 = vsub.f32 %v7225_v23, %v1097_v27  ;;  %v6053_v12 = vpop.permute.xlu1 %6052 }
 0x385   : > { %6325 = vpow2.f32 %v1114_v60  ;;  %v6054_v38 = vunpack.i.l.bf16 %v6053_v12 }
 0x386   : > { %v7287_v55 = vpop.eup %6317  ;;  %v1120_v4 = vmul.f32 1.442695, %v1105_v53 }
 0x387   : > { %v7289_v29 = vpop.eup %6319  ;;  %v1125_v56 = vsel %vm308_vm0, %v7287_v55, 0.0 }
 0x388   : > { %1126 = vadd.xlane.f32.xlu0 %v1125_v56  ;;  %v1122_v13 = vsel %vm308_vm0, %v7289_v29, 0.0  ;;  %6327 = vpow2.f32 %v1120_v4  ;;  %v7314_v51 = vpop.permute.xlu1 %6057 }
 0x389   : > { %1123 = vadd.xlane.f32.xlu1 %v1122_v13  ;;  %6329 = vpow2.f32 %v1112_v8  ;;  %v6059_v57 = vunpack.i.l.bf16 %v7314_v51 }
 0x38b   : > { %v7295_v16 = vpop.eup %6321 }
 0x38c   : > { %v1128_v23 = vsel %vm308_vm0, %v7295_v16, 0.0 }
 0x38d   : > { %1129 = vadd.xlane.f32.xlu0 %v1128_v23 }
 0x38e   : > { %v7299_v61 = vpop.eup %6323 }
 0x38f   : > { %v1137_v63 = vsel %vm308_vm0, %v7299_v61, 0.0  ;;  %v7303_v37 = vpop.eup %6325 }
 0x390   : > { %v1134_v40 = vsel %vm308_vm0, %v7303_v37, 0.0 }
 0x391   : > { %1138 = vadd.xlane.f32.xlu0 %v1137_v63 }
 0x392   : > { %v7307_v0 = vpop.eup %6327 }
 0x393   : > { %v1143_v42 = vsel %vm308_vm0, %v7307_v0, 0.0  ;;  %v7316_v25 = vpop.eup %6329 }
 0x394   : > { %v1131_v33 = vsel %vm308_vm0, %v7316_v25, 0.0 }
 0x395   : > { %1135 = vadd.xlane.f32.xlu0 %v1134_v40 }
 0x399   : > { %1144 = vadd.xlane.f32.xlu0 %v1143_v42 }
 0x39a   : > { %6062 = vrot.lane.b32.xlu1 %v7002_v48, %s6726_s28 }
 0x3b9   : > { %v1094_v18 = vpop.xlane.xlu1 %1093 }
 0x3ba   : > { %v1104_v30 = vsub.f32 %v7237_v28, %v1094_v18 }
 0x3bc   : > { %v1118_v32 = vmul.f32 1.442695, %v1104_v30 }
 0x3be   : > { %6331 = vpow2.f32 %v1118_v32  ;;  %1132 = vadd.xlane.f32.xlu1 %v1131_v33 }
 0x3c8   : > { %v7321_v35 = vpop.eup %6331 }
 0x3c9   : > { %v1140_v48 = vsel %vm308_vm0, %v7321_v35, 0.0 }
 0x3ca   : > { %1141 = vadd.xlane.f32.xlu0 %v1140_v48 }
 0x3cf   : > { %6072 = vrot.lane.b32.xlu1 %v7050_v7, %s6726_s28 }
 0x3d3   : > { %6077 = vrot.lane.b32.xlu1 %v7076_v20, %s6726_s28 }
 0x3d7   : > { %1388 = vrot.lane.b32.xlu1 %v6988_v41, %s6727_s15  ;;  %v6048_v41 = vpop.permute.xlu0 %6047 }
 0x3d8   : > { %v6050_v20 = vunpack.i.h.bf16 %v6048_v41  ;;  %v6049_v1 = vunpack.i.l.bf16 %v6048_v41 }
 0x3da   : > { %v5637_v39 = vpack.c.bf16 %v6050_v20, %v6049_v1 }
 0x3db   : > { %1390 = vrot.lane.b32.xlu1 %v6996_v45, %s6727_s15 }
 0x3df   : > { %1394 = vrot.lane.b32.xlu1 %v7014_v54, %s6727_s15 }
 0x3e0   : > { %6067 = vrot.lane.b32.xlu0 %v7024_v59, %s6726_s28 }
 0x3e3   : > { %1398 = vrot.lane.b32.xlu1 %v7038_v2, %s6727_s15 }
 0x3e4   : > { %1392 = vrot.lane.b32.xlu0 %v7006_v50, %s6727_s15 }
 0x3e7   : > { %1402 = vrot.lane.b32.xlu1 %v7068_v15, %s6727_s15 }
 0x3e8   : > { %1396 = vrot.lane.b32.xlu0 %v7030_v62, %s6727_s15 }
 0x3ec   : > { %1400 = vrot.lane.b32.xlu0 %v7058_v11, %s6727_s15  ;;  %v6055_v11 = vunpack.i.h.bf16 %v6053_v12 }
 0x3ee   : > { %v5641_v10 = vpack.c.bf16 %v6055_v11, %v6054_v38 }
 0x3f5   : > { %v701_v45 = vpop.xlane.xlu0 %700 }
 0x3f6   : > { %6333 = vrcp.f32 %v701_v45  ;;  %v698_v54 = vpop.xlane.xlu1 %697 }
 0x3f7   : > { %6335 = vrcp.f32 %v698_v54 }
 0x3fa   : > { %v707_v59 = vpop.xlane.xlu0 %706 }
 0x3fb   : > { %6337 = vrcp.f32 %v707_v59 }
 0x3fe   : > { %v704_v2 = vpop.xlane.xlu1 %703 }
 0x3ff   : > { %6339 = vrcp.f32 %v704_v2 }
 0x400   : > { %v6334_v7 = vpop.eup %6333 }
 0x401   : > { %v6336_v50 = vpop.eup %6335  ;;  %v723_v36 = vmul.f32 %v6334_v7, %v7248_v58  ;;  %v6060_v58 = vunpack.i.h.bf16 %v7314_v51 }
 0x402   : > { %v713_v15 = vpop.xlane.xlu0 %712  ;;  %v710_v28 = vpop.xlane.xlu1 %709  ;;  %v721_v62 = vmul.f32 %v6336_v50, %v7250_v34 }
 0x403   : > { %6341 = vrcp.f32 %v713_v15  ;;  %v5645_v47 = vpack.c.bf16 %v6060_v58, %v6059_v57 }
 0x404   : > { %6343 = vrcp.f32 %v710_v28  ;;  %5121 = vmatprep.mubr.msk.f32.mxu0 %vm308_vm0, %v721_v62 }
 0x405   : > { %5122 = vmatmul.mubr.msk.f32.vlgmr.msra.gmra.mrb[16].mxu0 %vm308_vm0, %v723_v36  ;;  %v6338_v6 = vpop.eup %6337 }
 0x406   : > { %5636 = vmatpush3.bf16.msra.mxu0 %v7157_v19  ;;  %v719_v43 = vpop.xlane.xlu0 %718  ;;  %v716_v5 = vpop.xlane.xlu1 %715  ;;  %v727_v46 = vmul.f32 %v6338_v6, %v7257_v49 }
 0x407   : > { %6345 = vrcp.f32 %v719_v43  ;;  %5638 = vmatprep.subr.bf16.mxu0 %v5637_v39 }
 0x408   : > { %6347 = vrcp.f32 %v716_v5 }
 0x409   : > { %v6340_v34 = vpop.eup %6339 }
 0x40a   : > { %5640 = vmatpush3.bf16.msra.mxu0 %v5637_v39  ;;  %v725_v44 = vmul.f32 %v6340_v34, %v7261_v9 }
 0x40b   : > { %5642 = vmatprep.subr.bf16.mxu0 %v5641_v10 }
 0x40c   : > { %5124 = vmatprep.mubr.msk.f32.mxu0 %vm308_vm0, %v725_v44 }
 0x40d   : > { %v6342_v19 = vpop.eup %6341  ;;  %5125 = vmatmul.mubr.msk.f32.gmra.mrb[18].mxu0 %vm308_vm0, %v727_v46 }
 0x40e   : > { %v6344_v52 = vpop.eup %6343  ;;  %5644 = vmatpush3.bf16.msra.mxu0 %v5641_v10  ;;  %v731_v60 = vmul.f32 %v6342_v19, %v7267_v17 }
 0x40f   : > { %5646 = vmatprep.subr.bf16.mxu0 %v5645_v47  ;;  %v729_v27 = vmul.f32 %v6344_v52, %v7265_v14 }
 0x411   : > { %v6346_v53 = vpop.eup %6345  ;;  %5127 = vmatprep.mubr.msk.f32.mxu0 %vm308_vm0, %v729_v27 }
 0x412   : > { %v6348_v9 = vpop.eup %6347  ;;  %5128 = vmatmul.mubr.msk.f32.gmra.mrb[20].mxu0 %vm308_vm0, %v731_v60  ;;  %v735_v49 = vmul.f32 %v6346_v53, %v7275_v24 }
 0x413   : > { %5648 = vmatpush3.bf16.msra.mxu0 %v5645_v47  ;;  %v733_v4 = vmul.f32 %v6348_v9, %v7273_v21 }
 0x415   : > { %5130 = vmatprep.mubr.msk.f32.mxu0 %vm308_vm0, %v733_v4  ;;  %v1127_v56 = vpop.xlane.xlu0 %1126 }
 0x416   : > { %6349 = vrcp.f32 %v1127_v56  ;;  %5131 = vmatmul.mubr.msk.f32.gmra.mrb[22].mxu0 %vm308_vm0, %v735_v49  ;;  %v1124_v17 = vpop.xlane.xlu1 %1123 }
 0x417   : > { %6351 = vrcp.f32 %v1124_v17 }
 0x41a   : > { %v1130_v14 = vpop.xlane.xlu0 %1129  ;;  %v6063_v13 = vpop.permute.xlu1 %6062 }
 0x41b   : > { %6353 = vrcp.f32 %v1130_v14  ;;  %v6065_v23 = vunpack.i.h.bf16 %v6063_v13  ;;  %v6064_v63 = vunpack.i.l.bf16 %v6063_v13 }
 0x41d   : > { %v5649_v40 = vpack.c.bf16 %v6065_v23, %v6064_v63 }
 0x41e   : > { %v1139_v51 = vpop.xlane.xlu0 %1138 }
 0x41f   : > { %5651 = vmatprep.subr.msk.bf16.mxu0 %vm7108_vm2, %v5649_v40 }
 0x420   : > { %v6350_v24 = vpop.eup %6349 }
 0x421   : > { %v6352_v42 = vpop.eup %6351  ;;  %v1149_v3 = vmul.f32 %v6350_v24, %v7287_v55 }
 0x422   : > { %v1147_v21 = vmul.f32 %v6352_v42, %v7289_v29  ;;  %v1136_v18 = vpop.xlane.xlu0 %1135 }
 0x423   : > { %6355 = vrcp.f32 %v1136_v18 }
 0x424   : > { %5177 = vmatprep.mubr.msk.f32.mxu0 %vm308_vm0, %v1147_v21 }
 0x425   : > { %v6354_v8 = vpop.eup %6353  ;;  %5178 = vmatmul.mubr.msk.f32.vlgmr.msra.gmra.mrb[24].mxu0 %vm308_vm0, %v1149_v3 }
 0x426   : > { %5654 = vmatpush3.bf16.xpose.msk.msra.mxu0 %vm7108_vm2, %v5649_v40  ;;  %v1151_v12 = vmul.f32 %v6354_v8, %v7295_v16  ;;  %v1145_v29 = vpop.xlane.xlu0 %1144 }
 0x428   : > { %5180 = vmatprep.mubr.msk.f32.mxu0 %vm308_vm0, %v1151_v12 }
 0x42d   : > { %v6356_v55 = vpop.eup %6355 }
 0x42e   : > { %v1155_v45 = vmul.f32 %v6356_v55, %v7303_v37 }
 0x44b   : > { %v1133_v30 = vpop.xlane.xlu1 %1132 }
 0x44c   : > { %6357 = vrcp.f32 %v1133_v30 }
 0x44d   : > { %6359 = vrcp.f32 %v1139_v51 }
 0x44e   : > { %6361 = vrcp.f32 %v1145_v29 }
 0x44f   : > { %v6073_v16 = vpop.permute.xlu1 %6072 }
 0x450   : > { %v6075_v2 = vunpack.i.h.bf16 %v6073_v16  ;;  %v6074_v7 = vunpack.i.l.bf16 %v6073_v16  ;;  %v1372_v16 = vld [vmem:[#allocation2 + $0x8] sm:$0xff] }
 0x453   : > { %v6078_v15 = vpop.permute.xlu1 %6077 }
 0x454   : > { %v6080_v62 = vunpack.i.h.bf16 %v6078_v15  ;;  %v6079_v36 = vunpack.i.l.bf16 %v6078_v15 }
 0x456   : > { %v6358_v32 = vpop.eup %6357  ;;  %v5667_v39 = vpack.c.bf16 %v6080_v62, %v6079_v36 }
 0x457   : > { %v1142_v33 = vpop.xlane.xlu0 %1141  ;;  %v1153_v48 = vmul.f32 %v6358_v32, %v7316_v25  ;;  %v6360_v41 = vpop.eup %6359  ;;  %v5661_v25 = vpack.c.bf16 %v6075_v2, %v6074_v7  ;;  %v1375_v2 = vld [vmem:[#allocation2 + $0x38] sm:$0xff]  ;;  %v1374_v7 = vld [vmem:[#allocation2 + $0x28] sm:$0xff] }
 0x458   : > { %6363 = vrcp.f32 %v1142_v33  ;;  %v1157_v59 = vmul.f32 %v6360_v41, %v7299_v61  ;;  %v6362_v37 = vpop.eup %6361  ;;  %v1389_v38 = vpop.permute.xlu1 %1388 }
 0x459   : > { %5181 = vmatmul.mubr.msk.f32.gmra.mrb[26].mxu0 %vm308_vm0, %v1153_v48  ;;  %v1161_v11 = vmul.f32 %v6362_v37, %v7307_v0 }
 0x45a   : > { %5183 = vmatprep.mubr.msk.f32.mxu0 %vm308_vm0, %v1155_v45  ;;  %v1373_v45 = vld [vmem:[#allocation2 + $0x18] sm:$0xff] }
 0x45b   : > { %v6068_v54 = vpop.permute.xlu0 %6067 }
 0x45c   : > { %v6070_v50 = vunpack.i.h.bf16 %v6068_v54  ;;  %v6069_v20 = vunpack.i.l.bf16 %v6068_v54  ;;  %v1391_v43 = vpop.permute.xlu1 %1390  ;;  %v7440_v54 = vpack.i.bf16 %v1373_v45, %v1372_v16 }
 0x45d   : > { %5184 = vmatmul.mubr.msk.f32.gmra.mrb[28].mxu0 %vm308_vm0, %v1157_v59 }
 0x45e   : > { %v5655_v1 = vpack.c.bf16 %v6070_v50, %v6069_v20  ;;  %v7446_v50 = vpack.i.bf16 %v1375_v2, %v1374_v7 }
 0x460   : > { %5657 = vmatprep.subr.msk.bf16.mxu0 %vm7108_vm2, %v5655_v1  ;;  %v1395_v0 = vpop.permute.xlu1 %1394 }
 0x461   : > { %5660 = vmatpush3.bf16.xpose.msk.msra.mxu0 %vm7108_vm2, %v5655_v1 }
 0x462   : > { %v6364_v28 = vpop.eup %6363  ;;  %5663 = vmatprep.subr.msk.bf16.mxu0 %vm7108_vm2, %v5661_v25 }
 0x463   : > { %v1159_v61 = vmul.f32 %v6364_v28, %v7321_v35  ;;  %v1393_v35 = vpop.permute.xlu0 %1392 }
 0x464   : > { %v1399_v6 = vpop.permute.xlu1 %1398 }
 0x465   : > { %5186 = vmatprep.mubr.msk.f32.mxu0 %vm308_vm0, %v1159_v61 }
 0x466   : > { %5187 = vmatmul.mubr.msk.f32.gmra.mrb[30].mxu0 %vm308_vm0, %v1161_v11 }
 0x467   : > { %5205 = vmatprep.mubr.msk.f32.mxu0 %vm502_vm1, %v1389_v38  ;;  %v1397_v5 = vpop.permute.xlu0 %1396 }
 0x468   : > { %v1403_v58 = vpop.permute.xlu1 %1402 }
 0x469   : > { %5666 = vmatpush3.bf16.xpose.msk.msra.mxu0 %vm7108_vm2, %v5661_v25 }
 0x46a   : > { %5669 = vmatprep.subr.msk.bf16.mxu0 %vm7108_vm2, %v5667_v39 }
 0x46b   : > { %v1401_v34 = vpop.permute.xlu0 %1400 }
 0x471   : > { %5672 = vmatpush3.bf16.xpose.msk.msra.mxu0 %vm7108_vm2, %v5667_v39 }
 0x478   : > { %5206 = vmatmul.mubr.msk.f32.vlgmr.msra.gmra.mrb[32].mxu0 %vm502_vm1, %v1391_v43 }
 0x479   : > { %5208 = vmatprep.mubr.msk.f32.mxu0 %vm502_vm1, %v1393_v35 }
 0x47c   : > { %5209 = vmatmul.mubr.msk.f32.gmra.mrb[34].mxu0 %vm502_vm1, %v1395_v0 }
 0x47d   : > { %5211 = vmatprep.mubr.msk.f32.mxu0 %vm502_vm1, %v1397_v5 }
 0x480   : > { %5212 = vmatmul.mubr.msk.f32.gmra.mrb[36].mxu0 %vm502_vm1, %v1399_v6 }
 0x481   : > { %5214 = vmatprep.mubr.msk.f32.mxu0 %vm502_vm1, %v1401_v34 }
 0x484   : > { %5215 = vmatmul.mubr.msk.f32.gmra.mrb[38].mxu0 %vm502_vm1, %v1403_v58 }
 0x4d8   : > { %v5123_v57 = vpop.f32.mrb[16].mxu0 }
 0x4d9   : > { %866 = vst.msk [vmem:[#allocation3 + $0x8] sm:$0xff] %vm502_vm1, %v5123_v57  ;;  %v826_v10 = vpop.f32.mrb[17].mxu0 }
 0x4da   : > { %865 = vst.msk [vmem:[#allocation3] sm:$0xff] %vm502_vm1, %v826_v10 }
 0x4e0   : > { %v5126_v44 = vpop.f32.mrb[18].mxu0 }
 0x4e1   : > { %868 = vst.msk [vmem:[#allocation3 + $0x18] sm:$0xff] %vm502_vm1, %v5126_v44  ;;  %v836_v46 = vpop.f32.mrb[19].mxu0 }
 0x4e2   : > { %867 = vst.msk [vmem:[#allocation3 + $0x10] sm:$0xff] %vm502_vm1, %v836_v46 }
 0x4e5   : > { %v5129_v19 = vpop.f32.mrb[20].mxu0 }
 0x4e6   : > { %870 = vst.msk [vmem:[#allocation3 + $0x28] sm:$0xff] %vm502_vm1, %v5129_v19  ;;  %v846_v47 = vpop.f32.mrb[21].mxu0 }
 0x4e7   : > { %869 = vst.msk [vmem:[#allocation3 + $0x20] sm:$0xff] %vm502_vm1, %v846_v47 }
 0x4e9   : > { %v5132_v52 = vpop.f32.mrb[22].mxu0 }
 0x4ea   : > { %872 = vst.msk [vmem:[#allocation3 + $0x38] sm:$0xff] %vm502_vm1, %v5132_v52  ;;  %v856_v60 = vpop.f32.mrb[23].mxu0 }
 0x4eb   : > { %871 = vst.msk [vmem:[#allocation3 + $0x30] sm:$0xff] %vm502_vm1, %v856_v60 }
 0x4f8   : > { %v7414_v27 = vpop.f32.mrb[24].mxu0 }
 0x4f9   : > { %v7416_v53 = vpop.f32.mrb[25].mxu0 }
 0x52c   : > { %v7418_v9 = vpop.f32.mrb[26].mxu0 }
 0x52d   : > { %v7420_v49 = vpop.f32.mrb[27].mxu0 }
 0x530   : > { %v7422_v4 = vpop.f32.mrb[28].mxu0 }
 0x531   : > { %v7424_v56 = vpop.f32.mrb[29].mxu0 }
 0x539   : > { %v7426_v17 = vpop.f32.mrb[30].mxu0 }
 0x53a   : > { %v7428_v14 = vpop.f32.mrb[31].mxu0 }
 0x54b   : > { %v5207_v13 = vpop.f32.mrb[32].mxu0 }
 0x54c   : > { %v1558_v23 = vmul.f32 0.35355338, %v5207_v13  ;;  %v1518_v63 = vpop.f32.mrb[33].mxu0 }
 0x54d   : > { %v1557_v40 = vmul.f32 0.35355338, %v1518_v63 }
 0x54e   : > { %v1568_v24 = vsel %vm308_vm0, %v1558_v23, -inf }
 0x54f   : > { %1569 = vmax.xlane.f32.xlu1 %v1568_v24  ;;  %v5210_v42 = vpop.f32.mrb[34].mxu0  ;;  %v1565_v21 = vsel %vm308_vm0, %v1557_v40, -inf }
 0x550   : > { %v7432_v3 = vmul.f32 0.35355338, %v5210_v42  ;;  %1566 = vmax.xlane.f32.xlu0 %v1565_v21  ;;  %v1528_v8 = vpop.f32.mrb[35].mxu0  ;;  %v7475_v42 = vld [vmem:[#allocation2 + $0x10] sm:$0xff]  ;;  %v7477_v21 = vld [vmem:[#allocation2] sm:$0xff] }
 0x551   : > { %v1559_v51 = vmul.f32 0.35355338, %v1528_v8  ;;  %v7481_v8 = vpack.i.bf16 %v7475_v42, %v7477_v21 }
 0x552   : > { %v1574_v12 = vsel %vm308_vm0, %v7432_v3, -inf }
 0x553   : > { %v5213_v18 = vpop.f32.mrb[36].mxu0  ;;  %v1571_v32 = vsel %vm308_vm0, %v1559_v51, -inf }
 0x554   : > { %1575 = vmax.xlane.f32.xlu0 %v1574_v12  ;;  %v1538_v30 = vpop.f32.mrb[37].mxu0  ;;  %v1562_v29 = vmul.f32 0.35355338, %v5213_v18 }
 0x555   : > { %v1561_v20 = vmul.f32 0.35355338, %v1538_v30 }
 0x556   : > { %v1580_v41 = vsel %vm308_vm0, %v1562_v29, -inf }
 0x557   : > { %v5216_v55 = vpop.f32.mrb[38].mxu0  ;;  %v1577_v1 = vsel %vm308_vm0, %v1561_v20, -inf }
 0x558   : > { %1572 = vmax.xlane.f32.xlu0 %v1571_v32  ;;  %v1548_v33 = vpop.f32.mrb[39].mxu0  ;;  %v7437_v48 = vmul.f32 0.35355338, %v5216_v55 }
 0x559   : > { %v7453_v25 = vmul.f32 0.35355338, %v1548_v33 }
 0x55a   : > { %v1586_v59 = vsel %vm308_vm0, %v7437_v48, -inf }
 0x55b   : > { %v1583_v15 = vsel %vm308_vm0, %v7453_v25, -inf }
 0x55c   : > { %1581 = vmax.xlane.f32.xlu0 %v1580_v41 }
 0x560   : > { %6082 = vrot.lane.b32.xlu1 %v7440_v54, %s6727_s15  ;;  %1587 = vmax.xlane.f32.xlu0 %v1586_v59 }
 0x576   : > { %6087 = vrot.lane.b32.xlu0 %v7446_v50, %s6727_s15 }
 0x584   : > { %1578 = vmax.xlane.f32.xlu1 %v1577_v1  ;;  %v7499_v1 = vld [vmem:[#allocation2 + $0x50] sm:$0xff] }
 0x595   : > { %6092 = vrot.lane.b32.xlu1 %v7079_v22, %s6727_s15 }
 0x5b9   : > { %1584 = vmax.xlane.f32.xlu1 %v1583_v15  ;;  %v7501_v15 = vld [vmem:[#allocation2 + $0x40] sm:$0xff] }
 0x5ca   : > { %6097 = vrot.lane.b32.xlu1 %v7089_v26, %s6727_s15 }
 0x5dc   : > { %v1570_v37 = vpop.xlane.xlu1 %1569 }
 0x5dd   : > { %v1590_v28 = vsub.f32 %v1558_v23, %v1570_v37  ;;  %v1567_v61 = vpop.xlane.xlu0 %1566  ;;  %v7505_v37 = vpack.i.bf16 %v7499_v1, %v7501_v15 }
 0x5de   : > { %v1589_v62 = vsub.f32 %v1557_v40, %v1567_v61  ;;  %v7511_v61 = vld [vmem:[#allocation2 + $0x60] sm:$0xff] }
 0x5df   : > { %v1599_v36 = vmul.f32 1.442695, %v1590_v28  ;;  %v7507_v28 = vld [vmem:[#allocation2 + $0x70] sm:$0xff] }
 0x5e0   : > { %v1597_v11 = vmul.f32 1.442695, %v1589_v62  ;;  %v6083_v38 = vpop.permute.xlu1 %6082  ;;  %v7515_v62 = vpack.i.bf16 %v7507_v28, %v7511_v61 }
 0x5e1   : > { %6365 = vpow2.f32 %v1599_v36  ;;  %v6085_v39 = vunpack.i.h.bf16 %v6083_v38  ;;  %v6084_v43 = vunpack.i.l.bf16 %v6083_v38  ;;  %v1576_v22 = vpop.xlane.xlu0 %1575  ;;  %v7523_v36 = vld [vmem:[#allocation2 + $0x30] sm:$0xff] }
 0x5e2   : > { %6367 = vpow2.f32 %v1597_v11  ;;  %v1592_v12 = vsub.f32 %v7432_v3, %v1576_v22 }
 0x5e3   : > { %v5673_v35 = vpack.c.bf16 %v6085_v39, %v6084_v43 }
 0x5e4   : > { %v1603_v18 = vmul.f32 1.442695, %v1592_v12 }
 0x5e5   : > { %5674 = vmatprep.subr.bf16.mxu1 %v5673_v35  ;;  %v1573_v0 = vpop.xlane.xlu0 %1572 }
 0x5e6   : > { %v1591_v5 = vsub.f32 %v1559_v51, %v1573_v0  ;;  %5676 = vmatpush3.bf16.msra.mxu1 %v5673_v35 }
 0x5e8   : > { %v1601_v6 = vmul.f32 1.442695, %v1591_v5 }
 0x5e9   : > { %v1582_v34 = vpop.xlane.xlu0 %1581 }
 0x5ea   : > { %6369 = vpow2.f32 %v1601_v6  ;;  %v1594_v26 = vsub.f32 %v1562_v29, %v1582_v34 }
 0x5eb   : > { %v7459_v58 = vpop.eup %6365 }
 0x5ec   : > { %v7461_v57 = vpop.eup %6367  ;;  %v1607_v10 = vmul.f32 1.442695, %v1594_v26  ;;  %v1616_v44 = vsel %vm308_vm0, %v7459_v58, 0.0 }
 0x5ed   : > { %1617 = vadd.xlane.f32.xlu0 %v1616_v44  ;;  %v1588_v46 = vpop.xlane.xlu0 %1587  ;;  %v1613_v19 = vsel %vm308_vm0, %v7461_v57, 0.0 }
 0x5ee   : > { %6371 = vpow2.f32 %v1607_v10  ;;  %1614 = vadd.xlane.f32.xlu1 %v1613_v19  ;;  %v1596_v51 = vsub.f32 %v7437_v48, %v1588_v46 }
 0x5ef   : > { %6373 = vpow2.f32 %v1603_v18 }
 0x5f0   : > { %v1611_v55 = vmul.f32 1.442695, %v1596_v51 }
 0x5f1   : > { %v6088_v47 = vpop.permute.xlu0 %6087 }
 0x5f2   : > { %v6090_v52 = vunpack.i.h.bf16 %v6088_v47  ;;  %v6089_v60 = vunpack.i.l.bf16 %v6088_v47 }
 0x5f4   : > { %v7467_v13 = vpop.eup %6369  ;;  %v5677_v23 = vpack.c.bf16 %v6090_v52, %v6089_v60 }
 0x5f5   : > { %v1619_v63 = vsel %vm308_vm0, %v7467_v13, 0.0 }
 0x5f6   : > { %1620 = vadd.xlane.f32.xlu0 %v1619_v63  ;;  %5678 = vmatprep.subr.bf16.mxu1 %v5677_v23 }
 0x5f7   : > { %5680 = vmatpush3.bf16.msra.mxu1 %v5677_v23 }
 0x5f8   : > { %v7471_v40 = vpop.eup %6371 }
 0x5f9   : > { %v1628_v24 = vsel %vm308_vm0, %v7471_v40, 0.0  ;;  %v7487_v59 = vpop.eup %6373 }
 0x5fa   : > { %1629 = vadd.xlane.f32.xlu0 %v1628_v24  ;;  %v1622_v7 = vsel %vm308_vm0, %v7487_v59, 0.0 }
 0x5ff   : > { %6102 = vrot.lane.b32.xlu1 %v7481_v8, %s6728_s9 }
 0x611   : > { %v1579_v30 = vpop.xlane.xlu1 %1578 }
 0x612   : > { %v1593_v29 = vsub.f32 %v1561_v20, %v1579_v30 }
 0x614   : > { %v1605_v32 = vmul.f32 1.442695, %v1593_v29 }
 0x615   : > { %v6093_v33 = vpop.permute.xlu1 %6092 }
 0x616   : > { %6375 = vpow2.f32 %v1605_v32  ;;  %v6095_v41 = vunpack.i.h.bf16 %v6093_v33  ;;  %v6094_v45 = vunpack.i.l.bf16 %v6093_v33 }
 0x617   : > { %6377 = vpow2.f32 %v1611_v55 }
 0x618   : > { %v5681_v16 = vpack.c.bf16 %v6095_v41, %v6094_v45 }
 0x61a   : > { %5682 = vmatprep.subr.bf16.mxu1 %v5681_v16 }
 0x61b   : > { %5684 = vmatpush3.bf16.msra.mxu1 %v5681_v16 }
 0x620   : > { %v7489_v2 = vpop.eup %6375 }
 0x621   : > { %v1625_v3 = vsel %vm308_vm0, %v7489_v2, 0.0  ;;  %v7493_v48 = vpop.eup %6377 }
 0x622   : > { %1626 = vadd.xlane.f32.xlu0 %v1625_v3  ;;  %v1634_v20 = vsel %vm308_vm0, %v7493_v48, 0.0 }
 0x623   : > { %1623 = vadd.xlane.f32.xlu1 %v1622_v7 }
 0x626   : > { %1635 = vadd.xlane.f32.xlu0 %v1634_v20 }
 0x634   : > { %6112 = vrot.lane.b32.xlu1 %v7505_v37, %s6728_s9 }
 0x638   : > { %6117 = vrot.lane.b32.xlu1 %v7515_v62, %s6728_s9 }
 0x63c   : > { %1879 = vrot.lane.b32.xlu1 %v7477_v21, %s6729_s30 }
 0x640   : > { %1881 = vrot.lane.b32.xlu1 %v7475_v42, %s6729_s30 }
 0x644   : > { %1885 = vrot.lane.b32.xlu1 %v7523_v36, %s6729_s30 }
 0x646   : > { %v1585_v11 = vpop.xlane.xlu1 %1584 }
 0x647   : > { %v1595_v38 = vsub.f32 %v7453_v25, %v1585_v11  ;;  %v7536_v25 = vld [vmem:[#allocation2 + $0x20] sm:$0xff] }
 0x648   : > { %1889 = vrot.lane.b32.xlu1 %v7499_v1, %s6729_s30  ;;  %v7540_v34 = vpack.i.bf16 %v7523_v36, %v7536_v25 }
 0x649   : > { %v1609_v39 = vmul.f32 1.442695, %v1595_v38 }
 0x64a   : > { %v6098_v43 = vpop.permute.xlu1 %6097 }
 0x64b   : > { %6379 = vpow2.f32 %v1609_v39  ;;  %v6100_v22 = vunpack.i.h.bf16 %v6098_v43  ;;  %v6099_v35 = vunpack.i.l.bf16 %v6098_v43 }
 0x64c   : > { %1893 = vrot.lane.b32.xlu1 %v7507_v28, %s6729_s30 }
 0x64d   : > { %v5685_v0 = vpack.c.bf16 %v6100_v22, %v6099_v35 }
 0x64f   : > { %5686 = vmatprep.subr.bf16.mxu1 %v5685_v0 }
 0x650   : > { %5688 = vmatpush3.bf16.msra.mxu1 %v5685_v0 }
 0x655   : > { %v7532_v5 = vpop.eup %6379 }
 0x656   : > { %v1631_v6 = vsel %vm308_vm0, %v7532_v5, 0.0 }
 0x657   : > { %1632 = vadd.xlane.f32.xlu0 %v1631_v6 }
 0x66d   : > { %6107 = vrot.lane.b32.xlu0 %v7540_v34, %s6728_s9 }
 0x671   : > { %1883 = vrot.lane.b32.xlu0 %v7536_v25, %s6729_s30 }
 0x675   : > { %1887 = vrot.lane.b32.xlu0 %v7501_v15, %s6729_s30 }
 0x679   : > { %1891 = vrot.lane.b32.xlu0 %v7511_v61, %s6729_s30 }
 0x67a   : > { %v1618_v26 = vpop.xlane.xlu0 %1617 }
 0x67b   : > { %6381 = vrcp.f32 %v1618_v26  ;;  %v1615_v10 = vpop.xlane.xlu1 %1614 }
 0x67c   : > { %6383 = vrcp.f32 %v1615_v10 }
 0x67f   : > { %v6103_v44 = vpop.permute.xlu1 %6102 }
 0x680   : > { %v6105_v46 = vunpack.i.h.bf16 %v6103_v44  ;;  %v6104_v19 = vunpack.i.l.bf16 %v6103_v44 }
 0x682   : > { %v5689_v47 = vpack.c.bf16 %v6105_v46, %v6104_v19 }
 0x683   : > { %v1621_v52 = vpop.xlane.xlu0 %1620 }
 0x684   : > { %6385 = vrcp.f32 %v1621_v52  ;;  %5691 = vmatprep.subr.msk.bf16.mxu1 %vm7108_vm2, %v5689_v47 }
 0x685   : > { %v6382_v60 = vpop.eup %6381 }
 0x686   : > { %v6384_v23 = vpop.eup %6383  ;;  %v1640_v24 = vmul.f32 %v6382_v60, %v7459_v58 }
 0x687   : > { %v1638_v63 = vmul.f32 %v6384_v23, %v7461_v57  ;;  %v1630_v18 = vpop.xlane.xlu0 %1629 }
 0x689   : > { %5233 = vmatprep.mubr.msk.f32.mxu1 %vm308_vm0, %v1638_v63 }
 0x68a   : > { %5234 = vmatmul.mubr.msk.f32.vlgmr.msra.gmra.mrb[16].mxu1 %vm308_vm0, %v1640_v24 }
 0x68b   : > { %5694 = vmatpush3.bf16.xpose.msk.msra.mxu1 %vm7108_vm2, %v5689_v47 }
 0x68e   : > { %v6386_v12 = vpop.eup %6385 }
 0x68f   : > { %v1642_v51 = vmul.f32 %v6386_v12, %v7467_v13 }
 0x691   : > { %5236 = vmatprep.mubr.msk.f32.mxu1 %vm308_vm0, %v1642_v51 }
 0x6af   : > { %v1627_v30 = vpop.xlane.xlu0 %1626 }
 0x6b0   : > { %6387 = vrcp.f32 %v1627_v30  ;;  %v1624_v29 = vpop.xlane.xlu1 %1623 }
 0x6b1   : > { %6389 = vrcp.f32 %v1624_v29 }
 0x6b2   : > { %6391 = vrcp.f32 %v1630_v18 }
 0x6b3   : > { %v1636_v41 = vpop.xlane.xlu0 %1635 }
 0x6b4   : > { %6393 = vrcp.f32 %v1636_v41  ;;  %v6113_v16 = vpop.permute.xlu1 %6112 }
 0x6b5   : > { %v6115_v7 = vunpack.i.h.bf16 %v6113_v16  ;;  %v6114_v20 = vunpack.i.l.bf16 %v6113_v16 }
 0x6b8   : > { %v6118_v39 = vpop.permute.xlu1 %6117 }
 0x6b9   : > { %v6120_v35 = vunpack.i.h.bf16 %v6118_v39  ;;  %v6119_v0 = vunpack.i.l.bf16 %v6118_v39 }
 0x6ba   : > { %v6388_v57 = vpop.eup %6387 }
 0x6bb   : > { %v6390_v58 = vpop.eup %6389  ;;  %v1646_v33 = vmul.f32 %v6388_v57, %v7489_v2  ;;  %v5701_v2 = vpack.c.bf16 %v6115_v7, %v6114_v20  ;;  %v5707_v10 = vpack.c.bf16 %v6120_v35, %v6119_v0  ;;  %v1868_v0 = vld [vmem:[#allocation2 + $0x58] sm:$0xff] }
 0x6bc   : > { %v1644_v55 = vmul.f32 %v6390_v58, %v7487_v59  ;;  %v6392_v32 = vpop.eup %6391  ;;  %v1880_v26 = vpop.permute.xlu1 %1879 }
 0x6bd   : > { %v1648_v13 = vmul.f32 %v6392_v32, %v7471_v40 }
 0x6be   : > { %5237 = vmatmul.mubr.msk.f32.gmra.mrb[18].mxu1 %vm308_vm0, %v1644_v55  ;;  %v6394_v43 = vpop.eup %6393 }
 0x6bf   : > { %5239 = vmatprep.mubr.msk.f32.mxu1 %vm308_vm0, %v1646_v33  ;;  %v1652_v6 = vmul.f32 %v6394_v43, %v7493_v48 }
 0x6c0   : > { %v1882_v44 = vpop.permute.xlu1 %1881 }
 0x6c2   : > { %5240 = vmatmul.mubr.msk.f32.gmra.mrb[20].mxu1 %vm308_vm0, %v1648_v13 }
 0x6c4   : > { %v1886_v48 = vpop.permute.xlu1 %1885 }
 0x6c8   : > { %v1890_v19 = vpop.permute.xlu1 %1889 }
 0x6cc   : > { %v1894_v52 = vpop.permute.xlu1 %1893 }
 0x6e4   : > { %v1633_v45 = vpop.xlane.xlu0 %1632 }
 0x6e5   : > { %6395 = vrcp.f32 %v1633_v45 }
 0x6e8   : > { %v6108_v3 = vpop.permute.xlu0 %6107 }
 0x6e9   : > { %v6110_v59 = vunpack.i.h.bf16 %v6108_v3  ;;  %v6109_v11 = vunpack.i.l.bf16 %v6108_v3 }
 0x6eb   : > { %v5695_v38 = vpack.c.bf16 %v6110_v59, %v6109_v11 }
 0x6ed   : > { %5697 = vmatprep.subr.msk.bf16.mxu1 %vm7108_vm2, %v5695_v38 }
 0x6ee   : > { %5700 = vmatpush3.bf16.xpose.msk.msra.mxu1 %vm7108_vm2, %v5695_v38 }
 0x6ef   : > { %v6396_v40 = vpop.eup %6395  ;;  %5703 = vmatprep.subr.msk.bf16.mxu1 %vm7108_vm2, %v5701_v2 }
 0x6f0   : > { %v1650_v22 = vmul.f32 %v6396_v40, %v7532_v5  ;;  %v1884_v5 = vpop.permute.xlu0 %1883 }
 0x6f2   : > { %5242 = vmatprep.mubr.msk.f32.mxu1 %vm308_vm0, %v1650_v22 }
 0x6f3   : > { %5243 = vmatmul.mubr.msk.f32.gmra.mrb[22].mxu1 %vm308_vm0, %v1652_v6  ;;  %v1867_v6 = vld [vmem:[#allocation2 + $0x48] sm:$0xff] }
 0x6f4   : > { %5261 = vmatprep.mubr.msk.f32.mxu1 %vm502_vm1, %v1880_v26  ;;  %v1888_v46 = vpop.permute.xlu0 %1887  ;;  %v7626_v26 = vpack.i.bf16 %v1868_v0, %v1867_v6 }
 0x6f6   : > { %5706 = vmatpush3.bf16.xpose.msk.msra.mxu1 %vm7108_vm2, %v5701_v2 }
 0x6f7   : > { %5709 = vmatprep.subr.msk.bf16.mxu1 %vm7108_vm2, %v5707_v10 }
 0x6f8   : > { %v1892_v47 = vpop.permute.xlu0 %1891 }
 0x6fe   : > { %5712 = vmatpush3.bf16.xpose.msk.msra.mxu1 %vm7108_vm2, %v5707_v10 }
 0x705   : > { %5262 = vmatmul.mubr.msk.f32.vlgmr.msra.gmra.mrb[24].mxu1 %vm502_vm1, %v1882_v44 }
 0x706   : > { %5264 = vmatprep.mubr.msk.f32.mxu1 %vm502_vm1, %v1884_v5  ;;  %v1870_v5 = vld [vmem:[#allocation2 + $0x78] sm:$0xff] }
 0x709   : > { %5265 = vmatmul.mubr.msk.f32.gmra.mrb[26].mxu1 %vm502_vm1, %v1886_v48  ;;  %v1869_v48 = vld [vmem:[#allocation2 + $0x68] sm:$0xff] }
 0x70a   : > { %5267 = vmatprep.mubr.msk.f32.mxu1 %vm502_vm1, %v1888_v46  ;;  %v7634_v46 = vpack.i.bf16 %v1870_v5, %v1869_v48 }
 0x70d   : > { %5268 = vmatmul.mubr.msk.f32.gmra.mrb[28].mxu1 %vm502_vm1, %v1890_v19 }
 0x70e   : > { %5270 = vmatprep.mubr.msk.f32.mxu1 %vm502_vm1, %v1892_v47 }
 0x711   : > { %5271 = vmatmul.mubr.msk.f32.gmra.mrb[30].mxu1 %vm502_vm1, %v1894_v52 }
 0x75d   : > { %v7590_v60 = vpop.f32.mrb[16].mxu1 }
 0x75e   : > { %v7592_v23 = vpop.f32.mrb[17].mxu1 }
 0x791   : > { %v7594_v63 = vpop.f32.mrb[18].mxu1 }
 0x792   : > { %8522 = vst [vmem:[#allocation14_spill] sm:$0xff] %v7594_v63  ;;  %v7596_v24 = vpop.f32.mrb[19].mxu1 }
 0x793   : > { %8523 = vst [vmem:[#allocation15_spill] sm:$0xff] %v7596_v24 }
 0x795   : > { %v7598_v12 = vpop.f32.mrb[20].mxu1 }
 0x796   : > { %v7600_v51 = vpop.f32.mrb[21].mxu1 }
 0x7c6   : > { %v7602_v18 = vpop.f32.mrb[22].mxu1 }
 0x7c7   : > { %8524 = vst [vmem:[#allocation16_spill] sm:$0xff] %v7602_v18  ;;  %v7604_v30 = vpop.f32.mrb[23].mxu1 }
 0x7d8   : > { %v5263_v29 = vpop.f32.mrb[24].mxu1 }
 0x7d9   : > { %v2049_v57 = vmul.f32 0.35355338, %v5263_v29  ;;  %v2009_v58 = vpop.f32.mrb[25].mxu1 }
 0x7da   : > { %v2048_v55 = vmul.f32 0.35355338, %v2009_v58 }
 0x7db   : > { %v2059_v32 = vsel %vm308_vm0, %v2049_v57, -inf }
 0x7dc   : > { %2060 = vmax.xlane.f32.xlu1 %v2059_v32  ;;  %v5266_v33 = vpop.f32.mrb[26].mxu1  ;;  %v2056_v13 = vsel %vm308_vm0, %v2048_v55, -inf }
 0x7dd   : > { %v7608_v41 = vmul.f32 0.35355338, %v5266_v33  ;;  %2057 = vmax.xlane.f32.xlu0 %v2056_v13  ;;  %v2019_v45 = vpop.f32.mrb[27].mxu1 }
 0x7de   : > { %v2050_v3 = vmul.f32 0.35355338, %v2019_v45 }
 0x7df   : > { %v2065_v16 = vsel %vm308_vm0, %v7608_v41, -inf }
 0x7e0   : > { %v5269_v7 = vpop.f32.mrb[28].mxu1  ;;  %v2062_v38 = vsel %vm308_vm0, %v2050_v3, -inf }
 0x7e1   : > { %2066 = vmax.xlane.f32.xlu0 %v2065_v16  ;;  %v2029_v20 = vpop.f32.mrb[29].mxu1  ;;  %v2053_v59 = vmul.f32 0.35355338, %v5269_v7 }
 0x7e2   : > { %v7622_v22 = vmul.f32 0.35355338, %v2029_v20 }
 0x7e3   : > { %v2071_v43 = vsel %vm308_vm0, %v2053_v59, -inf }
 0x7e4   : > { %v5272_v11 = vpop.f32.mrb[30].mxu1  ;;  %v2068_v35 = vsel %vm308_vm0, %v7622_v22, -inf }
 0x7e5   : > { %2063 = vmax.xlane.f32.xlu0 %v2062_v38  ;;  %v2039_v2 = vpop.f32.mrb[31].mxu1  ;;  %v7613_v39 = vmul.f32 0.35355338, %v5272_v11 }
 0x7e6   : > { %v7630_v10 = vmul.f32 0.35355338, %v2039_v2 }
 0x7e7   : > { %v2077_v40 = vsel %vm308_vm0, %v7613_v39, -inf }
 0x7e8   : > { %v2074_v44 = vsel %vm308_vm0, %v7630_v10, -inf }
 0x7e9   : > { %2072 = vmax.xlane.f32.xlu0 %v2071_v43 }
 0x7ed   : > { %6122 = vrot.lane.b32.xlu1 %v7440_v54, %s6729_s30  ;;  %2078 = vmax.xlane.f32.xlu0 %v2077_v40 }
 0x803   : > { %6127 = vrot.lane.b32.xlu0 %v7446_v50, %s6729_s30 }
 0x811   : > { %2069 = vmax.xlane.f32.xlu1 %v2068_v35 }
 0x822   : > { %6132 = vrot.lane.b32.xlu1 %v7626_v26, %s6729_s30 }
 0x846   : > { %2075 = vmax.xlane.f32.xlu1 %v2074_v44 }
 0x857   : > { %6137 = vrot.lane.b32.xlu1 %v7634_v46, %s6729_s30 }
 0x869   : > { %v2061_v19 = vpop.xlane.xlu1 %2060 }
 0x86a   : > { %v2081_v47 = vsub.f32 %v2049_v57, %v2061_v19  ;;  %v2058_v52 = vpop.xlane.xlu0 %2057 }
 0x86b   : > { %v2080_v29 = vsub.f32 %v2048_v55, %v2058_v52 }
 0x86c   : > { %v2090_v58 = vmul.f32 1.442695, %v2081_v47 }
 0x86d   : > { %v2088_v32 = vmul.f32 1.442695, %v2080_v29  ;;  %v6123_v33 = vpop.permute.xlu1 %6122 }
 0x86e   : > { %6397 = vpow2.f32 %v2090_v58  ;;  %v6125_v13 = vunpack.i.h.bf16 %v6123_v33  ;;  %v6124_v45 = vunpack.i.l.bf16 %v6123_v33  ;;  %v2067_v16 = vpop.xlane.xlu0 %2066 }
 0x86f   : > { %6399 = vpow2.f32 %v2088_v32  ;;  %v2083_v29 = vsub.f32 %v7608_v41, %v2067_v16 }
 0x870   : > { %v5713_v7 = vpack.c.bf16 %v6125_v13, %v6124_v45 }
 0x871   : > { %v2094_v32 = vmul.f32 1.442695, %v2083_v29 }
 0x872   : > { %5714 = vmatprep.subr.bf16.mxu0 %v5713_v7  ;;  %v2064_v20 = vpop.xlane.xlu0 %2063 }
 0x873   : > { %v2082_v11 = vsub.f32 %v2050_v3, %v2064_v20  ;;  %5716 = vmatpush3.bf16.msra.mxu0 %v5713_v7 }
 0x875   : > { %v2092_v38 = vmul.f32 1.442695, %v2082_v11 }
 0x876   : > { %v2073_v2 = vpop.xlane.xlu0 %2072 }
 0x877   : > { %6401 = vpow2.f32 %v2092_v38  ;;  %v2085_v43 = vsub.f32 %v2053_v59, %v2073_v2 }
 0x878   : > { %v7638_v57 = vpop.eup %6397 }
 0x879   : > { %v7640_v55 = vpop.eup %6399  ;;  %v2098_v40 = vmul.f32 1.442695, %v2085_v43  ;;  %v2107_v35 = vsel %vm308_vm0, %v7638_v57, 0.0 }
 0x87a   : > { %2108 = vadd.xlane.f32.xlu0 %v2107_v35  ;;  %v2079_v0 = vpop.xlane.xlu0 %2078  ;;  %v2104_v6 = vsel %vm308_vm0, %v7640_v55, 0.0 }
 0x87b   : > { %6403 = vpow2.f32 %v2098_v40  ;;  %2105 = vadd.xlane.f32.xlu1 %v2104_v6  ;;  %v2087_v58 = vsub.f32 %v7613_v39, %v2079_v0 }
 0x87c   : > { %6405 = vpow2.f32 %v2094_v32 }
 0x87d   : > { %v2102_v45 = vmul.f32 1.442695, %v2087_v58 }
 0x87e   : > { %v6128_v3 = vpop.permute.xlu0 %6127 }
 0x87f   : > { %v6130_v44 = vunpack.i.h.bf16 %v6128_v3  ;;  %v6129_v5 = vunpack.i.l.bf16 %v6128_v3 }
 0x881   : > { %v7646_v48 = vpop.eup %6401  ;;  %v5717_v59 = vpack.c.bf16 %v6130_v44, %v6129_v5 }
 0x882   : > { %v2110_v19 = vsel %vm308_vm0, %v7646_v48, 0.0 }
 0x883   : > { %2111 = vadd.xlane.f32.xlu0 %v2110_v19  ;;  %5718 = vmatprep.subr.bf16.mxu0 %v5717_v59 }
 0x884   : > { %5720 = vmatpush3.bf16.msra.mxu0 %v5717_v59 }
 0x885   : > { %v7650_v47 = vpop.eup %6403 }
 0x886   : > { %v2119_v52 = vsel %vm308_vm0, %v7650_v47, 0.0  ;;  %v7659_v43 = vpop.eup %6405 }
 0x887   : > { %2120 = vadd.xlane.f32.xlu0 %v2119_v52 }
 0x88c   : > { %6142 = vrot.lane.b32.xlu1 %v7481_v8, %s6730_s11 }
 0x89e   : > { %v2070_v33 = vpop.xlane.xlu1 %2069 }
 0x89f   : > { %v2084_v13 = vsub.f32 %v7622_v22, %v2070_v33  ;;  %v2113_v22 = vsel %vm308_vm0, %v7659_v43, 0.0 }
 0x8a1   : > { %v2096_v7 = vmul.f32 1.442695, %v2084_v13 }
 0x8a2   : > { %v6133_v20 = vpop.permute.xlu1 %6132 }
 0x8a3   : > { %6407 = vpow2.f32 %v2096_v7  ;;  %v6135_v11 = vunpack.i.h.bf16 %v6133_v20  ;;  %v6134_v38 = vunpack.i.l.bf16 %v6133_v20 }
 0x8a4   : > { %6409 = vpow2.f32 %v2102_v45 }
 0x8a5   : > { %v5721_v2 = vpack.c.bf16 %v6135_v11, %v6134_v38 }
 0x8a7   : > { %5722 = vmatprep.subr.bf16.mxu0 %v5721_v2 }
 0x8a8   : > { %5724 = vmatpush3.bf16.msra.mxu0 %v5721_v2 }
 0x8ad   : > { %v7661_v41 = vpop.eup %6407 }
 0x8ae   : > { %v2116_v39 = vsel %vm308_vm0, %v7661_v41, 0.0  ;;  %v7665_v16 = vpop.eup %6409 }
 0x8af   : > { %2117 = vadd.xlane.f32.xlu0 %v2116_v39  ;;  %v2125_v40 = vsel %vm308_vm0, %v7665_v16, 0.0 }
 0x8b0   : > { %2114 = vadd.xlane.f32.xlu1 %v2113_v22 }
 0x8b3   : > { %2126 = vadd.xlane.f32.xlu0 %v2125_v40 }
 0x8c1   : > { %6152 = vrot.lane.b32.xlu1 %v7505_v37, %s6730_s11 }
 0x8c5   : > { %6157 = vrot.lane.b32.xlu1 %v7515_v62, %s6730_s11 }
 0x8c9   : > { %2370 = vrot.lane.b32.xlu1 %v7477_v21, %s6731_s23 }
 0x8cd   : > { %2372 = vrot.lane.b32.xlu1 %v7475_v42, %s6731_s23 }
 0x8d1   : > { %2376 = vrot.lane.b32.xlu1 %v7523_v36, %s6731_s23 }
 0x8d3   : > { %v2076_v35 = vpop.xlane.xlu1 %2075 }
 0x8d4   : > { %v2086_v0 = vsub.f32 %v7630_v10, %v2076_v35 }
 0x8d5   : > { %2380 = vrot.lane.b32.xlu1 %v7499_v1, %s6731_s23 }
 0x8d6   : > { %v2100_v6 = vmul.f32 1.442695, %v2086_v0 }
 0x8d7   : > { %v6138_v3 = vpop.permute.xlu1 %6137 }
 0x8d8   : > { %6411 = vpow2.f32 %v2100_v6  ;;  %v6140_v44 = vunpack.i.h.bf16 %v6138_v3  ;;  %v6139_v5 = vunpack.i.l.bf16 %v6138_v3 }
 0x8d9   : > { %2384 = vrot.lane.b32.xlu1 %v7507_v28, %s6731_s23 }
 0x8da   : > { %v5725_v59 = vpack.c.bf16 %v6140_v44, %v6139_v5 }
 0x8dc   : > { %5726 = vmatprep.subr.bf16.mxu0 %v5725_v59 }
 0x8dd   : > { %5728 = vmatpush3.bf16.msra.mxu0 %v5725_v59 }
 0x8e2   : > { %v6412_v19 = vpop.eup %6411 }
 0x8e3   : > { %v2122_v52 = vsel %vm308_vm0, %v6412_v19, 0.0 }
 0x8e4   : > { %2123 = vadd.xlane.f32.xlu0 %v2122_v52 }
 0x8fa   : > { %6147 = vrot.lane.b32.xlu0 %v7540_v34, %s6730_s11 }
 0x8fe   : > { %2374 = vrot.lane.b32.xlu0 %v7536_v25, %s6731_s23 }
 0x902   : > { %2378 = vrot.lane.b32.xlu0 %v7501_v15, %s6731_s23 }
 0x906   : > { %2382 = vrot.lane.b32.xlu0 %v7511_v61, %s6731_s23 }
 0x907   : > { %v2109_v10 = vpop.xlane.xlu0 %2108 }
 0x908   : > { %6413 = vrcp.f32 %v2109_v10  ;;  %v2106_v29 = vpop.xlane.xlu1 %2105 }
 0x909   : > { %6415 = vrcp.f32 %v2106_v29 }
 0x90c   : > { %v6143_v58 = vpop.permute.xlu1 %6142 }
 0x90d   : > { %v6145_v32 = vunpack.i.h.bf16 %v6143_v58  ;;  %v6144_v33 = vunpack.i.l.bf16 %v6143_v58 }
 0x90f   : > { %v5729_v13 = vpack.c.bf16 %v6145_v32, %v6144_v33 }
 0x910   : > { %v2112_v45 = vpop.xlane.xlu0 %2111 }
 0x911   : > { %6417 = vrcp.f32 %v2112_v45  ;;  %5731 = vmatprep.subr.msk.bf16.mxu0 %vm7108_vm2, %v5729_v13 }
 0x912   : > { %v6414_v7 = vpop.eup %6413 }
 0x913   : > { %v6416_v20 = vpop.eup %6415  ;;  %v2131_v38 = vmul.f32 %v6414_v7, %v7638_v57 }
 0x914   : > { %v2129_v11 = vmul.f32 %v6416_v20, %v7640_v55  ;;  %v2121_v22 = vpop.xlane.xlu0 %2120 }
 0x916   : > { %5289 = vmatprep.mubr.msk.f32.mxu0 %vm308_vm0, %v2129_v11 }
 0x917   : > { %5290 = vmatmul.mubr.msk.f32.vlgmr.msra.gmra.mrb[40].mxu0 %vm308_vm0, %v2131_v38 }
 0x918   : > { %5734 = vmatpush3.bf16.xpose.msk.msra.mxu0 %vm7108_vm2, %v5729_v13 }
 0x91b   : > { %v6418_v2 = vpop.eup %6417 }
 0x91c   : > { %v2133_v39 = vmul.f32 %v6418_v2, %v7646_v48 }
 0x91e   : > { %5292 = vmatprep.mubr.msk.f32.mxu0 %vm308_vm0, %v2133_v39 }
 0x93c   : > { %v2118_v40 = vpop.xlane.xlu0 %2117 }
 0x93d   : > { %6419 = vrcp.f32 %v2118_v40  ;;  %v2115_v35 = vpop.xlane.xlu1 %2114 }
 0x93e   : > { %6421 = vrcp.f32 %v2115_v35 }
 0x93f   : > { %6423 = vrcp.f32 %v2121_v22 }
 0x940   : > { %v2127_v44 = vpop.xlane.xlu0 %2126 }
 0x941   : > { %6425 = vrcp.f32 %v2127_v44  ;;  %v6153_v59 = vpop.permute.xlu1 %6152 }
 0x942   : > { %v6155_v10 = vunpack.i.h.bf16 %v6153_v59  ;;  %v6154_v29 = vunpack.i.l.bf16 %v6153_v59 }
 0x945   : > { %v6158_v33 = vpop.permute.xlu1 %6157 }
 0x946   : > { %v6160_v7 = vunpack.i.h.bf16 %v6158_v33  ;;  %v6159_v20 = vunpack.i.l.bf16 %v6158_v33 }
 0x947   : > { %v6420_v55 = vpop.eup %6419 }
 0x948   : > { %v6422_v57 = vpop.eup %6421  ;;  %v2137_v3 = vmul.f32 %v6420_v55, %v7661_v41  ;;  %v5741_v41 = vpack.c.bf16 %v6155_v10, %v6154_v29  ;;  %v5747_v2 = vpack.c.bf16 %v6160_v7, %v6159_v20 }
 0x949   : > { %v2135_v0 = vmul.f32 %v6422_v57, %v7659_v43  ;;  %v6424_v6 = vpop.eup %6423  ;;  %v2371_v38 = vpop.permute.xlu1 %2370 }
 0x94a   : > { %v2139_v48 = vmul.f32 %v6424_v6, %v7650_v47 }
 0x94b   : > { %5293 = vmatmul.mubr.msk.f32.gmra.mrb[42].mxu0 %vm308_vm0, %v2135_v0  ;;  %v6426_v13 = vpop.eup %6425 }
 0x94c   : > { %5295 = vmatprep.mubr.msk.f32.mxu0 %vm308_vm0, %v2137_v3  ;;  %v2143_v11 = vmul.f32 %v6426_v13, %v7665_v16 }
 0x94d   : > { %v2373_v39 = vpop.permute.xlu1 %2372 }
 0x94f   : > { %5296 = vmatmul.mubr.msk.f32.gmra.mrb[44].mxu0 %vm308_vm0, %v2139_v48 }
 0x951   : > { %v2377_v16 = vpop.permute.xlu1 %2376 }
 0x955   : > { %v2381_v40 = vpop.permute.xlu1 %2380 }
 0x959   : > { %v2385_v55 = vpop.permute.xlu1 %2384 }
 0x971   : > { %v2124_v5 = vpop.xlane.xlu0 %2123 }
 0x972   : > { %6427 = vrcp.f32 %v2124_v5 }
 0x975   : > { %v6148_v52 = vpop.permute.xlu0 %6147 }
 0x976   : > { %v6150_v43 = vunpack.i.h.bf16 %v6148_v52  ;;  %v6149_v58 = vunpack.i.l.bf16 %v6148_v52 }
 0x978   : > { %v5735_v32 = vpack.c.bf16 %v6150_v43, %v6149_v58 }
 0x97a   : > { %5737 = vmatprep.subr.msk.bf16.mxu0 %vm7108_vm2, %v5735_v32 }
 0x97b   : > { %5740 = vmatpush3.bf16.xpose.msk.msra.mxu0 %vm7108_vm2, %v5735_v32 }
 0x97c   : > { %v6428_v47 = vpop.eup %6427  ;;  %5743 = vmatprep.subr.msk.bf16.mxu0 %vm7108_vm2, %v5741_v41 }
 0x97d   : > { %v2141_v45 = vmul.f32 %v6428_v47, %v6412_v19  ;;  %v2375_v19 = vpop.permute.xlu0 %2374 }
 0x97f   : > { %5298 = vmatprep.mubr.msk.f32.mxu0 %vm308_vm0, %v2141_v45 }
 0x980   : > { %5299 = vmatmul.mubr.msk.f32.gmra.mrb[46].mxu0 %vm308_vm0, %v2143_v11 }
 0x981   : > { %5317 = vmatprep.mubr.msk.f32.mxu0 %vm502_vm1, %v2371_v38  ;;  %v2379_v22 = vpop.permute.xlu0 %2378 }
 0x983   : > { %5746 = vmatpush3.bf16.xpose.msk.msra.mxu0 %vm7108_vm2, %v5741_v41 }
 0x984   : > { %5749 = vmatprep.subr.msk.bf16.mxu0 %vm7108_vm2, %v5747_v2 }
 0x985   : > { %v2383_v35 = vpop.permute.xlu0 %2382 }
 0x98b   : > { %5752 = vmatpush3.bf16.xpose.msk.msra.mxu0 %vm7108_vm2, %v5747_v2 }
 0x992   : > { %5318 = vmatmul.mubr.msk.f32.vlgmr.msra.gmra.mrb[48].mxu0 %vm502_vm1, %v2373_v39 }
 0x993   : > { %5320 = vmatprep.mubr.msk.f32.mxu0 %vm502_vm1, %v2375_v19 }
 0x996   : > { %5321 = vmatmul.mubr.msk.f32.gmra.mrb[50].mxu0 %vm502_vm1, %v2377_v16 }
 0x997   : > { %5323 = vmatprep.mubr.msk.f32.mxu0 %vm502_vm1, %v2379_v22 }
 0x99a   : > { %5324 = vmatmul.mubr.msk.f32.gmra.mrb[52].mxu0 %vm502_vm1, %v2381_v40 }
 0x99b   : > { %5326 = vmatprep.mubr.msk.f32.mxu0 %vm502_vm1, %v2383_v35 }
 0x99e   : > { %5327 = vmatmul.mubr.msk.f32.gmra.mrb[54].mxu0 %vm502_vm1, %v2385_v55 }
 0x9ea   : > { %v7734_v57 = vpop.f32.mrb[40].mxu0 }
 0x9eb   : > { %v7736_v0 = vpop.f32.mrb[41].mxu0 }
 0xa1e   : > { %v7738_v6 = vpop.f32.mrb[42].mxu0 }
 0xa1f   : > { %8525 = vst [vmem:[#allocation17_spill] sm:$0xff] %v7738_v6  ;;  %v7740_v3 = vpop.f32.mrb[43].mxu0 }
 0xa20   : > { %8526 = vst [vmem:[#allocation18_spill] sm:$0xff] %v7740_v3 }
 0xa22   : > { %v7742_v48 = vpop.f32.mrb[44].mxu0 }
 0xa23   : > { %v7744_v44 = vpop.f32.mrb[45].mxu0 }
 0xa53   : > { %v7746_v5 = vpop.f32.mrb[46].mxu0 }
 0xa54   : > { %8527 = vst [vmem:[#allocation19_spill] sm:$0xff] %v7746_v5  ;;  %v7748_v59 = vpop.f32.mrb[47].mxu0 }
 0xa55   : > { %8528 = vst [vmem:[#allocation20_spill] sm:$0xff] %v7748_v59 }
 0xa65   : > { %v5319_v52 = vpop.f32.mrb[48].mxu0 }
 0xa66   : > { %v2540_v10 = vmul.f32 0.35355338, %v5319_v52  ;;  %v2500_v29 = vpop.f32.mrb[49].mxu0 }
 0xa67   : > { %v2539_v43 = vmul.f32 0.35355338, %v2500_v29 }
 0xa68   : > { %v2550_v58 = vsel %vm308_vm0, %v2540_v10, -inf }
 0xa69   : > { %2551 = vmax.xlane.f32.xlu1 %v2550_v58  ;;  %v5322_v32 = vpop.f32.mrb[50].mxu0  ;;  %v2547_v41 = vsel %vm308_vm0, %v2539_v43, -inf }
 0xa6a   : > { %v7752_v33 = vmul.f32 0.35355338, %v5322_v32  ;;  %2548 = vmax.xlane.f32.xlu0 %v2547_v41  ;;  %v2510_v13 = vpop.f32.mrb[51].mxu0 }
 0xa6b   : > { %v2541_v45 = vmul.f32 0.35355338, %v2510_v13 }
 0xa6c   : > { %v2556_v47 = vsel %vm308_vm0, %v7752_v33, -inf }
 0xa6d   : > { %v5325_v7 = vpop.f32.mrb[52].mxu0  ;;  %v2553_v2 = vsel %vm308_vm0, %v2541_v45, -inf }
 0xa6e   : > { %2557 = vmax.xlane.f32.xlu0 %v2556_v47  ;;  %v2520_v20 = vpop.f32.mrb[53].mxu0  ;;  %v2544_v11 = vmul.f32 0.35355338, %v5325_v7 }
 0xa6f   : > { %v2543_v40 = vmul.f32 0.35355338, %v2520_v20 }
 0xa70   : > { %v2562_v16 = vsel %vm308_vm0, %v2544_v11, -inf }
 0xa71   : > { %v5328_v38 = vpop.f32.mrb[54].mxu0  ;;  %v2559_v35 = vsel %vm308_vm0, %v2543_v40, -inf }
 0xa72   : > { %2554 = vmax.xlane.f32.xlu0 %v2553_v2  ;;  %v2530_v39 = vpop.f32.mrb[55].mxu0  ;;  %v7757_v19 = vmul.f32 0.35355338, %v5328_v38 }
 0xa73   : > { %v7769_v55 = vmul.f32 0.35355338, %v2530_v39 }
 0xa74   : > { %v2568_v22 = vsel %vm308_vm0, %v7757_v19, -inf }
 0xa75   : > { %v2565_v52 = vsel %vm308_vm0, %v7769_v55, -inf }
 0xa76   : > { %2563 = vmax.xlane.f32.xlu0 %v2562_v16 }
 0xa7a   : > { %6162 = vrot.lane.b32.xlu1 %v7440_v54, %s6731_s23  ;;  %2569 = vmax.xlane.f32.xlu0 %v2568_v22 }
 0xa90   : > { %6167 = vrot.lane.b32.xlu0 %v7446_v50, %s6731_s23 }
 0xa9e   : > { %2560 = vmax.xlane.f32.xlu1 %v2559_v35 }
 0xaaf   : > { %6172 = vrot.lane.b32.xlu1 %v7626_v26, %s6731_s23 }
 0xad3   : > { %2566 = vmax.xlane.f32.xlu1 %v2565_v52 }
 0xae4   : > { %6177 = vrot.lane.b32.xlu1 %v7634_v46, %s6731_s23 }
 0xaf6   : > { %v2552_v54 = vpop.xlane.xlu1 %2551 }
 0xaf7   : > { %v2572_v29 = vsub.f32 %v2540_v10, %v2552_v54  ;;  %v2549_v58 = vpop.xlane.xlu0 %2548 }
 0xaf8   : > { %v2571_v50 = vsub.f32 %v2539_v43, %v2549_v58 }
 0xaf9   : > { %v2581_v32 = vmul.f32 1.442695, %v2572_v29 }
 0xafa   : > { %v2579_v41 = vmul.f32 1.442695, %v2571_v50  ;;  %v6163_v13 = vpop.permute.xlu1 %6162 }
 0xafb   : > { %6429 = vpow2.f32 %v2581_v32  ;;  %v6165_v47 = vunpack.i.h.bf16 %v6163_v13  ;;  %v6164_v7 = vunpack.i.l.bf16 %v6163_v13  ;;  %v2558_v20 = vpop.xlane.xlu0 %2557 }
 0xafc   : > { %6431 = vpow2.f32 %v2579_v41 }
 0xafd   : > { %v5753_v38 = vpack.c.bf16 %v6165_v47, %v6164_v7 }
 0xaff   : > { %5754 = vmatprep.subr.bf16.mxu1 %v5753_v38  ;;  %v2555_v2 = vpop.xlane.xlu0 %2554 }
 0xb00   : > { %v2573_v39 = vsub.f32 %v2541_v45, %v2555_v2  ;;  %5756 = vmatpush3.bf16.msra.mxu1 %v5753_v38  ;;  %v2574_v38 = vsub.f32 %v7752_v33, %v2558_v20 }
 0xb02   : > { %v2583_v16 = vmul.f32 1.442695, %v2573_v39  ;;  %v2585_v39 = vmul.f32 1.442695, %v2574_v38 }
 0xb03   : > { %v2564_v22 = vpop.xlane.xlu0 %2563 }
 0xb04   : > { %6433 = vpow2.f32 %v2583_v16  ;;  %v2576_v35 = vsub.f32 %v2544_v11, %v2564_v22 }
 0xb05   : > { %v7775_v10 = vpop.eup %6429 }
 0xb06   : > { %v7777_v43 = vpop.eup %6431  ;;  %v2589_v52 = vmul.f32 1.442695, %v2576_v35  ;;  %v2598_v54 = vsel %vm308_vm0, %v7775_v10, 0.0 }
 0xb07   : > { %2599 = vadd.xlane.f32.xlu0 %v2598_v54  ;;  %v2570_v29 = vpop.xlane.xlu0 %2569  ;;  %v2595_v58 = vsel %vm308_vm0, %v7777_v43, 0.0 }
 0xb08   : > { %6435 = vpow2.f32 %v2589_v52  ;;  %2596 = vadd.xlane.f32.xlu1 %v2595_v58  ;;  %v2578_v2 = vsub.f32 %v7757_v19, %v2570_v29 }
 0xb09   : > { %6437 = vpow2.f32 %v2585_v39 }
 0xb0a   : > { %v2593_v35 = vmul.f32 1.442695, %v2578_v2 }
 0xb0b   : > { %v6168_v45 = vpop.permute.xlu0 %6167 }
 0xb0c   : > { %v6170_v50 = vunpack.i.h.bf16 %v6168_v45  ;;  %v6169_v32 = vunpack.i.l.bf16 %v6168_v45 }
 0xb0e   : > { %v7783_v41 = vpop.eup %6433  ;;  %v5757_v11 = vpack.c.bf16 %v6170_v50, %v6169_v32 }
 0xb0f   : > { %v2601_v13 = vsel %vm308_vm0, %v7783_v41, 0.0 }
 0xb10   : > { %2602 = vadd.xlane.f32.xlu0 %v2601_v13  ;;  %5758 = vmatprep.subr.bf16.mxu1 %v5757_v11 }
 0xb11   : > { %5760 = vmatpush3.bf16.msra.mxu1 %v5757_v11 }
 0xb12   : > { %v7787_v47 = vpop.eup %6435 }
 0xb13   : > { %v2610_v7 = vsel %vm308_vm0, %v7787_v47, 0.0  ;;  %v7795_v32 = vpop.eup %6437 }
 0xb14   : > { %2611 = vadd.xlane.f32.xlu0 %v2610_v7 }
 0xb19   : > { %6182 = vrot.lane.b32.xlu1 %v7481_v8, %s6732_s7 }
 0xb2b   : > { %v2561_v16 = vpop.xlane.xlu1 %2560 }
 0xb2c   : > { %v2575_v22 = vsub.f32 %v2543_v40, %v2561_v16  ;;  %v2604_v40 = vsel %vm308_vm0, %v7795_v32, 0.0 }
 0xb2e   : > { %v2587_v52 = vmul.f32 1.442695, %v2575_v22 }
 0xb2f   : > { %v6173_v54 = vpop.permute.xlu1 %6172 }
 0xb30   : > { %6439 = vpow2.f32 %v2587_v52  ;;  %v6175_v58 = vunpack.i.h.bf16 %v6173_v54  ;;  %v6174_v45 = vunpack.i.l.bf16 %v6173_v54 }
 0xb31   : > { %6441 = vpow2.f32 %v2593_v35 }
 0xb32   : > { %v5761_v50 = vpack.c.bf16 %v6175_v58, %v6174_v45 }
 0xb34   : > { %5762 = vmatprep.subr.bf16.mxu1 %v5761_v50 }
 0xb35   : > { %5764 = vmatpush3.bf16.msra.mxu1 %v5761_v50 }
 0xb3a   : > { %v7797_v8 = vpop.eup %6439 }
 0xb3b   : > { %v2607_v33 = vsel %vm308_vm0, %v7797_v8, 0.0  ;;  %v7801_v19 = vpop.eup %6441 }
 0xb3c   : > { %2608 = vadd.xlane.f32.xlu0 %v2607_v33  ;;  %v2616_v20 = vsel %vm308_vm0, %v7801_v19, 0.0 }
 0xb3d   : > { %2605 = vadd.xlane.f32.xlu1 %v2604_v40 }
 0xb40   : > { %2617 = vadd.xlane.f32.xlu0 %v2616_v20 }
 0xb4e   : > { %6192 = vrot.lane.b32.xlu1 %v7505_v37, %s6732_s7 }
 0xb52   : > { %6197 = vrot.lane.b32.xlu1 %v7515_v62, %s6732_s7 }
 0xb56   : > { %2861 = vrot.lane.b32.xlu1 %v7477_v21, %s6733_s8 }
 0xb5a   : > { %2863 = vrot.lane.b32.xlu1 %v7475_v42, %s6733_s8 }
 0xb5e   : > { %2867 = vrot.lane.b32.xlu1 %v7523_v36, %s6733_s8 }
 0xb60   : > { %v2567_v29 = vpop.xlane.xlu1 %2566 }
 0xb61   : > { %v2577_v11 = vsub.f32 %v7769_v55, %v2567_v29 }
 0xb62   : > { %2871 = vrot.lane.b32.xlu1 %v7499_v1, %s6733_s8 }
 0xb63   : > { %v2591_v37 = vmul.f32 1.442695, %v2577_v11 }
 0xb64   : > { %v6178_v13 = vpop.permute.xlu1 %6177 }
 0xb65   : > { %6443 = vpow2.f32 %v2591_v37  ;;  %v6180_v62 = vunpack.i.h.bf16 %v6178_v13  ;;  %v6179_v7 = vunpack.i.l.bf16 %v6178_v13 }
 0xb66   : > { %2875 = vrot.lane.b32.xlu1 %v7507_v28, %s6733_s8 }
 0xb67   : > { %v5765_v21 = vpack.c.bf16 %v6180_v62, %v6179_v7 }
 0xb69   : > { %5766 = vmatprep.subr.bf16.mxu1 %v5765_v21 }
 0xb6a   : > { %5768 = vmatpush3.bf16.msra.mxu1 %v5765_v21 }
 0xb6f   : > { %v6444_v42 = vpop.eup %6443 }
 0xb70   : > { %v2613_v36 = vsel %vm308_vm0, %v6444_v42, 0.0 }
 0xb71   : > { %2614 = vadd.xlane.f32.xlu0 %v2613_v36 }
 0xb87   : > { %6187 = vrot.lane.b32.xlu0 %v7540_v34, %s6732_s7 }
 0xb8b   : > { %2865 = vrot.lane.b32.xlu0 %v7536_v25, %s6733_s8 }
 0xb8f   : > { %2869 = vrot.lane.b32.xlu0 %v7501_v15, %s6733_s8 }
 0xb93   : > { %2873 = vrot.lane.b32.xlu0 %v7511_v61, %s6733_s8 }
 0xb94   : > { %v2600_v1 = vpop.xlane.xlu0 %2599 }
 0xb95   : > { %6445 = vrcp.f32 %v2600_v1  ;;  %v2597_v28 = vpop.xlane.xlu1 %2596 }
 0xb96   : > { %6447 = vrcp.f32 %v2597_v28 }
 0xb99   : > { %v6183_v55 = vpop.permute.xlu1 %6182 }
 0xb9a   : > { %v6185_v38 = vunpack.i.h.bf16 %v6183_v55  ;;  %v6184_v2 = vunpack.i.l.bf16 %v6183_v55 }
 0xb9c   : > { %v5769_v39 = vpack.c.bf16 %v6185_v38, %v6184_v2 }
 0xb9d   : > { %v2603_v16 = vpop.xlane.xlu0 %2602 }
 0xb9e   : > { %6449 = vrcp.f32 %v2603_v16  ;;  %5771 = vmatprep.subr.msk.bf16.mxu1 %vm7108_vm2, %v5769_v39 }
 0xb9f   : > { %v6446_v25 = vpop.eup %6445 }
 0xba0   : > { %v6448_v34 = vpop.eup %6447  ;;  %v2622_v22 = vmul.f32 %v6446_v25, %v7775_v10 }
 0xba1   : > { %v2620_v15 = vmul.f32 %v6448_v34, %v7777_v43  ;;  %v2612_v52 = vpop.xlane.xlu0 %2611 }
 0xba3   : > { %5345 = vmatprep.mubr.msk.f32.mxu1 %vm308_vm0, %v2620_v15 }
 0xba4   : > { %5346 = vmatmul.mubr.msk.f32.vlgmr.msra.gmra.mrb[32].mxu1 %vm308_vm0, %v2622_v22 }
 0xba5   : > { %5774 = vmatpush3.bf16.xpose.msk.msra.mxu1 %vm7108_vm2, %v5769_v39 }
 0xba8   : > { %v6450_v61 = vpop.eup %6449 }
 0xba9   : > { %v2624_v35 = vmul.f32 %v6450_v61, %v7783_v41 }
 0xbab   : > { %5348 = vmatprep.mubr.msk.f32.mxu1 %vm308_vm0, %v2624_v35 }
 0xbc9   : > { %v2609_v54 = vpop.xlane.xlu0 %2608 }
 0xbca   : > { %6451 = vrcp.f32 %v2609_v54  ;;  %v2606_v58 = vpop.xlane.xlu1 %2605 }
 0xbcb   : > { %6453 = vrcp.f32 %v2606_v58 }
 0xbcc   : > { %6455 = vrcp.f32 %v2612_v52 }
 0xbcd   : > { %v2618_v40 = vpop.xlane.xlu0 %2617 }
 0xbce   : > { %6457 = vrcp.f32 %v2618_v40  ;;  %v6193_v29 = vpop.permute.xlu1 %6192 }
 0xbcf   : > { %v6195_v37 = vunpack.i.h.bf16 %v6193_v29  ;;  %v6194_v13 = vunpack.i.l.bf16 %v6193_v29 }
 0xbd2   : > { %v6198_v21 = vpop.permute.xlu1 %6197 }
 0xbd3   : > { %v6200_v28 = vunpack.i.h.bf16 %v6198_v21  ;;  %v6199_v55 = vunpack.i.l.bf16 %v6198_v21 }
 0xbd4   : > { %v6452_v43 = vpop.eup %6451 }
 0xbd5   : > { %v6454_v10 = vpop.eup %6453  ;;  %v2628_v33 = vmul.f32 %v6452_v43, %v7797_v8  ;;  %v5781_v8 = vpack.c.bf16 %v6195_v37, %v6194_v13  ;;  %v5787_v39 = vpack.c.bf16 %v6200_v28, %v6199_v55 }
 0xbd6   : > { %v2626_v45 = vmul.f32 %v6454_v10, %v7795_v32  ;;  %v6456_v50 = vpop.eup %6455  ;;  %v2862_v2 = vpop.permute.xlu1 %2861 }
 0xbd7   : > { %v2630_v41 = vmul.f32 %v6456_v50, %v7787_v47 }
 0xbd8   : > { %5349 = vmatmul.mubr.msk.f32.gmra.mrb[34].mxu1 %vm308_vm0, %v2626_v45  ;;  %v6458_v36 = vpop.eup %6457 }
 0xbd9   : > { %5351 = vmatprep.mubr.msk.f32.mxu1 %vm308_vm0, %v2628_v33  ;;  %v2634_v38 = vmul.f32 %v6458_v36, %v7801_v19 }
 0xbda   : > { %v2864_v16 = vpop.permute.xlu1 %2863 }
 0xbdc   : > { %5352 = vmatmul.mubr.msk.f32.gmra.mrb[36].mxu1 %vm308_vm0, %v2630_v41 }
 0xbde   : > { %v2868_v19 = vpop.permute.xlu1 %2867 }
 0xbe2   : > { %v2872_v34 = vpop.permute.xlu1 %2871 }
 0xbe6   : > { %v2876_v22 = vpop.permute.xlu1 %2875 }
 0xbfe   : > { %v2615_v20 = vpop.xlane.xlu0 %2614 }
 0xbff   : > { %6459 = vrcp.f32 %v2615_v20 }
 0xc02   : > { %v6188_v11 = vpop.permute.xlu0 %6187 }
 0xc03   : > { %v6190_v32 = vunpack.i.h.bf16 %v6188_v11  ;;  %v6189_v62 = vunpack.i.l.bf16 %v6188_v11 }
 0xc05   : > { %v5775_v7 = vpack.c.bf16 %v6190_v32, %v6189_v62 }
 0xc07   : > { %5777 = vmatprep.subr.msk.bf16.mxu1 %vm7108_vm2, %v5775_v7 }
 0xc08   : > { %5780 = vmatpush3.bf16.xpose.msk.msra.mxu1 %vm7108_vm2, %v5775_v7 }
 0xc09   : > { %v6460_v47 = vpop.eup %6459  ;;  %5783 = vmatprep.subr.msk.bf16.mxu1 %vm7108_vm2, %v5781_v8 }
 0xc0a   : > { %v2632_v1 = vmul.f32 %v6460_v47, %v6444_v42  ;;  %v2866_v42 = vpop.permute.xlu0 %2865 }
 0xc0c   : > { %5354 = vmatprep.mubr.msk.f32.mxu1 %vm308_vm0, %v2632_v1 }
 0xc0d   : > { %5355 = vmatmul.mubr.msk.f32.gmra.mrb[38].mxu1 %vm308_vm0, %v2634_v38  ;;  %v2846_v38 = vld [vmem:[#allocation2 + $0x18] sm:$0xff] }
 0xc0e   : > { %5373 = vmatprep.mubr.msk.f32.mxu1 %vm502_vm1, %v2862_v2  ;;  %v2870_v25 = vpop.permute.xlu0 %2869  ;;  %v2845_v2 = vld [vmem:[#allocation2 + $0x8] sm:$0xff] }
 0xc10   : > { %5786 = vmatpush3.bf16.xpose.msk.msra.mxu1 %vm7108_vm2, %v5781_v8 }
 0xc11   : > { %5789 = vmatprep.subr.msk.bf16.mxu1 %vm7108_vm2, %v5787_v39 }
 0xc12   : > { %v2874_v15 = vpop.permute.xlu0 %2873 }
 0xc18   : > { %5792 = vmatpush3.bf16.xpose.msk.msra.mxu1 %vm7108_vm2, %v5787_v39  ;;  %v7896_v39 = vpack.i.bf16 %v2846_v38, %v2845_v2 }
 0xc1f   : > { %5374 = vmatmul.mubr.msk.f32.vlgmr.msra.gmra.mrb[40].mxu1 %vm502_vm1, %v2864_v16 }
 0xc20   : > { %5376 = vmatprep.mubr.msk.f32.mxu1 %vm502_vm1, %v2866_v42  ;;  %v2848_v42 = vld [vmem:[#allocation2 + $0x38] sm:$0xff] }
 0xc23   : > { %5377 = vmatmul.mubr.msk.f32.gmra.mrb[42].mxu1 %vm502_vm1, %v2868_v19  ;;  %v2847_v19 = vld [vmem:[#allocation2 + $0x28] sm:$0xff] }
 0xc24   : > { %5379 = vmatprep.mubr.msk.f32.mxu1 %vm502_vm1, %v2870_v25  ;;  %v7902_v25 = vpack.i.bf16 %v2848_v42, %v2847_v19 }
 0xc27   : > { %5380 = vmatmul.mubr.msk.f32.gmra.mrb[44].mxu1 %vm502_vm1, %v2872_v34 }
 0xc28   : > { %5382 = vmatprep.mubr.msk.f32.mxu1 %vm502_vm1, %v2874_v15 }
 0xc2b   : > { %5383 = vmatmul.mubr.msk.f32.gmra.mrb[46].mxu1 %vm502_vm1, %v2876_v22 }
 0xc77   : > { %v7870_v61 = vpop.f32.mrb[32].mxu1 }
 0xc78   : > { %v7872_v35 = vpop.f32.mrb[33].mxu1 }
 0xcab   : > { %v7874_v52 = vpop.f32.mrb[34].mxu1 }
 0xcac   : > { %8529 = vst [vmem:[#allocation21_spill] sm:$0xff] %v7874_v52  ;;  %v7876_v54 = vpop.f32.mrb[35].mxu1 }
 0xcad   : > { %8530 = vst [vmem:[#allocation22_spill] sm:$0xff] %v7876_v54 }
 0xcaf   : > { %v7878_v58 = vpop.f32.mrb[36].mxu1 }
 0xcb0   : > { %v7880_v43 = vpop.f32.mrb[37].mxu1 }
 0xce0   : > { %v7882_v10 = vpop.f32.mrb[38].mxu1 }
 0xce1   : > { %8531 = vst [vmem:[#allocation23_spill] sm:$0xff] %v7882_v10  ;;  %v7884_v45 = vpop.f32.mrb[39].mxu1 }
 0xce2   : > { %8532 = vst [vmem:[#allocation24_spill] sm:$0xff] %v7884_v45 }
 0xcf2   : > { %v5375_v50 = vpop.f32.mrb[40].mxu1 }
 0xcf3   : > { %v3031_v33 = vmul.f32 0.35355338, %v5375_v50  ;;  %v2991_v41 = vpop.f32.mrb[41].mxu1 }
 0xcf4   : > { %v3030_v40 = vmul.f32 0.35355338, %v2991_v41 }
 0xcf5   : > { %v3041_v20 = vsel %vm308_vm0, %v3031_v33, -inf }
 0xcf6   : > { %3042 = vmax.xlane.f32.xlu1 %v3041_v20  ;;  %v5378_v29 = vpop.f32.mrb[42].mxu1  ;;  %v3038_v11 = vsel %vm308_vm0, %v3030_v40, -inf }
 0xcf7   : > { %v7888_v37 = vmul.f32 0.35355338, %v5378_v29  ;;  %3039 = vmax.xlane.f32.xlu0 %v3038_v11  ;;  %v3001_v13 = vpop.f32.mrb[43].mxu1 }
 0xcf8   : > { %v3032_v62 = vmul.f32 0.35355338, %v3001_v13 }
 0xcf9   : > { %v3047_v32 = vsel %vm308_vm0, %v7888_v37, -inf }
 0xcfa   : > { %v5381_v7 = vpop.f32.mrb[44].mxu1  ;;  %v3044_v47 = vsel %vm308_vm0, %v3032_v62, -inf }
 0xcfb   : > { %3048 = vmax.xlane.f32.xlu0 %v3047_v32  ;;  %v3011_v8 = vpop.f32.mrb[45].mxu1  ;;  %v3035_v21 = vmul.f32 0.35355338, %v5381_v7 }
 0xcfc   : > { %v3034_v34 = vmul.f32 0.35355338, %v3011_v8 }
 0xcfd   : > { %v3053_v55 = vsel %vm308_vm0, %v3035_v21, -inf }
 0xcfe   : > { %v5384_v36 = vpop.f32.mrb[46].mxu1  ;;  %v3050_v15 = vsel %vm308_vm0, %v3034_v34, -inf }
 0xcff   : > { %3045 = vmax.xlane.f32.xlu0 %v3044_v47  ;;  %v3021_v1 = vpop.f32.mrb[47].mxu1  ;;  %v7893_v28 = vmul.f32 0.35355338, %v5384_v36 }
 0xd00   : > { %v7909_v22 = vmul.f32 0.35355338, %v3021_v1 }
 0xd01   : > { %v3059_v16 = vsel %vm308_vm0, %v7893_v28, -inf }
 0xd02   : > { %v3056_v50 = vsel %vm308_vm0, %v7909_v22, -inf }
 0xd03   : > { %3054 = vmax.xlane.f32.xlu0 %v3053_v55 }
 0xd07   : > { %6202 = vrot.lane.b32.xlu1 %v7896_v39, %s6733_s8  ;;  %3060 = vmax.xlane.f32.xlu0 %v3059_v16 }
 0xd1d   : > { %6207 = vrot.lane.b32.xlu0 %v7902_v25, %s6733_s8 }
 0xd2b   : > { %3051 = vmax.xlane.f32.xlu1 %v3050_v15 }
 0xd3c   : > { %6212 = vrot.lane.b32.xlu1 %v7626_v26, %s6733_s8 }
 0xd60   : > { %3057 = vmax.xlane.f32.xlu1 %v3056_v50 }
 0xd71   : > { %6217 = vrot.lane.b32.xlu1 %v7634_v46, %s6733_s8 }
 0xd83   : > { %v3043_v41 = vpop.xlane.xlu1 %3042 }
 0xd84   : > { %v3063_v20 = vsub.f32 %v3031_v33, %v3043_v41  ;;  %v3040_v29 = vpop.xlane.xlu0 %3039 }
 0xd85   : > { %v3062_v11 = vsub.f32 %v3030_v40, %v3040_v29 }
 0xd86   : > { %v3072_v13 = vmul.f32 1.442695, %v3063_v20 }
 0xd87   : > { %v3070_v32 = vmul.f32 1.442695, %v3062_v11  ;;  %v6203_v7 = vpop.permute.xlu1 %6202 }
 0xd88   : > { %6461 = vpow2.f32 %v3072_v13  ;;  %v6205_v8 = vunpack.i.h.bf16 %v6203_v7  ;;  %v6204_v36 = vunpack.i.l.bf16 %v6203_v7  ;;  %v3049_v26 = vpop.xlane.xlu0 %3048  ;;  %v7933_v7 = vld [vmem:[#allocation2] sm:$0xff] }
 0xd89   : > { %6463 = vpow2.f32 %v3070_v32  ;;  %v7931_v32 = vld [vmem:[#allocation2 + $0x10] sm:$0xff] }
 0xd8a   : > { %v5793_v47 = vpack.c.bf16 %v6205_v8, %v6204_v36  ;;  %v7937_v8 = vpack.i.bf16 %v7931_v32, %v7933_v7  ;;  %v3065_v36 = vsub.f32 %v7888_v37, %v3049_v26 }
 0xd8c   : > { %5794 = vmatprep.subr.bf16.mxu0 %v5793_v47  ;;  %v3046_v1 = vpop.xlane.xlu0 %3045 }
 0xd8d   : > { %v3064_v55 = vsub.f32 %v3032_v62, %v3046_v1  ;;  %5796 = vmatpush3.bf16.msra.mxu0 %v5793_v47  ;;  %v3076_v1 = vmul.f32 1.442695, %v3065_v36  ;;  %v7967_v36 = vld [vmem:[#allocation2 + $0x60] sm:$0xff] }
 0xd8f   : > { %v3074_v38 = vmul.f32 1.442695, %v3064_v55 }
 0xd90   : > { %v3055_v2 = vpop.xlane.xlu0 %3054 }
 0xd91   : > { %6465 = vpow2.f32 %v3074_v38  ;;  %v3067_v46 = vsub.f32 %v3035_v21, %v3055_v2 }
 0xd92   : > { %v7915_v33 = vpop.eup %6461 }
 0xd93   : > { %v7917_v40 = vpop.eup %6463  ;;  %v3080_v16 = vmul.f32 1.442695, %v3067_v46  ;;  %v3089_v42 = vsel %vm308_vm0, %v7915_v33, 0.0 }
 0xd94   : > { %3090 = vadd.xlane.f32.xlu0 %v3089_v42  ;;  %v3061_v19 = vpop.xlane.xlu0 %3060  ;;  %v3086_v15 = vsel %vm308_vm0, %v7917_v40, 0.0 }
 0xd95   : > { %6467 = vpow2.f32 %v3080_v16  ;;  %3087 = vadd.xlane.f32.xlu1 %v3086_v15  ;;  %v3069_v47 = vsub.f32 %v7893_v28, %v3061_v19  ;;  %v7955_v19 = vld [vmem:[#allocation2 + $0x50] sm:$0xff] }
 0xd96   : > { %6469 = vpow2.f32 %v3076_v1  ;;  %v7979_v1 = vld [vmem:[#allocation2 + $0x30] sm:$0xff] }
 0xd97   : > { %v3084_v2 = vmul.f32 1.442695, %v3069_v47 }
 0xd98   : > { %v6208_v62 = vpop.permute.xlu0 %6207 }
 0xd99   : > { %v6210_v50 = vunpack.i.h.bf16 %v6208_v62  ;;  %v6209_v41 = vunpack.i.l.bf16 %v6208_v62 }
 0xd9b   : > { %v7923_v20 = vpop.eup %6465  ;;  %v5797_v21 = vpack.c.bf16 %v6210_v50, %v6209_v41 }
 0xd9c   : > { %v3092_v29 = vsel %vm308_vm0, %v7923_v20, 0.0 }
 0xd9d   : > { %3093 = vadd.xlane.f32.xlu0 %v3092_v29  ;;  %5798 = vmatprep.subr.bf16.mxu0 %v5797_v21 }
 0xd9e   : > { %5800 = vmatpush3.bf16.msra.mxu0 %v5797_v21  ;;  %v7957_v21 = vld [vmem:[#allocation2 + $0x40] sm:$0xff] }
 0xd9f   : > { %v7927_v11 = vpop.eup %6467  ;;  %v7961_v29 = vpack.i.bf16 %v7955_v19, %v7957_v21 }
 0xda0   : > { %v3101_v13 = vsel %vm308_vm0, %v7927_v11, 0.0  ;;  %v7943_v50 = vpop.eup %6469 }
 0xda1   : > { %3102 = vadd.xlane.f32.xlu0 %v3101_v13  ;;  %v7963_v13 = vld [vmem:[#allocation2 + $0x70] sm:$0xff] }
 0xda2   : > { %v7971_v47 = vpack.i.bf16 %v7963_v13, %v7967_v36 }
 0xda6   : > { %6222 = vrot.lane.b32.xlu1 %v7937_v8, %s6734_s14 }
 0xdb8   : > { %v3052_v55 = vpop.xlane.xlu1 %3051 }
 0xdb9   : > { %v3066_v38 = vsub.f32 %v3034_v34, %v3052_v55  ;;  %v3095_v34 = vsel %vm308_vm0, %v7943_v50, 0.0 }
 0xdbb   : > { %v3078_v46 = vmul.f32 1.442695, %v3066_v38 }
 0xdbc   : > { %v6213_v16 = vpop.permute.xlu1 %6212 }
 0xdbd   : > { %6471 = vpow2.f32 %v3078_v46  ;;  %v6215_v42 = vunpack.i.h.bf16 %v6213_v16  ;;  %v6214_v15 = vunpack.i.l.bf16 %v6213_v16 }
 0xdbe   : > { %6473 = vpow2.f32 %v3084_v2 }
 0xdbf   : > { %v5801_v62 = vpack.c.bf16 %v6215_v42, %v6214_v15 }
 0xdc1   : > { %5802 = vmatprep.subr.bf16.mxu0 %v5801_v62 }
 0xdc2   : > { %5804 = vmatpush3.bf16.msra.mxu0 %v5801_v62 }
 0xdc7   : > { %v7945_v41 = vpop.eup %6471 }
 0xdc8   : > { %v3098_v37 = vsel %vm308_vm0, %v7945_v41, 0.0  ;;  %v7949_v28 = vpop.eup %6473 }
 0xdc9   : > { %3099 = vadd.xlane.f32.xlu0 %v3098_v37  ;;  %v3107_v26 = vsel %vm308_vm0, %v7949_v28, 0.0 }
 0xdca   : > { %3096 = vadd.xlane.f32.xlu1 %v3095_v34 }
 0xdcd   : > { %3108 = vadd.xlane.f32.xlu0 %v3107_v26 }
 0xddb   : > { %6232 = vrot.lane.b32.xlu1 %v7961_v29, %s6734_s14 }
 0xddf   : > { %6237 = vrot.lane.b32.xlu1 %v7971_v47, %s6734_s14 }
 0xde3   : > { %3352 = vrot.lane.b32.xlu1 %v7933_v7, %s6735_s24 }
 0xde7   : > { %3354 = vrot.lane.b32.xlu1 %v7931_v32, %s6735_s24 }
 0xdeb   : > { %3358 = vrot.lane.b32.xlu1 %v7979_v1, %s6735_s24 }
 0xded   : > { %v3058_v55 = vpop.xlane.xlu1 %3057 }
 0xdee   : > { %v3068_v38 = vsub.f32 %v7909_v22, %v3058_v55  ;;  %v7992_v22 = vld [vmem:[#allocation2 + $0x20] sm:$0xff] }
 0xdef   : > { %3362 = vrot.lane.b32.xlu1 %v7955_v19, %s6735_s24  ;;  %v7996_v34 = vpack.i.bf16 %v7979_v1, %v7992_v22 }
 0xdf0   : > { %v3082_v2 = vmul.f32 1.442695, %v3068_v38 }
 0xdf1   : > { %v6218_v46 = vpop.permute.xlu1 %6217 }
 0xdf2   : > { %6475 = vpow2.f32 %v3082_v2  ;;  %v6220_v16 = vunpack.i.h.bf16 %v6218_v46  ;;  %v6219_v42 = vunpack.i.l.bf16 %v6218_v46 }
 0xdf3   : > { %3366 = vrot.lane.b32.xlu1 %v7963_v13, %s6735_s24 }
 0xdf4   : > { %v5805_v15 = vpack.c.bf16 %v6220_v16, %v6219_v42 }
 0xdf6   : > { %5806 = vmatprep.subr.bf16.mxu0 %v5805_v15 }
 0xdf7   : > { %5808 = vmatpush3.bf16.msra.mxu0 %v5805_v15 }
 0xdfc   : > { %v7988_v62 = vpop.eup %6475 }
 0xdfd   : > { %v3104_v37 = vsel %vm308_vm0, %v7988_v62, 0.0 }
 0xdfe   : > { %3105 = vadd.xlane.f32.xlu0 %v3104_v37 }
 0xe14   : > { %6227 = vrot.lane.b32.xlu0 %v7996_v34, %s6734_s14 }
 0xe18   : > { %3356 = vrot.lane.b32.xlu0 %v7992_v22, %s6735_s24 }
 0xe1c   : > { %3360 = vrot.lane.b32.xlu0 %v7957_v21, %s6735_s24 }
 0xe20   : > { %3364 = vrot.lane.b32.xlu0 %v7967_v36, %s6735_s24 }
 0xe21   : > { %v3091_v26 = vpop.xlane.xlu0 %3090 }
 0xe22   : > { %6477 = vrcp.f32 %v3091_v26  ;;  %v3088_v55 = vpop.xlane.xlu1 %3087 }
 0xe23   : > { %6479 = vrcp.f32 %v3088_v55 }
 0xe26   : > { %v6223_v38 = vpop.permute.xlu1 %6222 }
 0xe27   : > { %v6225_v2 = vunpack.i.h.bf16 %v6223_v38  ;;  %v6224_v46 = vunpack.i.l.bf16 %v6223_v38 }
 0xe29   : > { %v5809_v16 = vpack.c.bf16 %v6225_v2, %v6224_v46 }
 0xe2a   : > { %v3094_v42 = vpop.xlane.xlu0 %3093 }
 0xe2b   : > { %6481 = vrcp.f32 %v3094_v42  ;;  %5811 = vmatprep.subr.msk.bf16.mxu0 %vm7108_vm2, %v5809_v16 }
 0xe2c   : > { %v6478_v15 = vpop.eup %6477 }
 0xe2d   : > { %v6480_v37 = vpop.eup %6479  ;;  %v3113_v54 = vmul.f32 %v6478_v15, %v7915_v33 }
 0xe2e   : > { %v3111_v52 = vmul.f32 %v6480_v37, %v7917_v40  ;;  %v3103_v38 = vpop.xlane.xlu0 %3102 }
 0xe30   : > { %5401 = vmatprep.mubr.msk.f32.mxu0 %vm308_vm0, %v3111_v52 }
 0xe31   : > { %5402 = vmatmul.mubr.msk.f32.vlgmr.msra.gmra.mrb[56].mxu0 %vm308_vm0, %v3113_v54 }
 0xe32   : > { %5814 = vmatpush3.bf16.xpose.msk.msra.mxu0 %vm7108_vm2, %v5809_v16 }
 0xe35   : > { %v6482_v26 = vpop.eup %6481 }
 0xe36   : > { %v3115_v55 = vmul.f32 %v6482_v26, %v7923_v20 }
 0xe38   : > { %5404 = vmatprep.mubr.msk.f32.mxu0 %vm308_vm0, %v3115_v55 }
 0xe56   : > { %v3100_v2 = vpop.xlane.xlu0 %3099 }
 0xe57   : > { %6483 = vrcp.f32 %v3100_v2  ;;  %v3097_v46 = vpop.xlane.xlu1 %3096 }
 0xe58   : > { %6485 = vrcp.f32 %v3097_v46 }
 0xe59   : > { %6487 = vrcp.f32 %v3103_v38 }
 0xe5a   : > { %v3109_v16 = vpop.xlane.xlu0 %3108 }
 0xe5b   : > { %6489 = vrcp.f32 %v3109_v16  ;;  %v6233_v37 = vpop.permute.xlu1 %6232 }
 0xe5c   : > { %v6235_v55 = vunpack.i.h.bf16 %v6233_v37  ;;  %v6234_v38 = vunpack.i.l.bf16 %v6233_v37 }
 0xe61   : > { %v6484_v40 = vpop.eup %6483 }
 0xe62   : > { %v6486_v33 = vpop.eup %6485  ;;  %v3119_v54 = vmul.f32 %v6484_v40, %v7945_v41  ;;  %v5821_v41 = vpack.c.bf16 %v6235_v55, %v6234_v38  ;;  %v6238_v40 = vpop.permute.xlu1 %6237 }
 0xe63   : > { %v3117_v52 = vmul.f32 %v6486_v33, %v7943_v50  ;;  %v6488_v42 = vpop.eup %6487 }
 0xe64   : > { %v3121_v20 = vmul.f32 %v6488_v42, %v7927_v11  ;;  %v6240_v42 = vunpack.i.h.bf16 %v6238_v40 }
 0xe65   : > { %5405 = vmatmul.mubr.msk.f32.gmra.mrb[58].mxu0 %vm308_vm0, %v3117_v52  ;;  %v6490_v33 = vpop.eup %6489 }
 0xe66   : > { %5407 = vmatprep.mubr.msk.f32.mxu0 %vm308_vm0, %v3119_v54  ;;  %v6239_v54 = vunpack.i.l.bf16 %v6238_v40  ;;  %v3353_v16 = vpop.permute.xlu1 %3352 }
 0xe69   : > { %5408 = vmatmul.mubr.msk.f32.gmra.mrb[60].mxu0 %vm308_vm0, %v3121_v20  ;;  %v3125_v20 = vmul.f32 %v6490_v33, %v7949_v28 }
 0xe6a   : > { %v3355_v37 = vpop.permute.xlu1 %3354 }
 0xe6e   : > { %v3359_v28 = vpop.permute.xlu1 %3358 }
 0xe72   : > { %v3363_v55 = vpop.permute.xlu1 %3362 }
 0xe8b   : > { %v3106_v15 = vpop.xlane.xlu0 %3105 }
 0xe8c   : > { %6491 = vrcp.f32 %v3106_v15  ;;  %v5827_v15 = vpack.c.bf16 %v6240_v42, %v6239_v54 }
 0xe8f   : > { %v6228_v26 = vpop.permute.xlu0 %6227 }
 0xe90   : > { %v6230_v50 = vunpack.i.h.bf16 %v6228_v26  ;;  %v6229_v2 = vunpack.i.l.bf16 %v6228_v26 }
 0xe92   : > { %v5815_v46 = vpack.c.bf16 %v6230_v50, %v6229_v2  ;;  %v3367_v50 = vpop.permute.xlu1 %3366 }
 0xe94   : > { %5817 = vmatprep.subr.msk.bf16.mxu0 %vm7108_vm2, %v5815_v46 }
 0xe95   : > { %5820 = vmatpush3.bf16.xpose.msk.msra.mxu0 %vm7108_vm2, %v5815_v46 }
 0xe96   : > { %v6492_v11 = vpop.eup %6491  ;;  %5823 = vmatprep.subr.msk.bf16.mxu0 %vm7108_vm2, %v5821_v41 }
 0xe97   : > { %v3123_v52 = vmul.f32 %v6492_v11, %v7988_v62  ;;  %v3357_v62 = vpop.permute.xlu0 %3356 }
 0xe99   : > { %5410 = vmatprep.mubr.msk.f32.mxu0 %vm308_vm0, %v3123_v52 }
 0xe9a   : > { %5411 = vmatmul.mubr.msk.f32.gmra.mrb[62].mxu0 %vm308_vm0, %v3125_v20 }
 0xe9b   : > { %5429 = vmatprep.mubr.msk.f32.mxu0 %vm502_vm1, %v3353_v16  ;;  %v3361_v26 = vpop.permute.xlu0 %3360 }
 0xe9d   : > { %5826 = vmatpush3.bf16.xpose.msk.msra.mxu0 %vm7108_vm2, %v5821_v41 }
 0xe9e   : > { %5829 = vmatprep.subr.msk.bf16.mxu0 %vm7108_vm2, %v5827_v15 }
 0xe9f   : > { %v3365_v38 = vpop.permute.xlu0 %3364 }
 0xea5   : > { %5832 = vmatpush3.bf16.xpose.msk.msra.mxu0 %vm7108_vm2, %v5827_v15 }
 0xeac   : > { %5430 = vmatmul.mubr.msk.f32.vlgmr.msra.gmra.mrb[64].mxu0 %vm502_vm1, %v3355_v37 }
 0xead   : > { %5432 = vmatprep.mubr.msk.f32.mxu0 %vm502_vm1, %v3357_v62 }
 0xeb0   : > { %5433 = vmatmul.mubr.msk.f32.gmra.mrb[66].mxu0 %vm502_vm1, %v3359_v28 }
 0xeb1   : > { %5435 = vmatprep.mubr.msk.f32.mxu0 %vm502_vm1, %v3361_v26 }
 0xeb4   : > { %5436 = vmatmul.mubr.msk.f32.gmra.mrb[68].mxu0 %vm502_vm1, %v3363_v55 }
 0xeb5   : > { %5438 = vmatprep.mubr.msk.f32.mxu0 %vm502_vm1, %v3365_v38 }
 0xeb8   : > { %5439 = vmatmul.mubr.msk.f32.gmra.mrb[70].mxu0 %vm502_vm1, %v3367_v50 }
 0xf04   : > { %v8046_v2 = vpop.f32.mrb[56].mxu0 }
 0xf05   : > { %8533 = vst [vmem:[#allocation25_spill] sm:$0xff] %v8046_v2  ;;  %v8048_v46 = vpop.f32.mrb[57].mxu0 }
 0xf38   : > { %v8050_v41 = vpop.f32.mrb[58].mxu0 }
 0xf39   : > { %8534 = vst [vmem:[#allocation26_spill] sm:$0xff] %v8050_v41  ;;  %v8052_v40 = vpop.f32.mrb[59].mxu0 }
 0xf3a   : > { %8535 = vst [vmem:[#allocation27_spill] sm:$0xff] %v8052_v40 }
 0xf3c   : > { %v8054_v33 = vpop.f32.mrb[60].mxu0 }
 0xf3d   : > { %v8056_v11 = vpop.f32.mrb[61].mxu0 }
 0xf6d   : > { %v8058_v52 = vpop.f32.mrb[62].mxu0 }
 0xf6e   : > { %8536 = vst [vmem:[#allocation28_spill] sm:$0xff] %v8058_v52  ;;  %v8060_v42 = vpop.f32.mrb[63].mxu0 }
 0xf6f   : > { %8537 = vst [vmem:[#allocation29_spill] sm:$0xff] %v8060_v42 }
 0xf7f   : > { %v5431_v54 = vpop.f32.mrb[64].mxu0 }
 0xf80   : > { %v3522_v20 = vmul.f32 0.35355338, %v5431_v54  ;;  %v3482_v16 = vpop.f32.mrb[65].mxu0 }
 0xf81   : > { %v3521_v15 = vmul.f32 0.35355338, %v3482_v16 }
 0xf82   : > { %v3532_v37 = vsel %vm308_vm0, %v3522_v20, -inf }
 0xf83   : > { %3533 = vmax.xlane.f32.xlu1 %v3532_v37  ;;  %v5434_v62 = vpop.f32.mrb[66].mxu0  ;;  %v3529_v28 = vsel %vm308_vm0, %v3521_v15, -inf }
 0xf84   : > { %v8064_v26 = vmul.f32 0.35355338, %v5434_v62  ;;  %3530 = vmax.xlane.f32.xlu0 %v3529_v28  ;;  %v3492_v55 = vpop.f32.mrb[67].mxu0 }
 0xf85   : > { %v3523_v50 = vmul.f32 0.35355338, %v3492_v55 }
 0xf86   : > { %v3538_v38 = vsel %vm308_vm0, %v8064_v26, -inf }
 0xf87   : > { %v5437_v41 = vpop.f32.mrb[68].mxu0  ;;  %v3535_v16 = vsel %vm308_vm0, %v3523_v50, -inf }
 0xf88   : > { %3539 = vmax.xlane.f32.xlu0 %v3538_v38  ;;  %v3502_v40 = vpop.f32.mrb[69].mxu0  ;;  %v3526_v54 = vmul.f32 0.35355338, %v5437_v41  ;;  %v3340_v38 = vld [vmem:[#allocation2 + $0x48] sm:$0xff] }
 0xf89   : > { %v8078_v41 = vmul.f32 0.35355338, %v3502_v40  ;;  %v3342_v40 = vld [vmem:[#allocation2 + $0x68] sm:$0xff] }
 0xf8a   : > { %v3544_v62 = vsel %vm308_vm0, %v3526_v54, -inf }
 0xf8b   : > { %v5440_v52 = vpop.f32.mrb[70].mxu0  ;;  %v3541_v55 = vsel %vm308_vm0, %v8078_v41, -inf }
 0xf8c   : > { %3536 = vmax.xlane.f32.xlu0 %v3535_v16  ;;  %v3512_v37 = vpop.f32.mrb[71].mxu0  ;;  %v8069_v42 = vmul.f32 0.35355338, %v5440_v52  ;;  %v3341_v52 = vld [vmem:[#allocation2 + $0x58] sm:$0xff] }
 0xf8d   : > { %v8082_v16 = vpack.i.bf16 %v3341_v52, %v3340_v38 }
 0xf8e   : > { %v3550_v28 = vsel %vm308_vm0, %v8069_v42, -inf }
 0xf90   : > { %3545 = vmax.xlane.f32.xlu0 %v3544_v62  ;;  %v8086_v62 = vmul.f32 0.35355338, %v3512_v37 }
 0xf94   : > { %6242 = vrot.lane.b32.xlu1 %v7896_v39, %s6735_s24  ;;  %3551 = vmax.xlane.f32.xlu0 %v3550_v28  ;;  %v3547_v28 = vsel %vm308_vm0, %v8086_v62, -inf }
 0xfaa   : > { %6247 = vrot.lane.b32.xlu0 %v7902_v25, %s6735_s24  ;;  %v3343_v25 = vld [vmem:[#allocation2 + $0x78] sm:$0xff] }
 0xfab   : > { %v8090_v10 = vpack.i.bf16 %v3343_v25, %v3342_v40 }
 0xfb8   : > { %3542 = vmax.xlane.f32.xlu1 %v3541_v55 }
 0xfc9   : > { %6252 = vrot.lane.b32.xlu1 %v8082_v16, %s6735_s24 }
 0xfed   : > { %3548 = vmax.xlane.f32.xlu1 %v3547_v28 }
 0xffe   : > { %6257 = vrot.lane.b32.xlu1 %v8090_v10, %s6735_s24 }
0x1010   : > { %v3534_v55 = vpop.xlane.xlu1 %3533 }
0x1011   : > { %v3554_v6 = vsub.f32 %v3522_v20, %v3534_v55  ;;  %v3531_v52 = vpop.xlane.xlu0 %3530 }
0x1012   : > { %v3553_v38 = vsub.f32 %v3521_v15, %v3531_v52 }
0x1013   : > { %v3563_v45 = vmul.f32 1.442695, %v3554_v6 }
0x1014   : > { %v3561_v5 = vmul.f32 1.442695, %v3553_v38  ;;  %v6243_v3 = vpop.permute.xlu1 %6242 }
0x1015   : > { %6493 = vpow2.f32 %v3563_v45  ;;  %v6245_v37 = vunpack.i.h.bf16 %v6243_v3  ;;  %v6244_v63 = vunpack.i.l.bf16 %v6243_v3  ;;  %v3540_v59 = vpop.xlane.xlu0 %3539 }
0x1016   : > { %6495 = vpow2.f32 %v3561_v5  ;;  %v3556_v38 = vsub.f32 %v8064_v26, %v3540_v59 }
0x1017   : > { %v5833_v28 = vpack.c.bf16 %v6245_v37, %v6244_v63 }
0x1019   : > { %5834 = vmatprep.subr.bf16.mxu1 %v5833_v28  ;;  %v3537_v18 = vpop.xlane.xlu0 %3536 }
0x101a   : > { %v3555_v25 = vsub.f32 %v3523_v50, %v3537_v18  ;;  %5836 = vmatpush3.bf16.msra.mxu1 %v5833_v28  ;;  %v3567_v28 = vmul.f32 1.442695, %v3556_v38 }
0x101c   : > { %v3565_v40 = vmul.f32 1.442695, %v3555_v25 }
0x101d   : > { %v3546_v2 = vpop.xlane.xlu0 %3545 }
0x101e   : > { %6497 = vpow2.f32 %v3565_v40  ;;  %v3558_v24 = vsub.f32 %v3526_v54, %v3546_v2 }
0x101f   : > { %v8094_v20 = vpop.eup %6493 }
0x1020   : > { %v8096_v15 = vpop.eup %6495  ;;  %v3571_v6 = vmul.f32 1.442695, %v3558_v24  ;;  %v3580_v45 = vsel %vm308_vm0, %v8094_v20, 0.0 }
0x1021   : > { %3581 = vadd.xlane.f32.xlu0 %v3580_v45  ;;  %v3552_v3 = vpop.xlane.xlu0 %3551  ;;  %v3577_v63 = vsel %vm308_vm0, %v8096_v15, 0.0 }
0x1022   : > { %6499 = vpow2.f32 %v3571_v6  ;;  %3578 = vadd.xlane.f32.xlu1 %v3577_v63  ;;  %v3560_v37 = vsub.f32 %v8069_v42, %v3552_v3 }
0x1023   : > { %6501 = vpow2.f32 %v3567_v28 }
0x1024   : > { %v3575_v6 = vmul.f32 1.442695, %v3560_v37 }
0x1025   : > { %v6248_v18 = vpop.permute.xlu0 %6247 }
0x1026   : > { %v6250_v5 = vunpack.i.h.bf16 %v6248_v18  ;;  %v6249_v50 = vunpack.i.l.bf16 %v6248_v18 }
0x1028   : > { %v8102_v55 = vpop.eup %6497  ;;  %v5837_v2 = vpack.c.bf16 %v6250_v5, %v6249_v50 }
0x1029   : > { %v3583_v54 = vsel %vm308_vm0, %v8102_v55, 0.0 }
0x102a   : > { %3584 = vadd.xlane.f32.xlu0 %v3583_v54  ;;  %5838 = vmatprep.subr.bf16.mxu1 %v5837_v2 }
0x102b   : > { %5840 = vmatpush3.bf16.msra.mxu1 %v5837_v2 }
0x102c   : > { %v8106_v24 = vpop.eup %6499 }
0x102d   : > { %v3592_v52 = vsel %vm308_vm0, %v8106_v24, 0.0 }
0x102e   : > { %3593 = vadd.xlane.f32.xlu0 %v3592_v52 }
0x1033   : > { %6262 = vrot.lane.b32.xlu1 %v7937_v8, %s6736_s26  ;;  %v8115_v8 = vpop.eup %6501 }
0x1045   : > { %v3543_v25 = vpop.xlane.xlu1 %3542 }
0x1046   : > { %v3557_v40 = vsub.f32 %v8078_v41, %v3543_v25  ;;  %v3586_v41 = vsel %vm308_vm0, %v8115_v8, 0.0 }
0x1048   : > { %v3569_v45 = vmul.f32 1.442695, %v3557_v40 }
0x1049   : > { %v6253_v63 = vpop.permute.xlu1 %6252 }
0x104a   : > { %6503 = vpow2.f32 %v3569_v45  ;;  %v6255_v18 = vunpack.i.h.bf16 %v6253_v63  ;;  %v6254_v5 = vunpack.i.l.bf16 %v6253_v63 }
0x104b   : > { %6505 = vpow2.f32 %v3575_v6 }
0x104c   : > { %v5841_v50 = vpack.c.bf16 %v6255_v18, %v6254_v5 }
0x104e   : > { %5842 = vmatprep.subr.bf16.mxu1 %v5841_v50 }
0x104f   : > { %5844 = vmatpush3.bf16.msra.mxu1 %v5841_v50 }
0x1054   : > { %v8117_v59 = vpop.eup %6503 }
0x1055   : > { %v3589_v42 = vsel %vm308_vm0, %v8117_v59, 0.0  ;;  %v8121_v26 = vpop.eup %6505 }
0x1056   : > { %3590 = vadd.xlane.f32.xlu0 %v3589_v42  ;;  %v3598_v3 = vsel %vm308_vm0, %v8121_v26, 0.0 }
0x1057   : > { %3587 = vadd.xlane.f32.xlu1 %v3586_v41 }
0x105a   : > { %3599 = vadd.xlane.f32.xlu0 %v3598_v3 }
0x1068   : > { %6272 = vrot.lane.b32.xlu1 %v7961_v29, %s6736_s26 }
0x106c   : > { %6277 = vrot.lane.b32.xlu1 %v7971_v47, %s6736_s26 }
0x1070   : > { %3843 = vrot.lane.b32.xlu1 %v7933_v7, %s6737_s12 }
0x1074   : > { %3845 = vrot.lane.b32.xlu1 %v7931_v32, %s6737_s12 }
0x1078   : > { %3849 = vrot.lane.b32.xlu1 %v7979_v1, %s6737_s12 }
0x107a   : > { %v3549_v2 = vpop.xlane.xlu1 %3548 }
0x107b   : > { %v3559_v54 = vsub.f32 %v8086_v62, %v3549_v2 }
0x107c   : > { %3853 = vrot.lane.b32.xlu1 %v7955_v19, %s6737_s12 }
0x107d   : > { %v3573_v29 = vmul.f32 1.442695, %v3559_v54 }
0x107e   : > { %v6258_v52 = vpop.permute.xlu1 %6257 }
0x107f   : > { %6507 = vpow2.f32 %v3573_v29  ;;  %v6260_v47 = vunpack.i.h.bf16 %v6258_v52  ;;  %v6259_v38 = vunpack.i.l.bf16 %v6258_v52 }
0x1080   : > { %3857 = vrot.lane.b32.xlu1 %v7963_v13, %s6737_s12 }
0x1081   : > { %v5845_v7 = vpack.c.bf16 %v6260_v47, %v6259_v38 }
0x1083   : > { %5846 = vmatprep.subr.bf16.mxu1 %v5845_v7 }
0x1084   : > { %5848 = vmatpush3.bf16.msra.mxu1 %v5845_v7 }
0x1089   : > { %v6508_v32 = vpop.eup %6507 }
0x108a   : > { %v3595_v1 = vsel %vm308_vm0, %v6508_v32, 0.0 }
0x108b   : > { %3596 = vadd.xlane.f32.xlu0 %v3595_v1 }
0x10a1   : > { %6267 = vrot.lane.b32.xlu0 %v7996_v34, %s6736_s26 }
0x10a5   : > { %3847 = vrot.lane.b32.xlu0 %v7992_v22, %s6737_s12 }
0x10a9   : > { %3851 = vrot.lane.b32.xlu0 %v7957_v21, %s6737_s12 }
0x10ad   : > { %3855 = vrot.lane.b32.xlu0 %v7967_v36, %s6737_s12 }
0x10ae   : > { %v3582_v19 = vpop.xlane.xlu0 %3581 }
0x10af   : > { %6509 = vrcp.f32 %v3582_v19  ;;  %v3579_v13 = vpop.xlane.xlu1 %3578 }
0x10b0   : > { %6511 = vrcp.f32 %v3579_v13 }
0x10b3   : > { %v6263_v62 = vpop.permute.xlu1 %6262 }
0x10b4   : > { %v6265_v37 = vunpack.i.h.bf16 %v6263_v62  ;;  %v6264_v28 = vunpack.i.l.bf16 %v6263_v62 }
0x10b6   : > { %v5849_v25 = vpack.c.bf16 %v6265_v37, %v6264_v28 }
0x10b7   : > { %v3585_v40 = vpop.xlane.xlu0 %3584 }
0x10b8   : > { %6513 = vrcp.f32 %v3585_v40  ;;  %5851 = vmatprep.subr.msk.bf16.mxu1 %vm7108_vm2, %v5849_v25 }
0x10b9   : > { %v6510_v22 = vpop.eup %6509 }
0x10ba   : > { %v6512_v34 = vpop.eup %6511  ;;  %v3604_v6 = vmul.f32 %v6510_v22, %v8094_v20 }
0x10bb   : > { %v3602_v21 = vmul.f32 %v6512_v34, %v8096_v15  ;;  %v3594_v63 = vpop.xlane.xlu0 %3593 }
0x10bd   : > { %5457 = vmatprep.mubr.msk.f32.mxu1 %vm308_vm0, %v3602_v21 }
0x10be   : > { %5458 = vmatmul.mubr.msk.f32.vlgmr.msra.gmra.mrb[48].mxu1 %vm308_vm0, %v3604_v6 }
0x10bf   : > { %5854 = vmatpush3.bf16.xpose.msk.msra.mxu1 %vm7108_vm2, %v5849_v25 }
0x10c2   : > { %v6514_v36 = vpop.eup %6513 }
0x10c3   : > { %v3606_v45 = vmul.f32 %v6514_v36, %v8102_v55 }
0x10c5   : > { %5460 = vmatprep.mubr.msk.f32.mxu1 %vm308_vm0, %v3606_v45 }
0x10e3   : > { %v3591_v18 = vpop.xlane.xlu0 %3590 }
0x10e4   : > { %6515 = vrcp.f32 %v3591_v18  ;;  %v3588_v5 = vpop.xlane.xlu1 %3587 }
0x10e5   : > { %6517 = vrcp.f32 %v3588_v5 }
0x10e6   : > { %6519 = vrcp.f32 %v3594_v63 }
0x10e7   : > { %v3600_v3 = vpop.xlane.xlu0 %3599 }
0x10e8   : > { %6521 = vrcp.f32 %v3600_v3  ;;  %v6273_v54 = vpop.permute.xlu1 %6272 }
0x10e9   : > { %v6275_v52 = vunpack.i.h.bf16 %v6273_v54  ;;  %v6274_v47 = vunpack.i.l.bf16 %v6273_v54 }
0x10ec   : > { %v6278_v1 = vpop.permute.xlu1 %6277 }
0x10ed   : > { %v6280_v62 = vunpack.i.h.bf16 %v6278_v1  ;;  %v6279_v37 = vunpack.i.l.bf16 %v6278_v1 }
0x10ee   : > { %v6516_v15 = vpop.eup %6515 }
0x10ef   : > { %v6518_v20 = vpop.eup %6517  ;;  %v3610_v41 = vmul.f32 %v6516_v15, %v8117_v59  ;;  %v5861_v59 = vpack.c.bf16 %v6275_v52, %v6274_v47  ;;  %v5867_v40 = vpack.c.bf16 %v6280_v62, %v6279_v37 }
0x10f0   : > { %v3608_v50 = vmul.f32 %v6518_v20, %v8115_v8  ;;  %v6520_v42 = vpop.eup %6519  ;;  %v3844_v25 = vpop.permute.xlu1 %3843 }
0x10f1   : > { %v3612_v55 = vmul.f32 %v6520_v42, %v8106_v24 }
0x10f2   : > { %5461 = vmatmul.mubr.msk.f32.gmra.mrb[50].mxu1 %vm308_vm0, %v3608_v50  ;;  %v6522_v19 = vpop.eup %6521 }
0x10f3   : > { %5463 = vmatprep.mubr.msk.f32.mxu1 %vm308_vm0, %v3610_v41  ;;  %v3616_v28 = vmul.f32 %v6522_v19, %v8121_v26 }
0x10f4   : > { %v3846_v22 = vpop.permute.xlu1 %3845 }
0x10f6   : > { %5464 = vmatmul.mubr.msk.f32.gmra.mrb[52].mxu1 %vm308_vm0, %v3612_v55 }
0x10f8   : > { %v3850_v26 = vpop.permute.xlu1 %3849 }
0x10fc   : > { %v3854_v21 = vpop.permute.xlu1 %3853 }
0x1100   : > { %v3858_v36 = vpop.permute.xlu1 %3857 }
0x1118   : > { %v3597_v2 = vpop.xlane.xlu0 %3596 }
0x1119   : > { %6523 = vrcp.f32 %v3597_v2 }
0x111c   : > { %v6268_v29 = vpop.permute.xlu0 %6267 }
0x111d   : > { %v6270_v8 = vunpack.i.h.bf16 %v6268_v29  ;;  %v6269_v38 = vunpack.i.l.bf16 %v6268_v29 }
0x111f   : > { %v5855_v7 = vpack.c.bf16 %v6270_v8, %v6269_v38 }
0x1121   : > { %5857 = vmatprep.subr.msk.bf16.mxu1 %vm7108_vm2, %v5855_v7 }
0x1122   : > { %5860 = vmatpush3.bf16.xpose.msk.msra.mxu1 %vm7108_vm2, %v5855_v7 }
0x1123   : > { %v6524_v24 = vpop.eup %6523  ;;  %5863 = vmatprep.subr.msk.bf16.mxu1 %vm7108_vm2, %v5861_v59 }
0x1124   : > { %v3614_v13 = vmul.f32 %v6524_v24, %v6508_v32  ;;  %v3848_v32 = vpop.permute.xlu0 %3847 }
0x1126   : > { %5466 = vmatprep.mubr.msk.f32.mxu1 %vm308_vm0, %v3614_v13 }
0x1127   : > { %5467 = vmatmul.mubr.msk.f32.gmra.mrb[54].mxu1 %vm308_vm0, %v3616_v28 }
0x1128   : > { %5485 = vmatprep.mubr.msk.f32.mxu1 %vm502_vm1, %v3844_v25  ;;  %v3852_v34 = vpop.permute.xlu0 %3851 }
0x112a   : > { %5866 = vmatpush3.bf16.xpose.msk.msra.mxu1 %vm7108_vm2, %v5861_v59 }
0x112b   : > { %5869 = vmatprep.subr.msk.bf16.mxu1 %vm7108_vm2, %v5867_v40 }
0x112c   : > { %v3856_v6 = vpop.permute.xlu0 %3855 }
0x1132   : > { %5872 = vmatpush3.bf16.xpose.msk.msra.mxu1 %vm7108_vm2, %v5867_v40 }
0x1139   : > { %5486 = vmatmul.mubr.msk.f32.vlgmr.msra.gmra.mrb[56].mxu1 %vm502_vm1, %v3846_v22 }
0x113a   : > { %5488 = vmatprep.mubr.msk.f32.mxu1 %vm502_vm1, %v3848_v32 }
0x113d   : > { %5489 = vmatmul.mubr.msk.f32.gmra.mrb[58].mxu1 %vm502_vm1, %v3850_v26 }
0x113e   : > { %5491 = vmatprep.mubr.msk.f32.mxu1 %vm502_vm1, %v3852_v34 }
0x1141   : > { %5492 = vmatmul.mubr.msk.f32.gmra.mrb[60].mxu1 %vm502_vm1, %v3854_v21 }
0x1142   : > { %5494 = vmatprep.mubr.msk.f32.mxu1 %vm502_vm1, %v3856_v6 }
0x1145   : > { %5495 = vmatmul.mubr.msk.f32.gmra.mrb[62].mxu1 %vm502_vm1, %v3858_v36 }
0x1191   : > { %v8190_v31 = vpop.f32.mrb[48].mxu1 }
0x1192   : > { %v8192_v45 = vpop.f32.mrb[49].mxu1 }
0x11c5   : > { %v8194_v63 = vpop.f32.mrb[50].mxu1 }
0x11c6   : > { %v8196_v18 = vpop.f32.mrb[51].mxu1 }
0x11c9   : > { %v8198_v5 = vpop.f32.mrb[52].mxu1 }
0x11ca   : > { %v8200_v15 = vpop.f32.mrb[53].mxu1 }
0x11fa   : > { %v8202_v20 = vpop.f32.mrb[54].mxu1 }
0x11fb   : > { %v8204_v50 = vpop.f32.mrb[55].mxu1 }
0x120c   : > { %v5487_v42 = vpop.f32.mrb[56].mxu1 }
0x120d   : > { %v4013_v41 = vmul.f32 0.35355338, %v5487_v42  ;;  %v3973_v55 = vpop.f32.mrb[57].mxu1 }
0x120e   : > { %v4012_v3 = vmul.f32 0.35355338, %v3973_v55 }
0x120f   : > { %v4023_v2 = vsel %vm308_vm0, %v4013_v41, -inf }
0x1210   : > { %4024 = vmax.xlane.f32.xlu1 %v4023_v2  ;;  %v5490_v54 = vpop.f32.mrb[58].mxu1  ;;  %v4020_v29 = vsel %vm308_vm0, %v4012_v3, -inf }
0x1211   : > { %4021 = vmax.xlane.f32.xlu0 %v4020_v29  ;;  %v3983_v52 = vpop.f32.mrb[59].mxu1  ;;  %v4015_v8 = vmul.f32 0.35355338, %v5490_v54 }
0x1212   : > { %v4014_v47 = vmul.f32 0.35355338, %v3983_v52 }
0x1213   : > { %v4029_v13 = vsel %vm308_vm0, %v4015_v8, -inf }
0x1214   : > { %v5493_v38 = vpop.f32.mrb[60].mxu1  ;;  %v4026_v7 = vsel %vm308_vm0, %v4014_v47, -inf }
0x1215   : > { %4027 = vmax.xlane.f32.xlu0 %v4026_v7  ;;  %v3993_v59 = vpop.f32.mrb[61].mxu1  ;;  %v4017_v19 = vmul.f32 0.35355338, %v5493_v38 }
0x1216   : > { %v4016_v1 = vmul.f32 0.35355338, %v3993_v59 }
0x1217   : > { %v4035_v40 = vsel %vm308_vm0, %v4017_v19, -inf }
0x1218   : > { %v5496_v24 = vpop.f32.mrb[62].mxu1  ;;  %v4032_v62 = vsel %vm308_vm0, %v4016_v1, -inf }
0x1219   : > { %4030 = vmax.xlane.f32.xlu0 %v4029_v13  ;;  %4033 = vmax.xlane.f32.xlu1 %v4032_v62  ;;  %v4003_v37 = vpop.f32.mrb[63].mxu1  ;;  %v4019_v25 = vmul.f32 0.35355338, %v5496_v24 }
0x121a   : > { %v4018_v28 = vmul.f32 0.35355338, %v4003_v37 }
0x121b   : > { %v4041_v32 = vsel %vm308_vm0, %v4019_v25, -inf }
0x121c   : > { %v4038_v22 = vsel %vm308_vm0, %v4018_v28, -inf }
0x121d   : > { %4036 = vmax.xlane.f32.xlu0 %v4035_v40  ;;  %4039 = vmax.xlane.f32.xlu1 %v4038_v22 }
0x1221   : > { %4042 = vmax.xlane.f32.xlu0 %v4041_v32 }
0x122e   : > { %6282 = vrot.lane.b32.xlu1 %v7896_v39, %s6737_s12 }
0x129d   : > { %v4025_v26 = vpop.xlane.xlu1 %4024 }
0x129e   : > { %v4045_v34 = vsub.f32 %v4013_v41, %v4025_v26  ;;  %v4022_v21 = vpop.xlane.xlu0 %4021 }
0x129f   : > { %v4044_v6 = vsub.f32 %v4012_v3, %v4022_v21 }
0x12a0   : > { %v4054_v36 = vmul.f32 1.442695, %v4045_v34 }
0x12a1   : > { %v4052_v42 = vmul.f32 1.442695, %v4044_v6 }
0x12a2   : > { %6525 = vpow2.f32 %v4054_v36  ;;  %v4028_v55 = vpop.xlane.xlu0 %4027 }
0x12a3   : > { %6527 = vpow2.f32 %v4052_v42  ;;  %v4046_v2 = vsub.f32 %v4014_v47, %v4028_v55 }
0x12a5   : > { %v4056_v54 = vmul.f32 1.442695, %v4046_v2 }
0x12a6   : > { %v4031_v29 = vpop.xlane.xlu0 %4030  ;;  %v4034_v52 = vpop.xlane.xlu1 %4033 }
0x12a7   : > { %6529 = vpow2.f32 %v4056_v54  ;;  %v4047_v38 = vsub.f32 %v4015_v8, %v4031_v29  ;;  %v4048_v7 = vsub.f32 %v4016_v1, %v4034_v52 }
0x12a9   : > { %v4058_v59 = vmul.f32 1.442695, %v4047_v38  ;;  %v4060_v24 = vmul.f32 1.442695, %v4048_v7 }
0x12aa   : > { %v4037_v13 = vpop.xlane.xlu0 %4036  ;;  %v4040_v39 = vpop.xlane.xlu1 %4039 }
0x12ab   : > { %6531 = vpow2.f32 %v4058_v59  ;;  %v4049_v41 = vsub.f32 %v4017_v19, %v4037_v13  ;;  %v4050_v40 = vsub.f32 %v4018_v28, %v4040_v39  ;;  %v3829_v13 = vld [vmem:[#allocation2 + $0x28] sm:$0xff] }
0x12ac   : > { %v8216_v62 = vpop.eup %6525  ;;  %6533 = vpow2.f32 %v4060_v24  ;;  %v3830_v24 = vld [vmem:[#allocation2 + $0x38] sm:$0xff] }
0x12ad   : > { %v8218_v3 = vpop.eup %6527  ;;  %v4062_v37 = vmul.f32 1.442695, %v4049_v41  ;;  %v4071_v47 = vsel %vm308_vm0, %v8216_v62, 0.0  ;;  %v4064_v21 = vmul.f32 1.442695, %v4050_v40  ;;  %v6286_v39 = vpack.i.bf16 %v3830_v24, %v3829_v13 }
0x12ae   : > { %4072 = vadd.xlane.f32.xlu0 %v4071_v47  ;;  %v4043_v22 = vpop.xlane.xlu0 %4042  ;;  %v6283_v8 = vpop.permute.xlu1 %6282  ;;  %v4068_v1 = vsel %vm308_vm0, %v8218_v3, 0.0 }
0x12af   : > { %6535 = vpow2.f32 %v4062_v37  ;;  %v4051_v32 = vsub.f32 %v4019_v25, %v4043_v22  ;;  %v6285_v26 = vunpack.i.h.bf16 %v6283_v8  ;;  %v6284_v19 = vunpack.i.l.bf16 %v6283_v8  ;;  %4069 = vadd.xlane.f32.xlu1 %v4068_v1 }
0x12b1   : > { %v8224_v34 = vpop.eup %6529  ;;  %v4066_v6 = vmul.f32 1.442695, %v4051_v32  ;;  %v5873_v36 = vpack.c.bf16 %v6285_v26, %v6284_v19 }
0x12b2   : > { %v4074_v28 = vsel %vm308_vm0, %v8224_v34, 0.0 }
0x12b3   : > { %6537 = vpow2.f32 %v4066_v6  ;;  %4075 = vadd.xlane.f32.xlu1 %v4074_v28  ;;  %5874 = vmatprep.subr.bf16.mxu0 %v5873_v36 }
0x12b4   : > { %5876 = vmatpush3.bf16.msra.mxu0 %v5873_v36  ;;  %6539 = vpow2.f32 %v4064_v21 }
0x12b5   : > { %v8228_v42 = vpop.eup %6531 }
0x12b6   : > { %v8230_v55 = vpop.eup %6533  ;;  %v4077_v25 = vsel %vm308_vm0, %v8228_v42, 0.0 }
0x12b7   : > { %4078 = vadd.xlane.f32.xlu0 %v4077_v25  ;;  %v4080_v2 = vsel %vm308_vm0, %v8230_v55, 0.0 }
0x12b8   : > { %4081 = vadd.xlane.f32.xlu1 %v4080_v2 }
0x12b9   : > { %v8236_v54 = vpop.eup %6535 }
0x12ba   : > { %v4083_v29 = vsel %vm308_vm0, %v8236_v54, 0.0 }
0x12bb   : > { %4084 = vadd.xlane.f32.xlu0 %v4083_v29 }
0x12bd   : > { %v8240_v52 = vpop.eup %6537 }
0x12be   : > { %v4089_v38 = vsel %vm308_vm0, %v8240_v52, 0.0  ;;  %v8244_v7 = vpop.eup %6539 }
0x12bf   : > { %4090 = vadd.xlane.f32.xlu0 %v4089_v38  ;;  %v4086_v59 = vsel %vm308_vm0, %v8244_v7, 0.0 }
0x12c3   : > { %4087 = vadd.xlane.f32.xlu0 %v4086_v59 }
0x12c9   : > { %6292 = vrot.lane.b32.xlu1 %v8082_v16, %s6737_s12 }
0x12cd   : > { %6297 = vrot.lane.b32.xlu1 %v8090_v10, %s6737_s12 }
0x12d1   : > { %1331 = vrot.lane.b32.xlu1 %v7416_v53, %s6736_s26  ;;  %v8539_v53 = vld [vmem:[#allocation25_spill] sm:$0xff] }
0x12d5   : > { %1339 = vrot.lane.b32.xlu1 %v7424_v56, %s6736_s26  ;;  %v8543_v56 = vld [vmem:[#allocation18_spill] sm:$0xff] }
0x12d9   : > { %1341 = vrot.lane.b32.xlu1 %v7422_v4, %s6736_s26  ;;  %6287 = vrot.lane.b32.xlu0 %v6286_v39, %s6737_s12  ;;  %v8542_v4 = vld [vmem:[#allocation14_spill] sm:$0xff] }
0x12dd   : > { %1830 = vrot.lane.b32.xlu1 %v7600_v51, %s6734_s14  ;;  %1333 = vrot.lane.b32.xlu0 %v7414_v27, %s6736_s26  ;;  %v8538_v27 = vld [vmem:[#allocation15_spill] sm:$0xff]  ;;  %v8549_v51 = vld [vmem:[#allocation29_spill] sm:$0xff] }
0x12e1   : > { %1832 = vrot.lane.b32.xlu1 %v7598_v12, %s6734_s14  ;;  %1822 = vrot.lane.b32.xlu0 %v7592_v23, %s6734_s14  ;;  %v8547_v23 = vld [vmem:[#allocation23_spill] sm:$0xff]  ;;  %v8548_v12 = vld [vmem:[#allocation22_spill] sm:$0xff] }
0x12e5   : > { %2321 = vrot.lane.b32.xlu1 %v7744_v44, %s6732_s7  ;;  %1824 = vrot.lane.b32.xlu0 %v7590_v60, %s6734_s14  ;;  %v8546_v60 = vld [vmem:[#allocation17_spill] sm:$0xff] }
0x12e9   : > { %2323 = vrot.lane.b32.xlu1 %v7742_v48, %s6732_s7  ;;  %2313 = vrot.lane.b32.xlu0 %v7736_v0, %s6732_s7  ;;  %v8552_v0 = vld [vmem:[#allocation27_spill] sm:$0xff]  ;;  %v8553_v48 = vld [vmem:[#allocation26_spill] sm:$0xff] }
0x12ed   : > { %2812 = vrot.lane.b32.xlu1 %v7880_v43, %s6730_s11  ;;  %2315 = vrot.lane.b32.xlu0 %v7734_v57, %s6732_s7  ;;  %v8551_v57 = vld [vmem:[#allocation28_spill] sm:$0xff] }
0x12f1   : > { %1343 = vrot.lane.b32.xlu1 %v7428_v14, %s6736_s26  ;;  %2804 = vrot.lane.b32.xlu0 %v7872_v35, %s6730_s11  ;;  %v8545_v14 = vld [vmem:[#allocation24_spill] sm:$0xff] }
0x12f5   : > { %2814 = vrot.lane.b32.xlu1 %v7878_v58, %s6730_s11  ;;  %1335 = vrot.lane.b32.xlu0 %v7420_v49, %s6736_s26  ;;  %v8540_v49 = vld [vmem:[#allocation16_spill] sm:$0xff] }
0x12f9   : > { %3303 = vrot.lane.b32.xlu1 %v8056_v11, %s6728_s9  ;;  %2806 = vrot.lane.b32.xlu0 %v7870_v61, %s6730_s11 }
0x12fd   : > { %1345 = vrot.lane.b32.xlu1 %v7426_v17, %s6736_s26  ;;  %3295 = vrot.lane.b32.xlu0 %v8048_v46, %s6728_s9  ;;  %v8544_v17 = vld [vmem:[#allocation19_spill] sm:$0xff] }
0x1301   : > { %1834 = vrot.lane.b32.xlu1 %v7604_v30, %s6734_s14  ;;  %1337 = vrot.lane.b32.xlu0 %v7418_v9, %s6736_s26  ;;  %v8541_v9 = vld [vmem:[#allocation20_spill] sm:$0xff]  ;;  %v8550_v30 = vld [vmem:[#allocation21_spill] sm:$0xff] }
0x1305   : > { %3305 = vrot.lane.b32.xlu1 %v8054_v33, %s6728_s9  ;;  %1826 = vrot.lane.b32.xlu0 %v8538_v27, %s6734_s14 }
0x1309   : > { %3794 = vrot.lane.b32.xlu1 %v8200_v15, %s6726_s28  ;;  %3297 = vrot.lane.b32.xlu0 %v8539_v53, %s6728_s9 }
0x130d   : > { %1836 = vrot.lane.b32.xlu1 %v8540_v49, %s6734_s14  ;;  %3786 = vrot.lane.b32.xlu0 %v8192_v45, %s6726_s28 }
0x1311   : > { %2325 = vrot.lane.b32.xlu1 %v8541_v9, %s6732_s7  ;;  %1828 = vrot.lane.b32.xlu0 %v8542_v4, %s6734_s14 }
0x1315   : > { %3796 = vrot.lane.b32.xlu1 %v8198_v5, %s6726_s28  ;;  %2317 = vrot.lane.b32.xlu0 %v8543_v56, %s6732_s7 }
0x1319   : > { %2327 = vrot.lane.b32.xlu1 %v8544_v17, %s6732_s7  ;;  %3788 = vrot.lane.b32.xlu0 %v8190_v31, %s6726_s28 }
0x131d   : > { %2816 = vrot.lane.b32.xlu1 %v8545_v14, %s6730_s11  ;;  %2319 = vrot.lane.b32.xlu0 %v8546_v60, %s6732_s7  ;;  %s6738_s7 = smov [#allocation10]  }
0x131e   : > { %s6647_s8 = sshll.u32 %s6738_s7, 4  ;;  %s6648_s8 = int_to_ptr.vmem [resolvable:$false] %s6647_s8 }
0x131f   : > { %s6649_s14 = scalar_lea.vmem %s6648_s8, 2048 }
0x1321   : > { %2818 = vrot.lane.b32.xlu1 %v8547_v23, %s6730_s11  ;;  %2808 = vrot.lane.b32.xlu0 %v8548_v12, %s6730_s11 }
0x1325   : > { %3307 = vrot.lane.b32.xlu1 %v8549_v51, %s6728_s9  ;;  %2810 = vrot.lane.b32.xlu0 %v8550_v30, %s6730_s11 }
0x1329   : > { %3309 = vrot.lane.b32.xlu1 %v8551_v57, %s6728_s9  ;;  %3299 = vrot.lane.b32.xlu0 %v8552_v0, %s6728_s9 }
0x132d   : > { %3798 = vrot.lane.b32.xlu1 %v8204_v50, %s6726_s28  ;;  %3301 = vrot.lane.b32.xlu0 %v8553_v48, %s6728_s9 }
0x1331   : > { %3800 = vrot.lane.b32.xlu1 %v8202_v20, %s6726_s28  ;;  %3790 = vrot.lane.b32.xlu0 %v8196_v18, %s6726_s28 }
0x1335   : > { %3792 = vrot.lane.b32.xlu0 %v8194_v63, %s6726_s28  ;;  %s271_s28 = scalar_lea.vmem [#allocation10], %s4585_s6  ;;  %s4804_s6 = sshll.u32 %s6791_s22, 10 }
0x1336   : > { %s4484_s15 = sshll.u32 %s271_s28, 4  ;;  %s8452_s11 = scalar_lea.hbm %s8506_s5, %s4804_s6  ;;  %s8454_s15 = int_to_ptr.vmem [resolvable:$true] %s4484_s15 }
0x1337   : > { %s4471_s22 = scalar_lea.sflag [#allocation6], %s6948_s17  ;;  %s6643_s23 = scalar_lea.vmem %s8454_s15, 1024 }
0x1338   : > { %p6644_p11 = scmp.ne.s32.totalorder %s8454_s15, %s6643_s23  ;;  %p6650_p5 = scmp.lt.s32.totalorder %s8454_s15, %s6648_s8 }
0x1339   : > { %p6651_p9 = scmp.lt.s32.totalorder %s6649_s14, %s6643_s23 }
0x133a   : > { %p6645_p1 = pnand %p6644_p11, %p8554_p0 }
0x133b   : > { %v4073_v61 = vpop.xlane.xlu0 %4072  ;;  %p6652_p12 = por %p6651_p9, %p6650_p5 }
0x133c   : > { %v4070_v44 = vpop.xlane.xlu1 %4069  ;;  %p6646_p3 = pneg %p6645_p1 }
0x133d   : > { %6541 = vrcp.f32 %v4070_v44 }
0x133e   : > { %6543 = vrcp.f32 %v4073_v61  ;;  %p6653_p2 = pnand %p6652_p12, %p6646_p3 }
0x1340   : > { %v4076_v35 = vpop.xlane.xlu1 %4075 }
0x1341   : > { %6545 = vrcp.f32 %v4076_v35 }
0x1344   : > { %v4079_v58 = vpop.xlane.xlu0 %4078 }
0x1345   : > { %v4082_v43 = vpop.xlane.xlu1 %4081  ;;  %6547 = vrcp.f32 %v4079_v58 }
0x1346   : > { %6549 = vrcp.f32 %v4082_v43 }
0x1347   : > { %v6542_v10 = vpop.eup %6541 }
0x1348   : > { %v4085_v46 = vpop.xlane.xlu0 %4084  ;;  %v4093_v33 = vmul.f32 %v6542_v10, %v8218_v3  ;;  %v6544_v19 = vpop.eup %6543 }
0x1349   : > { %v6293_v11 = vpop.permute.xlu1 %6292  ;;  %6551 = vrcp.f32 %v4085_v46  ;;  %v4095_v28 = vmul.f32 %v6544_v19, %v8216_v62 }
0x134a   : > { %5513 = vmatprep.mubr.msk.f32.mxu0 %vm308_vm0, %v4093_v33  ;;  %v6295_v5 = vunpack.i.h.bf16 %v6293_v11  ;;  %v6294_v15 = vunpack.i.l.bf16 %v6293_v11 }
0x134b   : > { %v6546_v6 = vpop.eup %6545 }
0x134c   : > { %v4091_v16 = vpop.xlane.xlu0 %4090  ;;  %v5881_v40 = vpack.c.bf16 %v6295_v5, %v6294_v15  ;;  %v4097_v29 = vmul.f32 %v6546_v6, %v8224_v34  ;;  %v4325_v6 = vld [vmem:[#allocation9 + $0x38] sm:$0xff] }
0x134d   : > { %v6298_v31 = vpop.permute.xlu1 %6297 }
0x134e   : > { %v6300_v47 = vunpack.i.h.bf16 %v6298_v31  ;;  %v6299_v22 = vunpack.i.l.bf16 %v6298_v31 }
0x134f   : > { %v6548_v25 = vpop.eup %6547 }
0x1350   : > { %v4088_v45 = vpop.xlane.xlu0 %4087  ;;  %v5885_v32 = vpack.c.bf16 %v6300_v47, %v6299_v22  ;;  %v6550_v38 = vpop.eup %6549  ;;  %v4099_v24 = vmul.f32 %v6548_v25, %v8228_v42  ;;  %v4320_v22 = vld [vmem:[#allocation9 + $0x10] sm:$0xff] }
0x1351   : > { %v1332_v18 = vpop.permute.xlu1 %1331  ;;  %6553 = vrcp.f32 %v4088_v45  ;;  %v4101_v62 = vmul.f32 %v6550_v38, %v8230_v55 }
0x1352   : > { %1356 = vst.msk [vmem:[#allocation3] sm:$0xff] %vm1355_vm3, %v1332_v18  ;;  %6555 = vrcp.f32 %v4091_v16 }
0x1353   : > { %v6552_v13 = vpop.eup %6551 }
0x1354   : > { %v6288_v63 = vpop.permute.xlu0 %6287  ;;  %v4103_v53 = vmul.f32 %v6552_v13, %v8236_v54 }
0x1355   : > { %v6290_v20 = vunpack.i.h.bf16 %v6288_v63  ;;  %v6289_v50 = vunpack.i.l.bf16 %v6288_v63  ;;  %v1340_v41 = vpop.permute.xlu1 %1339 }
0x1356   : > { %1360 = vst.msk [vmem:[#allocation3 + $0x20] sm:$0xff] %vm1355_vm3, %v1340_v41 }
0x1357   : > { %v5877_v3 = vpack.c.bf16 %v6290_v20, %v6289_v50 }
0x1358   : > { %v1334_v37 = vpop.permute.xlu0 %1333 }
0x1359   : > { %1357 = vst.msk [vmem:[#allocation3 + $0x8] sm:$0xff] %vm1355_vm3, %v1334_v37  ;;  %v1342_v8 = vpop.permute.xlu1 %1341  ;;  %5878 = vmatprep.subr.bf16.mxu0 %v5877_v3  ;;  %v4318_v37 = vld [vmem:[#allocation9] sm:$0xff] }
0x135a   : > { %1361 = vst.msk [vmem:[#allocation3 + $0x28] sm:$0xff] %vm1355_vm3, %v1342_v8  ;;  %5880 = vmatpush3.bf16.msra.mxu0 %v5877_v3  ;;  %v4321_v8 = vld [vmem:[#allocation9 + $0x18] sm:$0xff] }
0x135b   : > { %5882 = vmatprep.subr.bf16.mxu0 %v5881_v40  ;;  %v6554_v27 = vpop.eup %6553 }
0x135c   : > { %v1823_v1 = vpop.permute.xlu0 %1822  ;;  %v6556_v49 = vpop.eup %6555  ;;  %v4105_v42 = vmul.f32 %v6554_v27, %v8244_v7 }
0x135d   : > { %1847 = vst.msk [vmem:[#allocation3] sm:$0xff] %vm1846_vm4, %v1823_v1  ;;  %v1831_v26 = vpop.permute.xlu1 %1830  ;;  %v4107_v4 = vmul.f32 %v6556_v49, %v8240_v52  ;;  %v5893_v1 = vpack.c.bf16 %v4321_v8, %v4320_v22 }
0x135e   : > { %1851 = vst.msk [vmem:[#allocation3 + $0x20] sm:$0xff] %vm1846_vm4, %v1831_v26  ;;  %5884 = vmatpush3.bf16.msra.mxu0 %v5881_v40  ;;  %v4319_v40 = vld [vmem:[#allocation9 + $0x8] sm:$0xff] }
0x135f   : > { %5886 = vmatprep.subr.bf16.mxu0 %v5885_v32  ;;  %v5889_v47 = vpack.c.bf16 %v4319_v40, %v4318_v37  ;;  %v4323_v26 = vld [vmem:[#allocation9 + $0x28] sm:$0xff] }
0x1360   : > { %v1825_v21 = vpop.permute.xlu0 %1824 }
0x1361   : > { %1848 = vst.msk [vmem:[#allocation3 + $0x8] sm:$0xff] %vm1846_vm4, %v1825_v21  ;;  %v1833_v36 = vpop.permute.xlu1 %1832  ;;  %5905 = vmatprep.subr.bf16.mxu1 %v5889_v47  ;;  %v4324_v21 = vld [vmem:[#allocation9 + $0x30] sm:$0xff] }
0x1362   : > { %1852 = vst.msk [vmem:[#allocation3 + $0x28] sm:$0xff] %vm1846_vm4, %v1833_v36  ;;  %5888 = vmatpush3.bf16.msra.mxu0 %v5885_v32  ;;  %5909 = vmatpush3.bf16.msra.mxu1 %v5889_v47  ;;  %v4322_v32 = vld [vmem:[#allocation9 + $0x20] sm:$0xff]  ;;  %v5901_v36 = vpack.c.bf16 %v4325_v6, %v4324_v21 }
0x1363   : > { %5890 = vmatprep.subr.bf16.mxu0 %v5889_v47  ;;  %5906 = vmatprep.subr.bf16.mxu1 %v5893_v1  ;;  %v5897_v19 = vpack.c.bf16 %v4323_v26, %v4322_v32 }
0x1364   : > { %v2314_v2 = vpop.permute.xlu0 %2313 }
0x1365   : > { %2338 = vst.msk [vmem:[#allocation3] sm:$0xff] %vm2337_vm5, %v2314_v2  ;;  %v2322_v59 = vpop.permute.xlu1 %2321  ;;  %5514 = vmatmul.mubr.msk.f32.vlgmr.msra.gmra.mrb[72].mxu0 %vm308_vm0, %v4095_v28 }
0x1366   : > { %2342 = vst.msk [vmem:[#allocation3 + $0x20] sm:$0xff] %vm2337_vm5, %v2322_v59  ;;  %5516 = vmatprep.mubr.msk.f32.mxu0 %vm308_vm0, %v4097_v29  ;;  %5892 = vmatpush3.bf16.msra.mxu0 %v5889_v47 }
0x1367   : > { %5894 = vmatprep.subr.bf16.mxu0 %v5893_v1  ;;  %5910 = vmatpush3.bf16.msra.mxu1 %v5893_v1 }
0x1368   : > { %v2316_v39 = vpop.permute.xlu0 %2315  ;;  %5907 = vmatprep.subr.bf16.mxu1 %v5897_v19 }
0x1369   : > { %2339 = vst.msk [vmem:[#allocation3 + $0x8] sm:$0xff] %vm2337_vm5, %v2316_v39  ;;  %v2324_v34 = vpop.permute.xlu1 %2323  ;;  %5517 = vmatmul.mubr.msk.f32.gmra.mrb[74].mxu0 %vm308_vm0, %v4099_v24 }
0x136a   : > { %2343 = vst.msk [vmem:[#allocation3 + $0x28] sm:$0xff] %vm2337_vm5, %v2324_v34  ;;  %5519 = vmatprep.mubr.msk.f32.mxu0 %vm308_vm0, %v4101_v62  ;;  %5896 = vmatpush3.bf16.msra.mxu0 %v5893_v1 }
0x136b   : > { %5898 = vmatprep.subr.bf16.mxu0 %v5897_v19  ;;  %5911 = vmatpush3.bf16.msra.mxu1 %v5897_v19 }
0x136c   : > { %v2805_v9 = vpop.permute.xlu0 %2804  ;;  %5908 = vmatprep.subr.bf16.mxu1 %v5901_v36 }
0x136d   : > { %2829 = vst.msk [vmem:[#allocation3] sm:$0xff] %vm2828_vm6, %v2805_v9  ;;  %v2813_v55 = vpop.permute.xlu1 %2812  ;;  %5520 = vmatmul.mubr.msk.f32.gmra.mrb[76].mxu0 %vm308_vm0, %v4103_v53 }
0x136e   : > { %2833 = vst.msk [vmem:[#allocation3 + $0x20] sm:$0xff] %vm2828_vm6, %v2813_v55  ;;  %5522 = vmatprep.mubr.msk.f32.mxu0 %vm308_vm0, %v4105_v42  ;;  %5900 = vmatpush3.bf16.msra.mxu0 %v5897_v19 }
0x136f   : > { %5902 = vmatprep.subr.bf16.mxu0 %v5901_v36  ;;  %5912 = vmatpush3.bf16.msra.mxu1 %v5901_v36 }
0x1370   : > { %v1336_v56 = vpop.permute.xlu0 %1335 }
0x1371   : > { %1358 = vst.msk [vmem:[#allocation3 + $0x10] sm:$0xff] %vm1355_vm3, %v1336_v56  ;;  %v1344_v17 = vpop.permute.xlu1 %1343  ;;  %5523 = vmatmul.mubr.msk.f32.gmra.mrb[78].mxu0 %vm308_vm0, %v4107_v4 }
0x1372   : > { %1362 = vst.msk [vmem:[#allocation3 + $0x30] sm:$0xff] %vm1355_vm3, %v1344_v17  ;;  %5904 = vmatpush3.bf16.msra.mxu0 %v5901_v36 }
0x1374   : > { %v2807_v54 = vpop.permute.xlu0 %2806 }
0x1375   : > { %2830 = vst.msk [vmem:[#allocation3 + $0x8] sm:$0xff] %vm2828_vm6, %v2807_v54  ;;  %v2815_v7 = vpop.permute.xlu1 %2814 }
0x1376   : > { %2834 = vst.msk [vmem:[#allocation3 + $0x28] sm:$0xff] %vm2828_vm6, %v2815_v7 }
0x1378   : > { %v3296_v14 = vpop.permute.xlu0 %3295 }
0x1379   : > { %3320 = vst.msk [vmem:[#allocation3] sm:$0xff] %vm3319_vm7, %v3296_v14  ;;  %v3304_v60 = vpop.permute.xlu1 %3303 }
0x137a   : > { %3324 = vst.msk [vmem:[#allocation3 + $0x20] sm:$0xff] %vm3319_vm7, %v3304_v60 }
0x137c   : > { %v1338_v52 = vpop.permute.xlu0 %1337 }
0x137d   : > { %1359 = vst.msk [vmem:[#allocation3 + $0x18] sm:$0xff] %vm1355_vm3, %v1338_v52  ;;  %v1346_v23 = vpop.permute.xlu1 %1345  ;;  %v4789_v52 = vld [vmem:[%s8505_s4] ss:$0 sm:$0xff] }
0x137e   : > { %1363 = vst.msk [vmem:[#allocation3 + $0x38] sm:$0xff] %vm1355_vm3, %v1346_v23 }
0x1380   : > { %v1827_v12 = vpop.permute.xlu0 %1826 }
0x1381   : > { %1849 = vst.msk [vmem:[#allocation3 + $0x10] sm:$0xff] %vm1846_vm4, %v1827_v12  ;;  %v1835_v51 = vpop.permute.xlu1 %1834 }
0x1382   : > { %1853 = vst.msk [vmem:[#allocation3 + $0x30] sm:$0xff] %vm1846_vm4, %v1835_v51 }
0x1384   : > { %v3298_v30 = vpop.permute.xlu0 %3297 }
0x1385   : > { %3321 = vst.msk [vmem:[#allocation3 + $0x8] sm:$0xff] %vm3319_vm7, %v3298_v30  ;;  %v3306_v57 = vpop.permute.xlu1 %3305 }
0x1386   : > { %3325 = vst.msk [vmem:[#allocation3 + $0x28] sm:$0xff] %vm3319_vm7, %v3306_v57 }
0x1388   : > { %v3787_v0 = vpop.permute.xlu0 %3786 }
0x1389   : > { %3811 = vst.msk [vmem:[#allocation3] sm:$0xff] %vm3810_vm8, %v3787_v0  ;;  %v3795_v48 = vpop.permute.xlu1 %3794 }
0x138a   : > { %3815 = vst.msk [vmem:[#allocation3 + $0x20] sm:$0xff] %vm3810_vm8, %v3795_v48 }
0x138c   : > { %v1829_v44 = vpop.permute.xlu0 %1828 }
0x138d   : > { %1850 = vst.msk [vmem:[#allocation3 + $0x18] sm:$0xff] %vm1846_vm4, %v1829_v44  ;;  %v1837_v61 = vpop.permute.xlu1 %1836 }
0x138e   : > { %1854 = vst.msk [vmem:[#allocation3 + $0x38] sm:$0xff] %vm1846_vm4, %v1837_v61 }
0x1390   : > { %v2318_v35 = vpop.permute.xlu0 %2317 }
0x1391   : > { %2340 = vst.msk [vmem:[#allocation3 + $0x10] sm:$0xff] %vm2337_vm5, %v2318_v35  ;;  %v2326_v58 = vpop.permute.xlu1 %2325 }
0x1392   : > { %2344 = vst.msk [vmem:[#allocation3 + $0x30] sm:$0xff] %vm2337_vm5, %v2326_v58 }
0x1394   : > { %v3789_v43 = vpop.permute.xlu0 %3788 }
0x1395   : > { %3812 = vst.msk [vmem:[#allocation3 + $0x8] sm:$0xff] %vm3810_vm8, %v3789_v43  ;;  %v3797_v10 = vpop.permute.xlu1 %3796 }
0x1396   : > { %3816 = vst.msk [vmem:[#allocation3 + $0x28] sm:$0xff] %vm3810_vm8, %v3797_v10 }
0x1398   : > { %v2320_v46 = vpop.permute.xlu0 %2319 }
0x1399   : > { %2341 = vst.msk [vmem:[#allocation3 + $0x18] sm:$0xff] %vm2337_vm5, %v2320_v46  ;;  %v2328_v33 = vpop.permute.xlu1 %2327 }
0x139a   : > { %2345 = vst.msk [vmem:[#allocation3 + $0x38] sm:$0xff] %vm2337_vm5, %v2328_v33 }
0x139c   : > { %v2809_v11 = vpop.permute.xlu0 %2808 }
0x139d   : > { %2831 = vst.msk [vmem:[#allocation3 + $0x10] sm:$0xff] %vm2828_vm6, %v2809_v11  ;;  %v2817_v16 = vpop.permute.xlu1 %2816 }
0x139e   : > { %2835 = vst.msk [vmem:[#allocation3 + $0x30] sm:$0xff] %vm2828_vm6, %v2817_v16 }
0x13a0   : > { %v2811_v31 = vpop.permute.xlu0 %2810 }
0x13a1   : > { %2832 = vst.msk [vmem:[#allocation3 + $0x18] sm:$0xff] %vm2828_vm6, %v2811_v31  ;;  %v2819_v45 = vpop.permute.xlu1 %2818 }
0x13a2   : > { %2836 = vst.msk [vmem:[#allocation3 + $0x38] sm:$0xff] %vm2828_vm6, %v2819_v45 }
0x13a4   : > { %v3300_v18 = vpop.permute.xlu0 %3299 }
0x13a5   : > { %3322 = vst.msk [vmem:[#allocation3 + $0x10] sm:$0xff] %vm3319_vm7, %v3300_v18  ;;  %v3308_v63 = vpop.permute.xlu1 %3307 }
0x13a6   : > { %3326 = vst.msk [vmem:[#allocation3 + $0x30] sm:$0xff] %vm3319_vm7, %v3308_v63 }
0x13a8   : > { %v3302_v5 = vpop.permute.xlu0 %3301 }
0x13a9   : > { %3323 = vst.msk [vmem:[#allocation3 + $0x18] sm:$0xff] %vm3319_vm7, %v3302_v5  ;;  %v3310_v15 = vpop.permute.xlu1 %3309 }
0x13aa   : > { %3327 = vst.msk [vmem:[#allocation3 + $0x38] sm:$0xff] %vm3319_vm7, %v3310_v15 }
0x13ac   : > { %v3791_v20 = vpop.permute.xlu0 %3790 }
0x13ad   : > { %3813 = vst.msk [vmem:[#allocation3 + $0x10] sm:$0xff] %vm3810_vm8, %v3791_v20  ;;  %v3799_v50 = vpop.permute.xlu1 %3798 }
0x13ae   : > { %3817 = vst.msk [vmem:[#allocation3 + $0x30] sm:$0xff] %vm3810_vm8, %v3799_v50 }
0x13b0   : > { %v3793_v41 = vpop.permute.xlu0 %3792 }
0x13b1   : > { %3814 = vst.msk [vmem:[#allocation3 + $0x18] sm:$0xff] %vm3810_vm8, %v3793_v41  ;;  %v3801_v3 = vpop.permute.xlu1 %3800 }
0x13b2   : > { %3818 = vst.msk [vmem:[#allocation3 + $0x38] sm:$0xff] %vm3810_vm8, %v3801_v3 }
0x1438   : > { %v5515_v28 = vpop.f32.mrb[72].mxu0 }
0x1439   : > { %4279 = vrot.lane.b32.xlu0 %v5515_v28, %s6724_s13  ;;  %v4230_v25 = vpop.f32.mrb[73].mxu0 }
0x143c   : > { %v5518_v2 = vpop.f32.mrb[74].mxu0 }
0x143d   : > { %4277 = vrot.lane.b32.xlu0 %v4230_v25, %s6724_s13  ;;  %v4240_v29 = vpop.f32.mrb[75].mxu0 }
0x1440   : > { %v5521_v38 = vpop.f32.mrb[76].mxu0 }
0x1441   : > { %4281 = vrot.lane.b32.xlu0 %v4240_v29, %s6724_s13  ;;  %4287 = vrot.lane.b32.xlu1 %v5521_v38, %s6724_s13  ;;  %v4250_v59 = vpop.f32.mrb[77].mxu0 }
0x1444   : > { %v5524_v24 = vpop.f32.mrb[78].mxu0 }
0x1445   : > { %4283 = vrot.lane.b32.xlu0 %v5518_v2, %s6724_s13  ;;  %4285 = vrot.lane.b32.xlu1 %v4250_v59, %s6724_s13  ;;  %v4260_v13 = vpop.f32.mrb[79].mxu0 }
0x1449   : > { %4289 = vrot.lane.b32.xlu1 %v4260_v13, %s6724_s13 }
0x144d   : > { %4291 = vrot.lane.b32.xlu1 %v5524_v24, %s6724_s13 }
0x14ab   : > { %v4280_v39 = vpop.permute.xlu0 %4279 }
0x14ac   : > { %4303 = vst.msk [vmem:[#allocation3 + $0x8] sm:$0xff] %vm4301_vm9, %v4280_v39 }
0x14af   : > { %v4278_v62 = vpop.permute.xlu0 %4277 }
0x14b0   : > { %4302 = vst.msk [vmem:[#allocation3] sm:$0xff] %vm4301_vm9, %v4278_v62 }
0x14b3   : > { %v4282_v27 = vpop.permute.xlu0 %4281  ;;  %v4288_v34 = vpop.permute.xlu1 %4287  ;;  %v4311_v42 = vld [vmem:[#allocation3 + $0x8] sm:$0xff] }
0x14b4   : > { %4304 = vst.msk [vmem:[#allocation3 + $0x10] sm:$0xff] %vm4301_vm9, %v4282_v27  ;;  %4307 = vst.msk [vmem:[#allocation3 + $0x28] sm:$0xff] %vm4301_vm9, %v4288_v34 }
0x14b7   : > { %v4284_v53 = vpop.permute.xlu0 %4283  ;;  %v4286_v49 = vpop.permute.xlu1 %4285  ;;  %v4310_v9 = vld [vmem:[#allocation3] sm:$0xff] }
0x14b8   : > { %4305 = vst.msk [vmem:[#allocation3 + $0x18] sm:$0xff] %vm4301_vm9, %v4284_v53  ;;  %4306 = vst.msk [vmem:[#allocation3 + $0x20] sm:$0xff] %vm4301_vm9, %v4286_v49  ;;  %5541 = vmatprep.mubr.msk.f32.mxu0 %vm308_vm0, %v4310_v9 }
0x14b9   : > { %5542 = vmatmul.mubr.msk.f32.vlgmr.msra.gmra.mrb[80].mxu0 %vm308_vm0, %v4311_v42 }
0x14bb   : > { %v4290_v55 = vpop.permute.xlu1 %4289  ;;  %v4312_v4 = vld [vmem:[#allocation3 + $0x10] sm:$0xff]  ;;  %v4315_v7 = vld [vmem:[#allocation3 + $0x28] sm:$0xff] }
0x14bc   : > { %4308 = vst.msk [vmem:[#allocation3 + $0x30] sm:$0xff] %vm4301_vm9, %v4290_v55  ;;  %5544 = vmatprep.mubr.msk.f32.mxu0 %vm308_vm0, %v4312_v4 }
0x14bf   : > { %v4292_v56 = vpop.permute.xlu1 %4291  ;;  %v4313_v17 = vld [vmem:[#allocation3 + $0x18] sm:$0xff]  ;;  %v4314_v54 = vld [vmem:[#allocation3 + $0x20] sm:$0xff] }
0x14c0   : > { %4309 = vst.msk [vmem:[#allocation3 + $0x38] sm:$0xff] %vm4301_vm9, %v4292_v56  ;;  %5545 = vmatmul.mubr.msk.f32.gmra.mrb[82].mxu0 %vm308_vm0, %v4313_v17  ;;  %5547 = vmatprep.mubr.msk.f32.mxu1 %vm308_vm0, %v4314_v54 }
0x14c1   : > { %5548 = vmatmul.mubr.msk.f32.vlgmr.msra.gmra.mrb[64].mxu1 %vm308_vm0, %v4315_v7 }
0x14c3   : > { %v4316_v14 = vld [vmem:[#allocation3 + $0x30] sm:$0xff] }
0x14c4   : > { %5550 = vmatprep.mubr.msk.f32.mxu1 %vm308_vm0, %v4316_v14 }
0x14c7   : > { %v4317_v60 = vld [vmem:[#allocation3 + $0x38] sm:$0xff] }
0x14c8   : > { %5551 = vmatmul.mubr.msk.f32.gmra.mrb[66].mxu1 %vm308_vm0, %v4317_v60 }
0x158c   : > { %v5543_v23 = vpop.f32.mrb[80].mxu0 }
0x158d   : > { %v4429_v12 = vadd.f32 %v5543_v23, %v4789_v52  ;;  %v4423_v51 = vpop.f32.mrb[81].mxu0 }
0x158e   : > { %v4424_v30 = vadd.f32 %v4789_v52, %v4423_v51 }
0x158f   : > { %4463 = vst.msk [vmem:[%s271_s28 + $0x8] sm:$0xff] %vm308_vm0, %v4429_v12 }
0x1590   : > { %4462 = vst.msk [vmem:[%s271_s28] sm:$0xff] %vm308_vm0, %v4424_v30 }
0x1593   : > { %v5546_v57 = vpop.f32.mrb[82].mxu0 }
0x1594   : > { %v4439_v0 = vadd.f32 %v5546_v57, %v4789_v52  ;;  %v4433_v48 = vpop.f32.mrb[83].mxu0  ;;  %v5549_v44 = vpop.f32.mrb[64].mxu1 }
0x1595   : > { %v4434_v61 = vadd.f32 %v4789_v52, %v4433_v48  ;;  %v4449_v35 = vadd.f32 %v5549_v44, %v4789_v52  ;;  %v4443_v58 = vpop.f32.mrb[65].mxu1 }
0x1596   : > { %4465 = vst.msk [vmem:[%s271_s28 + $0x18] sm:$0xff] %vm308_vm0, %v4439_v0  ;;  %v4444_v43 = vadd.f32 %v4789_v52, %v4443_v58 }
0x1597   : > { %4464 = vst.msk [vmem:[%s271_s28 + $0x10] sm:$0xff] %vm308_vm0, %v4434_v61  ;;  %4467 = vst.msk [vmem:[%s271_s28 + $0x28] sm:$0xff] %vm308_vm0, %v4449_v35 }
0x1598   : > { %4466 = vst.msk [vmem:[%s271_s28 + $0x20] sm:$0xff] %vm308_vm0, %v4444_v43 }
0x159b   : > { %v5552_v10 = vpop.f32.mrb[66].mxu1 }
0x159c   : > { %v4459_v46 = vadd.f32 %v5552_v10, %v4789_v52  ;;  %v4453_v33 = vpop.f32.mrb[67].mxu1 }
0x159d   : > { %v4454_v11 = vadd.f32 %v4789_v52, %v4453_v33 }
0x159e   : > { %4469 = vst.msk [vmem:[%s271_s28 + $0x38] sm:$0xff] %vm308_vm0, %v4459_v46 }
0x159f   : > { %4468 = vst.msk [vmem:[%s271_s28 + $0x30] sm:$0xff] %vm308_vm0, %v4454_v11 }
0x15a0   : > { %6656 = shalt.err (!%p6653_p2)
}
0x15a1   : > { %s6657_s24 = scalar_lea.hbm %s8452_s11, 1024  ;;  %s6661_s10 = scalar_lea.hbm %s8506_s5, 2048 }
0x15a2   : > { %p6658_p13 = scmp.ne.s32.totalorder %s8452_s11, %s6657_s24  ;;  %p6662_p4 = scmp.lt.u32.totalorder %s8452_s11, %s8506_s5 }
0x15a3   : > { %p6663_p7 = scmp.lt.u32.totalorder %s6661_s10, %s6657_s24  ;;  %p6665_p11 = scmp.lt.u32.totalorder %s6657_s24, %s8452_s11 }
0x15a4   : > { %p6659_p6 = pnand %p6658_p13, %p8554_p0 }
0x15a5   : > { %p6664_p8 = por %p6663_p7, %p6662_p4 }
0x15a6   : > { %p6660_p10 = pneg %p6659_p6 }
0x15a7   : > { %p6666_p1 = por %p6665_p11, %p6664_p8 }
0x15a9   : > { %p6667_p3 = pnand %p6666_p1, %p6660_p10 }
0x15ab   : > { %6670 = shalt.err (!%p6667_p3)
}
0x15ac   : > { %s6739_s9 = smov 128  }
0x15ad   : > { %5923 = dma.vmem_to_hbm [thread:$0]  (%p8554_p0), %s8454_s15, 1024, %s8452_s11, %s4471_s22, %s6739_s9, %s6739_s9, %s6736_s26  }
0x15ae PF: > { %s4499_s30 = sand.u32 1, %s6701_s18   ;;  %p8555_p5 = scmp.ne.s32.totalorder %s8511_s25, 0 }
0x15af   : > { %p8556_p9 = scmp.ge.s32.totalorder %s6713_s21, 2  ;;  %s4500_s23 = scalar_lea.sflag [#allocation6], %s4499_s30 }
0x15b1   : > { %p5937_p12 = pnand %p8556_p9, %p8555_p5 }
0x15b3   : > { %6696 = dma.done.wait (!%p5937_p12), %s4500_s23, 1024  }
0x15b4   : > { %6698 = vsyncadd (!%p5937_p12), %s4500_s23, 4294966272  ;;  %p19_p2 = scmp.ge.s32.totalorder %s6883_s16, 4   ;;  %s8557_s18 = smov %s6705_s19 }
0x15b5   : > { %s8558_s19 = smov %s6709_s20  ;;  %s8559_s20 = smov %s6892_s27 }
0x15b6   : > { %s8560_s21 = smov %s6883_s16  ;;  %21 = sbr.rel (!%p19_p2) target bundleno = 6 (0x6), region = 93 }
0x15bd   :  { %4505 = vsyncpa [#allocation5], 1 }
0x15be   :  { %4507 = vsyncpa [#allocation5 + $0x1], 1 }
0x15bf   :  { %4508 = vsyncpa [#allocation8], 1 }
0x15c0   :  { %4509 = vsyncpa [#allocation6], 1 }
0x15c1   :  { %4511 = vsyncpa [#allocation6 + $0x1], 1 }

</bundles_post_ra>
